<compile_context>
chip_gen: v5e
topology: v5e:2x2
jax: 0.10.0
libtpu: 0.0.40
codegen_flags: <defaults>
</compile_context>

<pallas_src>
import functools

import jax
import jax.numpy as jnp
import numpy as np
from jax.experimental import pallas as pl
from jax.experimental.pallas import tpu as pltpu

KSIZE = 3
PAD = 1
LANES = 128


def _round_up(x, m):
    return (x + m - 1) // m * m


def _conv_relu_pool_kernel(x_ref, w_ref, b_ref, o_ref, *, hh, wh, wb):
    """Fused 3x3 conv (stride 1, pad 1) + bias + ReLU + 2x2 max-pool.

    x_ref: (4, Hb*Wb, Cin_p) bf16 -- 4 input phases (row/col parity) of the
                                     zero-padded image, each flattened
                                     row-major with padded width Wb.
    w_ref: (9, Cin_p, Cp)    bf16 -- tap-major weights, Cout zero-padded to Cp.
    b_ref: (1, Cp)           f32
    o_ref: (hh, wh, Cp)      output block (pooled spatial, lane-dense channels)
    """
    m_rows = hh * wb
    cp = w_ref.shape[-1]

    pooled = None
    for ph in range(2):                 # output-phase row parity
        for pw in range(2):             # output-phase col parity
            acc = jnp.zeros((m_rows, cp), jnp.float32)
            for kh in range(KSIZE):
                rh, ah = (ph + kh) & 1, (ph + kh) >> 1
                for kw in range(KSIZE):
                    rw, aw = (pw + kw) & 1, (pw + kw) >> 1
                    p_in = rh * 2 + rw              # which input phase
                    off = ah * wb + aw              # flat tap offset (static)
                    lhs = x_ref[p_in, pl.ds(off, m_rows), :]
                    acc = acc + jnp.dot(
                        lhs, w_ref[kh * KSIZE + kw],
                        preferred_element_type=jnp.float32)
            pooled = acc if pooled is None else jnp.maximum(pooled, acc)

    # Pool first (above), then bias + ReLU on the pooled block: identical
    # result since max(a+b, c+b) = max(a, c) + b and ReLU is monotone.
    y = jnp.maximum(pooled + b_ref[...], 0.0).astype(o_ref.dtype)
    y = y.reshape(hh, wb, cp)           # Wb % 8 == 0 -> tile-aligned split
    o_ref[...] = y[:, :wh, :]           # drop padded garbage columns


def conv_layer_forward(x_nchw, weight_oihw, bias):
    """Pallas equivalent of ConvLayer.forward (kernel_size=3, stride=1, pad=1)."""
    n, cin, h, w = x_nchw.shape
    cout = weight_oihw.shape[0]
    assert h % 2 == 0 and w % 2 == 0, "MaxPool2d(2) path assumes even H, W"

    hh, wh = h // 2, w // 2
    wb = _round_up(wh + 1, 8)                 # per-phase width (+1 halo col, aligned)
    hb = hh + 2                               # per-phase rows (+1 halo, +1 slack)
    cin_p = _round_up(cin, 8)                 # sublane-aligned K
    cp = _round_up(max(cout, LANES), LANES)   # lane-dense output channels

    # ---- wrapper-side layout plumbing (O(input) bytes, no im2col blow-up) ----
    x_nhwc = jnp.transpose(x_nchw, (0, 2, 3, 1))
    xp = jnp.pad(
        x_nhwc,
        ((0, 0), (PAD, 2 * hb - h - PAD), (PAD, 2 * wb - w - PAD), (0, cin_p - cin)))
    # 4 input phases (row/col parity of the padded image), each (N, hb, wb, cin_p)
    phases = jnp.stack(
        [xp[:, rh::2, rw::2, :] for rh in range(2) for rw in range(2)], axis=1)
    x_ph = phases.reshape(n, 4, hb * wb, cin_p).astype(jnp.bfloat16)

    # weights: OIHW -> (kh, kw, cin, cout) -> (9, cin_p, cp) bf16, zero-padded
    w_t = jnp.transpose(weight_oihw, (2, 3, 1, 0)).reshape(KSIZE * KSIZE, cin, cout)
    w_p = jnp.zeros((KSIZE * KSIZE, cin_p, cp), jnp.float32)
    w_p = w_p.at[:, :cin, :cout].set(w_t.astype(jnp.float32)).astype(jnp.bfloat16)
    b_p = jnp.zeros((1, cp), jnp.float32).at[:, :cout].set(bias.astype(jnp.float32))

    kernel = functools.partial(_conv_relu_pool_kernel, hh=hh, wh=wh, wb=wb)

    out_itemsize = jnp.dtype(x_nchw.dtype).itemsize
    flops = 2 * n * 4 * KSIZE * KSIZE * (hh * wb) * cin_p * cp
    bytes_accessed = (n * 4 * hb * wb * cin_p * 2          # bf16 input phases
                      + KSIZE * KSIZE * cin_p * cp * 2     # bf16 weights
                      + cp * 4                             # bias
                      + n * hh * wh * cp * out_itemsize)   # output

    out = pl.pallas_call(
        kernel,
        out_shape=jax.ShapeDtypeStruct((n, hh, wh, cp), x_nchw.dtype),
        grid_spec=pltpu.PrefetchScalarGridSpec(
            num_scalar_prefetch=0,
            grid=(n,),
            in_specs=[
                pl.BlockSpec((None, 4, hb * wb, cin_p), lambda i: (i, 0, 0, 0)),
                pl.BlockSpec((KSIZE * KSIZE, cin_p, cp), lambda i: (0, 0, 0)),
                pl.BlockSpec((1, cp), lambda i: (0, 0)),
            ],
            out_specs=pl.BlockSpec((None, hh, wh, cp), lambda i: (i, 0, 0, 0)),
        ),
        compiler_params=pltpu.CompilerParams(
            dimension_semantics=("parallel",)),
        cost_estimate=pl.CostEstimate(
            flops=flops, transcendentals=0, bytes_accessed=bytes_accessed),
    )(x_ph, w_p, b_p)

    # (N, H/2, W/2, Cp) -> keep real channels -> NCHW
    return out[:, :, :, :cout].transpose(0, 3, 1, 2)


def _reference_forward(x_nchw, weight_oihw, bias):
    y = jax.lax.conv_general_dilated(
        x_nchw, weight_oihw, window_strides=(1, 1),
        padding=((PAD, PAD), (PAD, PAD)),
        dimension_numbers=("NCHW", "OIHW", "NCHW"))
    y = y + bias.reshape(1, -1, 1, 1)
    y = jnp.maximum(y, 0.0)
    return jax.lax.reduce_window(
        y, -jnp.inf, jax.lax.max,
        window_dimensions=(1, 1, 2, 2), window_strides=(1, 1, 2, 2),
        padding="VALID")


if __name__ == "__main__":
    key = jax.random.PRNGKey(0)
    kx, kw, kb = jax.random.split(key, 3)

    n, cin, cout, h, w = 2, 4, 8, 16, 16
    x = jax.random.normal(kx, (n, cin, h, w), dtype=jnp.float32)
    weight = 0.1 * jax.random.normal(kw, (cout, cin, KSIZE, KSIZE), dtype=jnp.float32)
    bias = 0.1 * jax.random.normal(kb, (cout,), dtype=jnp.float32)

    out = conv_layer_forward(x, weight, bias)
    out = jax.block_until_ready(out)

    ref = _reference_forward(x, weight, bias)
    np.testing.assert_allclose(np.asarray(out), np.asarray(ref), rtol=5e-2, atol=5e-2)
    assert out.shape == (n, cout, h // 2, w // 2)
    print("KERNEL_OK")
</pallas_src>

<mosaic_0001>
module attributes {stable_mosaic.version = 11 : i64} {
  func.func @_conv_relu_pool_kernel(%arg0: i32, %arg1: memref<1x4x160x8xbf16, #tpu.memory_space<vmem>>, %arg2: memref<9x8x128xbf16, #tpu.memory_space<vmem>>, %arg3: memref<1x128xf32, #tpu.memory_space<vmem>>, %arg4: memref<1x8x8x128xf32, #tpu.memory_space<vmem>>) attributes {dimension_semantics = [#tpu.dimension_semantics<parallel>], iteration_bounds = array<i64: 2>, scalar_prefetch = 0 : i64, scratch_operands = 0 : i64, tpu.core_type = #tpu.core_type<tc>, window_params = [{transform_indices = @transform_0, window_bounds = array<i64: 1, 4, 160, 8>}, {pipeline_mode = #tpu.pipeline_mode<synchronous>, transform_indices = @transform_1, window_bounds = array<i64: 9, 8, 128>}, {pipeline_mode = #tpu.pipeline_mode<synchronous>, transform_indices = @transform_2, window_bounds = array<i64: 1, 128>}, {transform_indices = @transform_3, window_bounds = array<i64: 1, 8, 8, 128>}]} {
    %cst = arith.constant 0.000000e+00 : f32
    %0 = vector.broadcast %cst : f32 to vector<128x128xf32>
    %c0 = arith.constant 0 : index
    %c0_0 = arith.constant 0 : index
    %c0_1 = arith.constant 0 : index
    %c0_2 = arith.constant 0 : index
    %1 = vector.load %arg1[%c0, %c0_0, %c0_1, %c0_2] : memref<1x4x160x8xbf16, #tpu.memory_space<vmem>>, vector<1x1x128x8xbf16>
    %2 = vector.shape_cast %1 : vector<1x1x128x8xbf16> to vector<128x8xbf16>
    %c0_3 = arith.constant 0 : index
    %c0_4 = arith.constant 0 : index
    %c0_5 = arith.constant 0 : index
    %3 = vector.load %arg2[%c0_3, %c0_4, %c0_5] : memref<9x8x128xbf16, #tpu.memory_space<vmem>>, vector<1x8x128xbf16>
    %4 = vector.shape_cast %3 : vector<1x8x128xbf16> to vector<8x128xbf16>
    %cst_6 = arith.constant dense<0.000000e+00> : vector<128x128xf32>
    %5 = tpu.matmul %2, %4, %cst_6 {dimension_numbers = #tpu.dot_dimension_numbers<[1], [0], [0], [1], [0, 0, 1, 1], [], []>} : vector<128x8xbf16>, vector<8x128xbf16>, vector<128x128xf32> -> vector<128x128xf32>
    %6 = arith.addf %0, %5 : vector<128x128xf32>
    %c0_7 = arith.constant 0 : index
    %c1 = arith.constant 1 : index
    %c0_8 = arith.constant 0 : index
    %c0_9 = arith.constant 0 : index
    %7 = vector.load %arg1[%c0_7, %c1, %c0_8, %c0_9] : memref<1x4x160x8xbf16, #tpu.memory_space<vmem>>, vector<1x1x128x8xbf16>
    %8 = vector.shape_cast %7 : vector<1x1x128x8xbf16> to vector<128x8xbf16>
    %c1_10 = arith.constant 1 : index
    %c0_11 = arith.constant 0 : index
    %c0_12 = arith.constant 0 : index
    %9 = vector.load %arg2[%c1_10, %c0_11, %c0_12] : memref<9x8x128xbf16, #tpu.memory_space<vmem>>, vector<1x8x128xbf16>
    %10 = vector.shape_cast %9 : vector<1x8x128xbf16> to vector<8x128xbf16>
    %cst_13 = arith.constant dense<0.000000e+00> : vector<128x128xf32>
    %11 = tpu.matmul %8, %10, %cst_13 {dimension_numbers = #tpu.dot_dimension_numbers<[1], [0], [0], [1], [0, 0, 1, 1], [], []>} : vector<128x8xbf16>, vector<8x128xbf16>, vector<128x128xf32> -> vector<128x128xf32>
    %12 = arith.addf %6, %11 : vector<128x128xf32>
    %c0_14 = arith.constant 0 : index
    %c0_15 = arith.constant 0 : index
    %c1_16 = arith.constant 1 : index
    %c0_17 = arith.constant 0 : index
    %13 = vector.load %arg1[%c0_14, %c0_15, %c1_16, %c0_17] : memref<1x4x160x8xbf16, #tpu.memory_space<vmem>>, vector<1x1x128x8xbf16>
    %14 = vector.shape_cast %13 : vector<1x1x128x8xbf16> to vector<128x8xbf16>
    %c2 = arith.constant 2 : index
    %c0_18 = arith.constant 0 : index
    %c0_19 = arith.constant 0 : index
    %15 = vector.load %arg2[%c2, %c0_18, %c0_19] : memref<9x8x128xbf16, #tpu.memory_space<vmem>>, vector<1x8x128xbf16>
    %16 = vector.shape_cast %15 : vector<1x8x128xbf16> to vector<8x128xbf16>
    %cst_20 = arith.constant dense<0.000000e+00> : vector<128x128xf32>
    %17 = tpu.matmul %14, %16, %cst_20 {dimension_numbers = #tpu.dot_dimension_numbers<[1], [0], [0], [1], [0, 0, 1, 1], [], []>} : vector<128x8xbf16>, vector<8x128xbf16>, vector<128x128xf32> -> vector<128x128xf32>
    %18 = arith.addf %12, %17 : vector<128x128xf32>
    %c0_21 = arith.constant 0 : index
    %c2_22 = arith.constant 2 : index
    %c0_23 = arith.constant 0 : index
    %c0_24 = arith.constant 0 : index
    %19 = vector.load %arg1[%c0_21, %c2_22, %c0_23, %c0_24] : memref<1x4x160x8xbf16, #tpu.memory_space<vmem>>, vector<1x1x128x8xbf16>
    %20 = vector.shape_cast %19 : vector<1x1x128x8xbf16> to vector<128x8xbf16>
    %c3 = arith.constant 3 : index
    %c0_25 = arith.constant 0 : index
    %c0_26 = arith.constant 0 : index
    %21 = vector.load %arg2[%c3, %c0_25, %c0_26] : memref<9x8x128xbf16, #tpu.memory_space<vmem>>, vector<1x8x128xbf16>
    %22 = vector.shape_cast %21 : vector<1x8x128xbf16> to vector<8x128xbf16>
    %cst_27 = arith.constant dense<0.000000e+00> : vector<128x128xf32>
    %23 = tpu.matmul %20, %22, %cst_27 {dimension_numbers = #tpu.dot_dimension_numbers<[1], [0], [0], [1], [0, 0, 1, 1], [], []>} : vector<128x8xbf16>, vector<8x128xbf16>, vector<128x128xf32> -> vector<128x128xf32>
    %24 = arith.addf %18, %23 : vector<128x128xf32>
    %c0_28 = arith.constant 0 : index
    %c3_29 = arith.constant 3 : index
    %c0_30 = arith.constant 0 : index
    %c0_31 = arith.constant 0 : index
    %25 = vector.load %arg1[%c0_28, %c3_29, %c0_30, %c0_31] : memref<1x4x160x8xbf16, #tpu.memory_space<vmem>>, vector<1x1x128x8xbf16>
    %26 = vector.shape_cast %25 : vector<1x1x128x8xbf16> to vector<128x8xbf16>
    %c4 = arith.constant 4 : index
    %c0_32 = arith.constant 0 : index
    %c0_33 = arith.constant 0 : index
    %27 = vector.load %arg2[%c4, %c0_32, %c0_33] : memref<9x8x128xbf16, #tpu.memory_space<vmem>>, vector<1x8x128xbf16>
    %28 = vector.shape_cast %27 : vector<1x8x128xbf16> to vector<8x128xbf16>
    %cst_34 = arith.constant dense<0.000000e+00> : vector<128x128xf32>
    %29 = tpu.matmul %26, %28, %cst_34 {dimension_numbers = #tpu.dot_dimension_numbers<[1], [0], [0], [1], [0, 0, 1, 1], [], []>} : vector<128x8xbf16>, vector<8x128xbf16>, vector<128x128xf32> -> vector<128x128xf32>
    %30 = arith.addf %24, %29 : vector<128x128xf32>
    %c0_35 = arith.constant 0 : index
    %c2_36 = arith.constant 2 : index
    %c1_37 = arith.constant 1 : index
    %c0_38 = arith.constant 0 : index
    %31 = vector.load %arg1[%c0_35, %c2_36, %c1_37, %c0_38] : memref<1x4x160x8xbf16, #tpu.memory_space<vmem>>, vector<1x1x128x8xbf16>
    %32 = vector.shape_cast %31 : vector<1x1x128x8xbf16> to vector<128x8xbf16>
    %c5 = arith.constant 5 : index
    %c0_39 = arith.constant 0 : index
    %c0_40 = arith.constant 0 : index
    %33 = vector.load %arg2[%c5, %c0_39, %c0_40] : memref<9x8x128xbf16, #tpu.memory_space<vmem>>, vector<1x8x128xbf16>
    %34 = vector.shape_cast %33 : vector<1x8x128xbf16> to vector<8x128xbf16>
    %cst_41 = arith.constant dense<0.000000e+00> : vector<128x128xf32>
    %35 = tpu.matmul %32, %34, %cst_41 {dimension_numbers = #tpu.dot_dimension_numbers<[1], [0], [0], [1], [0, 0, 1, 1], [], []>} : vector<128x8xbf16>, vector<8x128xbf16>, vector<128x128xf32> -> vector<128x128xf32>
    %36 = arith.addf %30, %35 : vector<128x128xf32>
    %c0_42 = arith.constant 0 : index
    %c0_43 = arith.constant 0 : index
    %c16 = arith.constant 16 : index
    %c0_44 = arith.constant 0 : index
    %37 = vector.load %arg1[%c0_42, %c0_43, %c16, %c0_44] : memref<1x4x160x8xbf16, #tpu.memory_space<vmem>>, vector<1x1x128x8xbf16>
    %38 = vector.shape_cast %37 : vector<1x1x128x8xbf16> to vector<128x8xbf16>
    %c6 = arith.constant 6 : index
    %c0_45 = arith.constant 0 : index
    %c0_46 = arith.constant 0 : index
    %39 = vector.load %arg2[%c6, %c0_45, %c0_46] : memref<9x8x128xbf16, #tpu.memory_space<vmem>>, vector<1x8x128xbf16>
    %40 = vector.shape_cast %39 : vector<1x8x128xbf16> to vector<8x128xbf16>
    %cst_47 = arith.constant dense<0.000000e+00> : vector<128x128xf32>
    %41 = tpu.matmul %38, %40, %cst_47 {dimension_numbers = #tpu.dot_dimension_numbers<[1], [0], [0], [1], [0, 0, 1, 1], [], []>} : vector<128x8xbf16>, vector<8x128xbf16>, vector<128x128xf32> -> vector<128x128xf32>
    %42 = arith.addf %36, %41 : vector<128x128xf32>
    %c0_48 = arith.constant 0 : index
    %c1_49 = arith.constant 1 : index
    %c16_50 = arith.constant 16 : index
    %c0_51 = arith.constant 0 : index
    %43 = vector.load %arg1[%c0_48, %c1_49, %c16_50, %c0_51] : memref<1x4x160x8xbf16, #tpu.memory_space<vmem>>, vector<1x1x128x8xbf16>
    %44 = vector.shape_cast %43 : vector<1x1x128x8xbf16> to vector<128x8xbf16>
    %c7 = arith.constant 7 : index
    %c0_52 = arith.constant 0 : index
    %c0_53 = arith.constant 0 : index
    %45 = vector.load %arg2[%c7, %c0_52, %c0_53] : memref<9x8x128xbf16, #tpu.memory_space<vmem>>, vector<1x8x128xbf16>
    %46 = vector.shape_cast %45 : vector<1x8x128xbf16> to vector<8x128xbf16>
    %cst_54 = arith.constant dense<0.000000e+00> : vector<128x128xf32>
    %47 = tpu.matmul %44, %46, %cst_54 {dimension_numbers = #tpu.dot_dimension_numbers<[1], [0], [0], [1], [0, 0, 1, 1], [], []>} : vector<128x8xbf16>, vector<8x128xbf16>, vector<128x128xf32> -> vector<128x128xf32>
    %48 = arith.addf %42, %47 : vector<128x128xf32>
    %c0_55 = arith.constant 0 : index
    %c0_56 = arith.constant 0 : index
    %c17 = arith.constant 17 : index
    %c0_57 = arith.constant 0 : index
    %49 = vector.load %arg1[%c0_55, %c0_56, %c17, %c0_57] : memref<1x4x160x8xbf16, #tpu.memory_space<vmem>>, vector<1x1x128x8xbf16>
    %50 = vector.shape_cast %49 : vector<1x1x128x8xbf16> to vector<128x8xbf16>
    %c8 = arith.constant 8 : index
    %c0_58 = arith.constant 0 : index
    %c0_59 = arith.constant 0 : index
    %51 = vector.load %arg2[%c8, %c0_58, %c0_59] : memref<9x8x128xbf16, #tpu.memory_space<vmem>>, vector<1x8x128xbf16>
    %52 = vector.shape_cast %51 : vector<1x8x128xbf16> to vector<8x128xbf16>
    %cst_60 = arith.constant dense<0.000000e+00> : vector<128x128xf32>
    %53 = tpu.matmul %50, %52, %cst_60 {dimension_numbers = #tpu.dot_dimension_numbers<[1], [0], [0], [1], [0, 0, 1, 1], [], []>} : vector<128x8xbf16>, vector<8x128xbf16>, vector<128x128xf32> -> vector<128x128xf32>
    %54 = arith.addf %48, %53 : vector<128x128xf32>
    %cst_61 = arith.constant 0.000000e+00 : f32
    %55 = vector.broadcast %cst_61 : f32 to vector<128x128xf32>
    %c0_62 = arith.constant 0 : index
    %c1_63 = arith.constant 1 : index
    %c0_64 = arith.constant 0 : index
    %c0_65 = arith.constant 0 : index
    %56 = vector.load %arg1[%c0_62, %c1_63, %c0_64, %c0_65] : memref<1x4x160x8xbf16, #tpu.memory_space<vmem>>, vector<1x1x128x8xbf16>
    %57 = vector.shape_cast %56 : vector<1x1x128x8xbf16> to vector<128x8xbf16>
    %c0_66 = arith.constant 0 : index
    %c0_67 = arith.constant 0 : index
    %c0_68 = arith.constant 0 : index
    %58 = vector.load %arg2[%c0_66, %c0_67, %c0_68] : memref<9x8x128xbf16, #tpu.memory_space<vmem>>, vector<1x8x128xbf16>
    %59 = vector.shape_cast %58 : vector<1x8x128xbf16> to vector<8x128xbf16>
    %cst_69 = arith.constant dense<0.000000e+00> : vector<128x128xf32>
    %60 = tpu.matmul %57, %59, %cst_69 {dimension_numbers = #tpu.dot_dimension_numbers<[1], [0], [0], [1], [0, 0, 1, 1], [], []>} : vector<128x8xbf16>, vector<8x128xbf16>, vector<128x128xf32> -> vector<128x128xf32>
    %61 = arith.addf %55, %60 : vector<128x128xf32>
    %c0_70 = arith.constant 0 : index
    %c0_71 = arith.constant 0 : index
    %c1_72 = arith.constant 1 : index
    %c0_73 = arith.constant 0 : index
    %62 = vector.load %arg1[%c0_70, %c0_71, %c1_72, %c0_73] : memref<1x4x160x8xbf16, #tpu.memory_space<vmem>>, vector<1x1x128x8xbf16>
    %63 = vector.shape_cast %62 : vector<1x1x128x8xbf16> to vector<128x8xbf16>
    %c1_74 = arith.constant 1 : index
    %c0_75 = arith.constant 0 : index
    %c0_76 = arith.constant 0 : index
    %64 = vector.load %arg2[%c1_74, %c0_75, %c0_76] : memref<9x8x128xbf16, #tpu.memory_space<vmem>>, vector<1x8x128xbf16>
    %65 = vector.shape_cast %64 : vector<1x8x128xbf16> to vector<8x128xbf16>
    %cst_77 = arith.constant dense<0.000000e+00> : vector<128x128xf32>
    %66 = tpu.matmul %63, %65, %cst_77 {dimension_numbers = #tpu.dot_dimension_numbers<[1], [0], [0], [1], [0, 0, 1, 1], [], []>} : vector<128x8xbf16>, vector<8x128xbf16>, vector<128x128xf32> -> vector<128x128xf32>
    %67 = arith.addf %61, %66 : vector<128x128xf32>
    %c0_78 = arith.constant 0 : index
    %c1_79 = arith.constant 1 : index
    %c1_80 = arith.constant 1 : index
    %c0_81 = arith.constant 0 : index
    %68 = vector.load %arg1[%c0_78, %c1_79, %c1_80, %c0_81] : memref<1x4x160x8xbf16, #tpu.memory_space<vmem>>, vector<1x1x128x8xbf16>
    %69 = vector.shape_cast %68 : vector<1x1x128x8xbf16> to vector<128x8xbf16>
    %c2_82 = arith.constant 2 : index
    %c0_83 = arith.constant 0 : index
    %c0_84 = arith.constant 0 : index
    %70 = vector.load %arg2[%c2_82, %c0_83, %c0_84] : memref<9x8x128xbf16, #tpu.memory_space<vmem>>, vector<1x8x128xbf16>
    %71 = vector.shape_cast %70 : vector<1x8x128xbf16> to vector<8x128xbf16>
    %cst_85 = arith.constant dense<0.000000e+00> : vector<128x128xf32>
    %72 = tpu.matmul %69, %71, %cst_85 {dimension_numbers = #tpu.dot_dimension_numbers<[1], [0], [0], [1], [0, 0, 1, 1], [], []>} : vector<128x8xbf16>, vector<8x128xbf16>, vector<128x128xf32> -> vector<128x128xf32>
    %73 = arith.addf %67, %72 : vector<128x128xf32>
    %c0_86 = arith.constant 0 : index
    %c3_87 = arith.constant 3 : index
    %c0_88 = arith.constant 0 : index
    %c0_89 = arith.constant 0 : index
    %74 = vector.load %arg1[%c0_86, %c3_87, %c0_88, %c0_89] : memref<1x4x160x8xbf16, #tpu.memory_space<vmem>>, vector<1x1x128x8xbf16>
    %75 = vector.shape_cast %74 : vector<1x1x128x8xbf16> to vector<128x8xbf16>
    %c3_90 = arith.constant 3 : index
    %c0_91 = arith.constant 0 : index
    %c0_92 = arith.constant 0 : index
    %76 = vector.load %arg2[%c3_90, %c0_91, %c0_92] : memref<9x8x128xbf16, #tpu.memory_space<vmem>>, vector<1x8x128xbf16>
    %77 = vector.shape_cast %76 : vector<1x8x128xbf16> to vector<8x128xbf16>
    %cst_93 = arith.constant dense<0.000000e+00> : vector<128x128xf32>
    %78 = tpu.matmul %75, %77, %cst_93 {dimension_numbers = #tpu.dot_dimension_numbers<[1], [0], [0], [1], [0, 0, 1, 1], [], []>} : vector<128x8xbf16>, vector<8x128xbf16>, vector<128x128xf32> -> vector<128x128xf32>
    %79 = arith.addf %73, %78 : vector<128x128xf32>
    %c0_94 = arith.constant 0 : index
    %c2_95 = arith.constant 2 : index
    %c1_96 = arith.constant 1 : index
    %c0_97 = arith.constant 0 : index
    %80 = vector.load %arg1[%c0_94, %c2_95, %c1_96, %c0_97] : memref<1x4x160x8xbf16, #tpu.memory_space<vmem>>, vector<1x1x128x8xbf16>
    %81 = vector.shape_cast %80 : vector<1x1x128x8xbf16> to vector<128x8xbf16>
    %c4_98 = arith.constant 4 : index
    %c0_99 = arith.constant 0 : index
    %c0_100 = arith.constant 0 : index
    %82 = vector.load %arg2[%c4_98, %c0_99, %c0_100] : memref<9x8x128xbf16, #tpu.memory_space<vmem>>, vector<1x8x128xbf16>
    %83 = vector.shape_cast %82 : vector<1x8x128xbf16> to vector<8x128xbf16>
    %cst_101 = arith.constant dense<0.000000e+00> : vector<128x128xf32>
    %84 = tpu.matmul %81, %83, %cst_101 {dimension_numbers = #tpu.dot_dimension_numbers<[1], [0], [0], [1], [0, 0, 1, 1], [], []>} : vector<128x8xbf16>, vector<8x128xbf16>, vector<128x128xf32> -> vector<128x128xf32>
    %85 = arith.addf %79, %84 : vector<128x128xf32>
    %c0_102 = arith.constant 0 : index
    %c3_103 = arith.constant 3 : index
    %c1_104 = arith.constant 1 : index
    %c0_105 = arith.constant 0 : index
    %86 = vector.load %arg1[%c0_102, %c3_103, %c1_104, %c0_105] : memref<1x4x160x8xbf16, #tpu.memory_space<vmem>>, vector<1x1x128x8xbf16>
    %87 = vector.shape_cast %86 : vector<1x1x128x8xbf16> to vector<128x8xbf16>
    %c5_106 = arith.constant 5 : index
    %c0_107 = arith.constant 0 : index
    %c0_108 = arith.constant 0 : index
    %88 = vector.load %arg2[%c5_106, %c0_107, %c0_108] : memref<9x8x128xbf16, #tpu.memory_space<vmem>>, vector<1x8x128xbf16>
    %89 = vector.shape_cast %88 : vector<1x8x128xbf16> to vector<8x128xbf16>
    %cst_109 = arith.constant dense<0.000000e+00> : vector<128x128xf32>
    %90 = tpu.matmul %87, %89, %cst_109 {dimension_numbers = #tpu.dot_dimension_numbers<[1], [0], [0], [1], [0, 0, 1, 1], [], []>} : vector<128x8xbf16>, vector<8x128xbf16>, vector<128x128xf32> -> vector<128x128xf32>
    %91 = arith.addf %85, %90 : vector<128x128xf32>
    %c0_110 = arith.constant 0 : index
    %c1_111 = arith.constant 1 : index
    %c16_112 = arith.constant 16 : index
    %c0_113 = arith.constant 0 : index
    %92 = vector.load %arg1[%c0_110, %c1_111, %c16_112, %c0_113] : memref<1x4x160x8xbf16, #tpu.memory_space<vmem>>, vector<1x1x128x8xbf16>
    %93 = vector.shape_cast %92 : vector<1x1x128x8xbf16> to vector<128x8xbf16>
    %c6_114 = arith.constant 6 : index
    %c0_115 = arith.constant 0 : index
    %c0_116 = arith.constant 0 : index
    %94 = vector.load %arg2[%c6_114, %c0_115, %c0_116] : memref<9x8x128xbf16, #tpu.memory_space<vmem>>, vector<1x8x128xbf16>
    %95 = vector.shape_cast %94 : vector<1x8x128xbf16> to vector<8x128xbf16>
    %cst_117 = arith.constant dense<0.000000e+00> : vector<128x128xf32>
    %96 = tpu.matmul %93, %95, %cst_117 {dimension_numbers = #tpu.dot_dimension_numbers<[1], [0], [0], [1], [0, 0, 1, 1], [], []>} : vector<128x8xbf16>, vector<8x128xbf16>, vector<128x128xf32> -> vector<128x128xf32>
    %97 = arith.addf %91, %96 : vector<128x128xf32>
    %c0_118 = arith.constant 0 : index
    %c0_119 = arith.constant 0 : index
    %c17_120 = arith.constant 17 : index
    %c0_121 = arith.constant 0 : index
    %98 = vector.load %arg1[%c0_118, %c0_119, %c17_120, %c0_121] : memref<1x4x160x8xbf16, #tpu.memory_space<vmem>>, vector<1x1x128x8xbf16>
    %99 = vector.shape_cast %98 : vector<1x1x128x8xbf16> to vector<128x8xbf16>
    %c7_122 = arith.constant 7 : index
    %c0_123 = arith.constant 0 : index
    %c0_124 = arith.constant 0 : index
    %100 = vector.load %arg2[%c7_122, %c0_123, %c0_124] : memref<9x8x128xbf16, #tpu.memory_space<vmem>>, vector<1x8x128xbf16>
    %101 = vector.shape_cast %100 : vector<1x8x128xbf16> to vector<8x128xbf16>
    %cst_125 = arith.constant dense<0.000000e+00> : vector<128x128xf32>
    %102 = tpu.matmul %99, %101, %cst_125 {dimension_numbers = #tpu.dot_dimension_numbers<[1], [0], [0], [1], [0, 0, 1, 1], [], []>} : vector<128x8xbf16>, vector<8x128xbf16>, vector<128x128xf32> -> vector<128x128xf32>
    %103 = arith.addf %97, %102 : vector<128x128xf32>
    %c0_126 = arith.constant 0 : index
    %c1_127 = arith.constant 1 : index
    %c17_128 = arith.constant 17 : index
    %c0_129 = arith.constant 0 : index
    %104 = vector.load %arg1[%c0_126, %c1_127, %c17_128, %c0_129] : memref<1x4x160x8xbf16, #tpu.memory_space<vmem>>, vector<1x1x128x8xbf16>
    %105 = vector.shape_cast %104 : vector<1x1x128x8xbf16> to vector<128x8xbf16>
    %c8_130 = arith.constant 8 : index
    %c0_131 = arith.constant 0 : index
    %c0_132 = arith.constant 0 : index
    %106 = vector.load %arg2[%c8_130, %c0_131, %c0_132] : memref<9x8x128xbf16, #tpu.memory_space<vmem>>, vector<1x8x128xbf16>
    %107 = vector.shape_cast %106 : vector<1x8x128xbf16> to vector<8x128xbf16>
    %cst_133 = arith.constant dense<0.000000e+00> : vector<128x128xf32>
    %108 = tpu.matmul %105, %107, %cst_133 {dimension_numbers = #tpu.dot_dimension_numbers<[1], [0], [0], [1], [0, 0, 1, 1], [], []>} : vector<128x8xbf16>, vector<8x128xbf16>, vector<128x128xf32> -> vector<128x128xf32>
    %109 = arith.addf %103, %108 : vector<128x128xf32>
    %110 = arith.maximumf %54, %109 : vector<128x128xf32>
    %cst_134 = arith.constant 0.000000e+00 : f32
    %111 = vector.broadcast %cst_134 : f32 to vector<128x128xf32>
    %c0_135 = arith.constant 0 : index
    %c2_136 = arith.constant 2 : index
    %c0_137 = arith.constant 0 : index
    %c0_138 = arith.constant 0 : index
    %112 = vector.load %arg1[%c0_135, %c2_136, %c0_137, %c0_138] : memref<1x4x160x8xbf16, #tpu.memory_space<vmem>>, vector<1x1x128x8xbf16>
    %113 = vector.shape_cast %112 : vector<1x1x128x8xbf16> to vector<128x8xbf16>
    %c0_139 = arith.constant 0 : index
    %c0_140 = arith.constant 0 : index
    %c0_141 = arith.constant 0 : index
    %114 = vector.load %arg2[%c0_139, %c0_140, %c0_141] : memref<9x8x128xbf16, #tpu.memory_space<vmem>>, vector<1x8x128xbf16>
    %115 = vector.shape_cast %114 : vector<1x8x128xbf16> to vector<8x128xbf16>
    %cst_142 = arith.constant dense<0.000000e+00> : vector<128x128xf32>
    %116 = tpu.matmul %113, %115, %cst_142 {dimension_numbers = #tpu.dot_dimension_numbers<[1], [0], [0], [1], [0, 0, 1, 1], [], []>} : vector<128x8xbf16>, vector<8x128xbf16>, vector<128x128xf32> -> vector<128x128xf32>
    %117 = arith.addf %111, %116 : vector<128x128xf32>
    %c0_143 = arith.constant 0 : index
    %c3_144 = arith.constant 3 : index
    %c0_145 = arith.constant 0 : index
    %c0_146 = arith.constant 0 : index
    %118 = vector.load %arg1[%c0_143, %c3_144, %c0_145, %c0_146] : memref<1x4x160x8xbf16, #tpu.memory_space<vmem>>, vector<1x1x128x8xbf16>
    %119 = vector.shape_cast %118 : vector<1x1x128x8xbf16> to vector<128x8xbf16>
    %c1_147 = arith.constant 1 : index
    %c0_148 = arith.constant 0 : index
    %c0_149 = arith.constant 0 : index
    %120 = vector.load %arg2[%c1_147, %c0_148, %c0_149] : memref<9x8x128xbf16, #tpu.memory_space<vmem>>, vector<1x8x128xbf16>
    %121 = vector.shape_cast %120 : vector<1x8x128xbf16> to vector<8x128xbf16>
    %cst_150 = arith.constant dense<0.000000e+00> : vector<128x128xf32>
    %122 = tpu.matmul %119, %121, %cst_150 {dimension_numbers = #tpu.dot_dimension_numbers<[1], [0], [0], [1], [0, 0, 1, 1], [], []>} : vector<128x8xbf16>, vector<8x128xbf16>, vector<128x128xf32> -> vector<128x128xf32>
    %123 = arith.addf %117, %122 : vector<128x128xf32>
    %c0_151 = arith.constant 0 : index
    %c2_152 = arith.constant 2 : index
    %c1_153 = arith.constant 1 : index
    %c0_154 = arith.constant 0 : index
    %124 = vector.load %arg1[%c0_151, %c2_152, %c1_153, %c0_154] : memref<1x4x160x8xbf16, #tpu.memory_space<vmem>>, vector<1x1x128x8xbf16>
    %125 = vector.shape_cast %124 : vector<1x1x128x8xbf16> to vector<128x8xbf16>
    %c2_155 = arith.constant 2 : index
    %c0_156 = arith.constant 0 : index
    %c0_157 = arith.constant 0 : index
    %126 = vector.load %arg2[%c2_155, %c0_156, %c0_157] : memref<9x8x128xbf16, #tpu.memory_space<vmem>>, vector<1x8x128xbf16>
    %127 = vector.shape_cast %126 : vector<1x8x128xbf16> to vector<8x128xbf16>
    %cst_158 = arith.constant dense<0.000000e+00> : vector<128x128xf32>
    %128 = tpu.matmul %125, %127, %cst_158 {dimension_numbers = #tpu.dot_dimension_numbers<[1], [0], [0], [1], [0, 0, 1, 1], [], []>} : vector<128x8xbf16>, vector<8x128xbf16>, vector<128x128xf32> -> vector<128x128xf32>
    %129 = arith.addf %123, %128 : vector<128x128xf32>
    %c0_159 = arith.constant 0 : index
    %c0_160 = arith.constant 0 : index
    %c16_161 = arith.constant 16 : index
    %c0_162 = arith.constant 0 : index
    %130 = vector.load %arg1[%c0_159, %c0_160, %c16_161, %c0_162] : memref<1x4x160x8xbf16, #tpu.memory_space<vmem>>, vector<1x1x128x8xbf16>
    %131 = vector.shape_cast %130 : vector<1x1x128x8xbf16> to vector<128x8xbf16>
    %c3_163 = arith.constant 3 : index
    %c0_164 = arith.constant 0 : index
    %c0_165 = arith.constant 0 : index
    %132 = vector.load %arg2[%c3_163, %c0_164, %c0_165] : memref<9x8x128xbf16, #tpu.memory_space<vmem>>, vector<1x8x128xbf16>
    %133 = vector.shape_cast %132 : vector<1x8x128xbf16> to vector<8x128xbf16>
    %cst_166 = arith.constant dense<0.000000e+00> : vector<128x128xf32>
    %134 = tpu.matmul %131, %133, %cst_166 {dimension_numbers = #tpu.dot_dimension_numbers<[1], [0], [0], [1], [0, 0, 1, 1], [], []>} : vector<128x8xbf16>, vector<8x128xbf16>, vector<128x128xf32> -> vector<128x128xf32>
    %135 = arith.addf %129, %134 : vector<128x128xf32>
    %c0_167 = arith.constant 0 : index
    %c1_168 = arith.constant 1 : index
    %c16_169 = arith.constant 16 : index
    %c0_170 = arith.constant 0 : index
    %136 = vector.load %arg1[%c0_167, %c1_168, %c16_169, %c0_170] : memref<1x4x160x8xbf16, #tpu.memory_space<vmem>>, vector<1x1x128x8xbf16>
    %137 = vector.shape_cast %136 : vector<1x1x128x8xbf16> to vector<128x8xbf16>
    %c4_171 = arith.constant 4 : index
    %c0_172 = arith.constant 0 : index
    %c0_173 = arith.constant 0 : index
    %138 = vector.load %arg2[%c4_171, %c0_172, %c0_173] : memref<9x8x128xbf16, #tpu.memory_space<vmem>>, vector<1x8x128xbf16>
    %139 = vector.shape_cast %138 : vector<1x8x128xbf16> to vector<8x128xbf16>
    %cst_174 = arith.constant dense<0.000000e+00> : vector<128x128xf32>
    %140 = tpu.matmul %137, %139, %cst_174 {dimension_numbers = #tpu.dot_dimension_numbers<[1], [0], [0], [1], [0, 0, 1, 1], [], []>} : vector<128x8xbf16>, vector<8x128xbf16>, vector<128x128xf32> -> vector<128x128xf32>
    %141 = arith.addf %135, %140 : vector<128x128xf32>
    %c0_175 = arith.constant 0 : index
    %c0_176 = arith.constant 0 : index
    %c17_177 = arith.constant 17 : index
    %c0_178 = arith.constant 0 : index
    %142 = vector.load %arg1[%c0_175, %c0_176, %c17_177, %c0_178] : memref<1x4x160x8xbf16, #tpu.memory_space<vmem>>, vector<1x1x128x8xbf16>
    %143 = vector.shape_cast %142 : vector<1x1x128x8xbf16> to vector<128x8xbf16>
    %c5_179 = arith.constant 5 : index
    %c0_180 = arith.constant 0 : index
    %c0_181 = arith.constant 0 : index
    %144 = vector.load %arg2[%c5_179, %c0_180, %c0_181] : memref<9x8x128xbf16, #tpu.memory_space<vmem>>, vector<1x8x128xbf16>
    %145 = vector.shape_cast %144 : vector<1x8x128xbf16> to vector<8x128xbf16>
    %cst_182 = arith.constant dense<0.000000e+00> : vector<128x128xf32>
    %146 = tpu.matmul %143, %145, %cst_182 {dimension_numbers = #tpu.dot_dimension_numbers<[1], [0], [0], [1], [0, 0, 1, 1], [], []>} : vector<128x8xbf16>, vector<8x128xbf16>, vector<128x128xf32> -> vector<128x128xf32>
    %147 = arith.addf %141, %146 : vector<128x128xf32>
    %c0_183 = arith.constant 0 : index
    %c2_184 = arith.constant 2 : index
    %c16_185 = arith.constant 16 : index
    %c0_186 = arith.constant 0 : index
    %148 = vector.load %arg1[%c0_183, %c2_184, %c16_185, %c0_186] : memref<1x4x160x8xbf16, #tpu.memory_space<vmem>>, vector<1x1x128x8xbf16>
    %149 = vector.shape_cast %148 : vector<1x1x128x8xbf16> to vector<128x8xbf16>
    %c6_187 = arith.constant 6 : index
    %c0_188 = arith.constant 0 : index
    %c0_189 = arith.constant 0 : index
    %150 = vector.load %arg2[%c6_187, %c0_188, %c0_189] : memref<9x8x128xbf16, #tpu.memory_space<vmem>>, vector<1x8x128xbf16>
    %151 = vector.shape_cast %150 : vector<1x8x128xbf16> to vector<8x128xbf16>
    %cst_190 = arith.constant dense<0.000000e+00> : vector<128x128xf32>
    %152 = tpu.matmul %149, %151, %cst_190 {dimension_numbers = #tpu.dot_dimension_numbers<[1], [0], [0], [1], [0, 0, 1, 1], [], []>} : vector<128x8xbf16>, vector<8x128xbf16>, vector<128x128xf32> -> vector<128x128xf32>
    %153 = arith.addf %147, %152 : vector<128x128xf32>
    %c0_191 = arith.constant 0 : index
    %c3_192 = arith.constant 3 : index
    %c16_193 = arith.constant 16 : index
    %c0_194 = arith.constant 0 : index
    %154 = vector.load %arg1[%c0_191, %c3_192, %c16_193, %c0_194] : memref<1x4x160x8xbf16, #tpu.memory_space<vmem>>, vector<1x1x128x8xbf16>
    %155 = vector.shape_cast %154 : vector<1x1x128x8xbf16> to vector<128x8xbf16>
    %c7_195 = arith.constant 7 : index
    %c0_196 = arith.constant 0 : index
    %c0_197 = arith.constant 0 : index
    %156 = vector.load %arg2[%c7_195, %c0_196, %c0_197] : memref<9x8x128xbf16, #tpu.memory_space<vmem>>, vector<1x8x128xbf16>
    %157 = vector.shape_cast %156 : vector<1x8x128xbf16> to vector<8x128xbf16>
    %cst_198 = arith.constant dense<0.000000e+00> : vector<128x128xf32>
    %158 = tpu.matmul %155, %157, %cst_198 {dimension_numbers = #tpu.dot_dimension_numbers<[1], [0], [0], [1], [0, 0, 1, 1], [], []>} : vector<128x8xbf16>, vector<8x128xbf16>, vector<128x128xf32> -> vector<128x128xf32>
    %159 = arith.addf %153, %158 : vector<128x128xf32>
    %c0_199 = arith.constant 0 : index
    %c2_200 = arith.constant 2 : index
    %c17_201 = arith.constant 17 : index
    %c0_202 = arith.constant 0 : index
    %160 = vector.load %arg1[%c0_199, %c2_200, %c17_201, %c0_202] : memref<1x4x160x8xbf16, #tpu.memory_space<vmem>>, vector<1x1x128x8xbf16>
    %161 = vector.shape_cast %160 : vector<1x1x128x8xbf16> to vector<128x8xbf16>
    %c8_203 = arith.constant 8 : index
    %c0_204 = arith.constant 0 : index
    %c0_205 = arith.constant 0 : index
    %162 = vector.load %arg2[%c8_203, %c0_204, %c0_205] : memref<9x8x128xbf16, #tpu.memory_space<vmem>>, vector<1x8x128xbf16>
    %163 = vector.shape_cast %162 : vector<1x8x128xbf16> to vector<8x128xbf16>
    %cst_206 = arith.constant dense<0.000000e+00> : vector<128x128xf32>
    %164 = tpu.matmul %161, %163, %cst_206 {dimension_numbers = #tpu.dot_dimension_numbers<[1], [0], [0], [1], [0, 0, 1, 1], [], []>} : vector<128x8xbf16>, vector<8x128xbf16>, vector<128x128xf32> -> vector<128x128xf32>
    %165 = arith.addf %159, %164 : vector<128x128xf32>
    %166 = arith.maximumf %110, %165 : vector<128x128xf32>
    %cst_207 = arith.constant 0.000000e+00 : f32
    %167 = vector.broadcast %cst_207 : f32 to vector<128x128xf32>
    %c0_208 = arith.constant 0 : index
    %c3_209 = arith.constant 3 : index
    %c0_210 = arith.constant 0 : index
    %c0_211 = arith.constant 0 : index
    %168 = vector.load %arg1[%c0_208, %c3_209, %c0_210, %c0_211] : memref<1x4x160x8xbf16, #tpu.memory_space<vmem>>, vector<1x1x128x8xbf16>
    %169 = vector.shape_cast %168 : vector<1x1x128x8xbf16> to vector<128x8xbf16>
    %c0_212 = arith.constant 0 : index
    %c0_213 = arith.constant 0 : index
    %c0_214 = arith.constant 0 : index
    %170 = vector.load %arg2[%c0_212, %c0_213, %c0_214] : memref<9x8x128xbf16, #tpu.memory_space<vmem>>, vector<1x8x128xbf16>
    %171 = vector.shape_cast %170 : vector<1x8x128xbf16> to vector<8x128xbf16>
    %cst_215 = arith.constant dense<0.000000e+00> : vector<128x128xf32>
    %172 = tpu.matmul %169, %171, %cst_215 {dimension_numbers = #tpu.dot_dimension_numbers<[1], [0], [0], [1], [0, 0, 1, 1], [], []>} : vector<128x8xbf16>, vector<8x128xbf16>, vector<128x128xf32> -> vector<128x128xf32>
    %173 = arith.addf %167, %172 : vector<128x128xf32>
    %c0_216 = arith.constant 0 : index
    %c2_217 = arith.constant 2 : index
    %c1_218 = arith.constant 1 : index
    %c0_219 = arith.constant 0 : index
    %174 = vector.load %arg1[%c0_216, %c2_217, %c1_218, %c0_219] : memref<1x4x160x8xbf16, #tpu.memory_space<vmem>>, vector<1x1x128x8xbf16>
    %175 = vector.shape_cast %174 : vector<1x1x128x8xbf16> to vector<128x8xbf16>
    %c1_220 = arith.constant 1 : index
    %c0_221 = arith.constant 0 : index
    %c0_222 = arith.constant 0 : index
    %176 = vector.load %arg2[%c1_220, %c0_221, %c0_222] : memref<9x8x128xbf16, #tpu.memory_space<vmem>>, vector<1x8x128xbf16>
    %177 = vector.shape_cast %176 : vector<1x8x128xbf16> to vector<8x128xbf16>
    %cst_223 = arith.constant dense<0.000000e+00> : vector<128x128xf32>
    %178 = tpu.matmul %175, %177, %cst_223 {dimension_numbers = #tpu.dot_dimension_numbers<[1], [0], [0], [1], [0, 0, 1, 1], [], []>} : vector<128x8xbf16>, vector<8x128xbf16>, vector<128x128xf32> -> vector<128x128xf32>
    %179 = arith.addf %173, %178 : vector<128x128xf32>
    %c0_224 = arith.constant 0 : index
    %c3_225 = arith.constant 3 : index
    %c1_226 = arith.constant 1 : index
    %c0_227 = arith.constant 0 : index
    %180 = vector.load %arg1[%c0_224, %c3_225, %c1_226, %c0_227] : memref<1x4x160x8xbf16, #tpu.memory_space<vmem>>, vector<1x1x128x8xbf16>
    %181 = vector.shape_cast %180 : vector<1x1x128x8xbf16> to vector<128x8xbf16>
    %c2_228 = arith.constant 2 : index
    %c0_229 = arith.constant 0 : index
    %c0_230 = arith.constant 0 : index
    %182 = vector.load %arg2[%c2_228, %c0_229, %c0_230] : memref<9x8x128xbf16, #tpu.memory_space<vmem>>, vector<1x8x128xbf16>
    %183 = vector.shape_cast %182 : vector<1x8x128xbf16> to vector<8x128xbf16>
    %cst_231 = arith.constant dense<0.000000e+00> : vector<128x128xf32>
    %184 = tpu.matmul %181, %183, %cst_231 {dimension_numbers = #tpu.dot_dimension_numbers<[1], [0], [0], [1], [0, 0, 1, 1], [], []>} : vector<128x8xbf16>, vector<8x128xbf16>, vector<128x128xf32> -> vector<128x128xf32>
    %185 = arith.addf %179, %184 : vector<128x128xf32>
    %c0_232 = arith.constant 0 : index
    %c1_233 = arith.constant 1 : index
    %c16_234 = arith.constant 16 : index
    %c0_235 = arith.constant 0 : index
    %186 = vector.load %arg1[%c0_232, %c1_233, %c16_234, %c0_235] : memref<1x4x160x8xbf16, #tpu.memory_space<vmem>>, vector<1x1x128x8xbf16>
    %187 = vector.shape_cast %186 : vector<1x1x128x8xbf16> to vector<128x8xbf16>
    %c3_236 = arith.constant 3 : index
    %c0_237 = arith.constant 0 : index
    %c0_238 = arith.constant 0 : index
    %188 = vector.load %arg2[%c3_236, %c0_237, %c0_238] : memref<9x8x128xbf16, #tpu.memory_space<vmem>>, vector<1x8x128xbf16>
    %189 = vector.shape_cast %188 : vector<1x8x128xbf16> to vector<8x128xbf16>
    %cst_239 = arith.constant dense<0.000000e+00> : vector<128x128xf32>
    %190 = tpu.matmul %187, %189, %cst_239 {dimension_numbers = #tpu.dot_dimension_numbers<[1], [0], [0], [1], [0, 0, 1, 1], [], []>} : vector<128x8xbf16>, vector<8x128xbf16>, vector<128x128xf32> -> vector<128x128xf32>
    %191 = arith.addf %185, %190 : vector<128x128xf32>
    %c0_240 = arith.constant 0 : index
    %c0_241 = arith.constant 0 : index
    %c17_242 = arith.constant 17 : index
    %c0_243 = arith.constant 0 : index
    %192 = vector.load %arg1[%c0_240, %c0_241, %c17_242, %c0_243] : memref<1x4x160x8xbf16, #tpu.memory_space<vmem>>, vector<1x1x128x8xbf16>
    %193 = vector.shape_cast %192 : vector<1x1x128x8xbf16> to vector<128x8xbf16>
    %c4_244 = arith.constant 4 : index
    %c0_245 = arith.constant 0 : index
    %c0_246 = arith.constant 0 : index
    %194 = vector.load %arg2[%c4_244, %c0_245, %c0_246] : memref<9x8x128xbf16, #tpu.memory_space<vmem>>, vector<1x8x128xbf16>
    %195 = vector.shape_cast %194 : vector<1x8x128xbf16> to vector<8x128xbf16>
    %cst_247 = arith.constant dense<0.000000e+00> : vector<128x128xf32>
    %196 = tpu.matmul %193, %195, %cst_247 {dimension_numbers = #tpu.dot_dimension_numbers<[1], [0], [0], [1], [0, 0, 1, 1], [], []>} : vector<128x8xbf16>, vector<8x128xbf16>, vector<128x128xf32> -> vector<128x128xf32>
    %197 = arith.addf %191, %196 : vector<128x128xf32>
    %c0_248 = arith.constant 0 : index
    %c1_249 = arith.constant 1 : index
    %c17_250 = arith.constant 17 : index
    %c0_251 = arith.constant 0 : index
    %198 = vector.load %arg1[%c0_248, %c1_249, %c17_250, %c0_251] : memref<1x4x160x8xbf16, #tpu.memory_space<vmem>>, vector<1x1x128x8xbf16>
    %199 = vector.shape_cast %198 : vector<1x1x128x8xbf16> to vector<128x8xbf16>
    %c5_252 = arith.constant 5 : index
    %c0_253 = arith.constant 0 : index
    %c0_254 = arith.constant 0 : index
    %200 = vector.load %arg2[%c5_252, %c0_253, %c0_254] : memref<9x8x128xbf16, #tpu.memory_space<vmem>>, vector<1x8x128xbf16>
    %201 = vector.shape_cast %200 : vector<1x8x128xbf16> to vector<8x128xbf16>
    %cst_255 = arith.constant dense<0.000000e+00> : vector<128x128xf32>
    %202 = tpu.matmul %199, %201, %cst_255 {dimension_numbers = #tpu.dot_dimension_numbers<[1], [0], [0], [1], [0, 0, 1, 1], [], []>} : vector<128x8xbf16>, vector<8x128xbf16>, vector<128x128xf32> -> vector<128x128xf32>
    %203 = arith.addf %197, %202 : vector<128x128xf32>
    %c0_256 = arith.constant 0 : index
    %c3_257 = arith.constant 3 : index
    %c16_258 = arith.constant 16 : index
    %c0_259 = arith.constant 0 : index
    %204 = vector.load %arg1[%c0_256, %c3_257, %c16_258, %c0_259] : memref<1x4x160x8xbf16, #tpu.memory_space<vmem>>, vector<1x1x128x8xbf16>
    %205 = vector.shape_cast %204 : vector<1x1x128x8xbf16> to vector<128x8xbf16>
    %c6_260 = arith.constant 6 : index
    %c0_261 = arith.constant 0 : index
    %c0_262 = arith.constant 0 : index
    %206 = vector.load %arg2[%c6_260, %c0_261, %c0_262] : memref<9x8x128xbf16, #tpu.memory_space<vmem>>, vector<1x8x128xbf16>
    %207 = vector.shape_cast %206 : vector<1x8x128xbf16> to vector<8x128xbf16>
    %cst_263 = arith.constant dense<0.000000e+00> : vector<128x128xf32>
    %208 = tpu.matmul %205, %207, %cst_263 {dimension_numbers = #tpu.dot_dimension_numbers<[1], [0], [0], [1], [0, 0, 1, 1], [], []>} : vector<128x8xbf16>, vector<8x128xbf16>, vector<128x128xf32> -> vector<128x128xf32>
    %209 = arith.addf %203, %208 : vector<128x128xf32>
    %c0_264 = arith.constant 0 : index
    %c2_265 = arith.constant 2 : index
    %c17_266 = arith.constant 17 : index
    %c0_267 = arith.constant 0 : index
    %210 = vector.load %arg1[%c0_264, %c2_265, %c17_266, %c0_267] : memref<1x4x160x8xbf16, #tpu.memory_space<vmem>>, vector<1x1x128x8xbf16>
    %211 = vector.shape_cast %210 : vector<1x1x128x8xbf16> to vector<128x8xbf16>
    %c7_268 = arith.constant 7 : index
    %c0_269 = arith.constant 0 : index
    %c0_270 = arith.constant 0 : index
    %212 = vector.load %arg2[%c7_268, %c0_269, %c0_270] : memref<9x8x128xbf16, #tpu.memory_space<vmem>>, vector<1x8x128xbf16>
    %213 = vector.shape_cast %212 : vector<1x8x128xbf16> to vector<8x128xbf16>
    %cst_271 = arith.constant dense<0.000000e+00> : vector<128x128xf32>
    %214 = tpu.matmul %211, %213, %cst_271 {dimension_numbers = #tpu.dot_dimension_numbers<[1], [0], [0], [1], [0, 0, 1, 1], [], []>} : vector<128x8xbf16>, vector<8x128xbf16>, vector<128x128xf32> -> vector<128x128xf32>
    %215 = arith.addf %209, %214 : vector<128x128xf32>
    %c0_272 = arith.constant 0 : index
    %c3_273 = arith.constant 3 : index
    %c17_274 = arith.constant 17 : index
    %c0_275 = arith.constant 0 : index
    %216 = vector.load %arg1[%c0_272, %c3_273, %c17_274, %c0_275] : memref<1x4x160x8xbf16, #tpu.memory_space<vmem>>, vector<1x1x128x8xbf16>
    %217 = vector.shape_cast %216 : vector<1x1x128x8xbf16> to vector<128x8xbf16>
    %c8_276 = arith.constant 8 : index
    %c0_277 = arith.constant 0 : index
    %c0_278 = arith.constant 0 : index
    %218 = vector.load %arg2[%c8_276, %c0_277, %c0_278] : memref<9x8x128xbf16, #tpu.memory_space<vmem>>, vector<1x8x128xbf16>
    %219 = vector.shape_cast %218 : vector<1x8x128xbf16> to vector<8x128xbf16>
    %cst_279 = arith.constant dense<0.000000e+00> : vector<128x128xf32>
    %220 = tpu.matmul %217, %219, %cst_279 {dimension_numbers = #tpu.dot_dimension_numbers<[1], [0], [0], [1], [0, 0, 1, 1], [], []>} : vector<128x8xbf16>, vector<8x128xbf16>, vector<128x128xf32> -> vector<128x128xf32>
    %221 = arith.addf %215, %220 : vector<128x128xf32>
    %222 = arith.maximumf %166, %221 : vector<128x128xf32>
    %c0_280 = arith.constant 0 : index
    %c0_281 = arith.constant 0 : index
    %223 = vector.load %arg3[%c0_280, %c0_281] : memref<1x128xf32, #tpu.memory_space<vmem>>, vector<1x128xf32>
    %224 = vector.broadcast %223 : vector<1x128xf32> to vector<128x128xf32>
    %225 = arith.addf %222, %224 : vector<128x128xf32>
    %cst_282 = arith.constant 0.000000e+00 : f32
    %226 = vector.broadcast %cst_282 : f32 to vector<128x128xf32>
    %227 = arith.maximumf %225, %226 : vector<128x128xf32>
    %228 = vector.shape_cast %227 : vector<128x128xf32> to vector<8x16x128xf32>
    %229 = vector.extract_strided_slice %228 {offsets = [0, 0, 0], sizes = [8, 8, 128], strides = [1, 1, 1]} : vector<8x16x128xf32> to vector<8x8x128xf32>
    %c0_283 = arith.constant 0 : index
    %c0_284 = arith.constant 0 : index
    %c0_285 = arith.constant 0 : index
    %c0_286 = arith.constant 0 : index
    %230 = vector.load %arg4[%c0_283, %c0_284, %c0_285, %c0_286] : memref<1x8x8x128xf32, #tpu.memory_space<vmem>>, vector<1x8x8x128xf32>
    %231 = vector.shape_cast %230 : vector<1x8x8x128xf32> to vector<8x8x128xf32>
    %232 = vector.shape_cast %229 : vector<8x8x128xf32> to vector<1x8x8x128xf32>
    tpu.vector_store %arg4[%c0_283, %c0_284, %c0_285, %c0_286], %232 {strides = array<i32>} : memref<1x8x8x128xf32, #tpu.memory_space<vmem>>, vector<1x8x8x128xf32>,
    return
  }
  func.func @transform_0(%arg0: i32) -> (i32, i32, i32, i32) {
    %c0_i32 = arith.constant 0 : i32
    %c0_i32_0 = arith.constant 0 : i32
    %c0_i32_1 = arith.constant 0 : i32
    %c0_i32_2 = arith.constant 0 : i32
    return %arg0, %c0_i32, %c0_i32_0, %c0_i32_1 : i32, i32, i32, i32
  }
  func.func @transform_1(%arg0: i32) -> (i32, i32, i32) {
    %c0_i32 = arith.constant 0 : i32
    %c0_i32_0 = arith.constant 0 : i32
    %c0_i32_1 = arith.constant 0 : i32
    %c0_i32_2 = arith.constant 0 : i32
    return %c0_i32, %c0_i32_0, %c0_i32_1 : i32, i32, i32
  }
  func.func @transform_2(%arg0: i32) -> (i32, i32) {
    %c0_i32 = arith.constant 0 : i32
    %c0_i32_0 = arith.constant 0 : i32
    %c0_i32_1 = arith.constant 0 : i32
    return %c0_i32, %c0_i32_0 : i32, i32
  }
  func.func @transform_3(%arg0: i32) -> (i32, i32, i32, i32) {
    %c0_i32 = arith.constant 0 : i32
    %c0_i32_0 = arith.constant 0 : i32
    %c0_i32_1 = arith.constant 0 : i32
    %c0_i32_2 = arith.constant 0 : i32
    return %arg0, %c0_i32, %c0_i32_0, %c0_i32_1 : i32, i32, i32, i32
  }
}

</mosaic_0001>

<bundles_post_ra>
// kernel: tpu_custom_call.1
= control target key start
LH: loop header
LB: loop body
LE: loop exit
PB: predicated region body
PF: predicated region fallthrough
CT: control target
= control target key end

     0   :  { %8 = vsyncpa [#allocation3], 0  ;;  %s6642_s0 = inlined_call_operand.vmem [shape: bf16[2,4,160,8], index: 0, kind: input, shape index: {}]   ;;  %s6643_s1 = inlined_call_operand.vmem [shape: bf16[9,8,128], index: 1, kind: input, shape index: {}]   ;;  %s6644_s2 = inlined_call_operand.vmem [shape: f32[1,128], index: 2, kind: input, shape index: {}]   ;;  %s6645_s3 = inlined_call_operand.hbm [shape: f32[2,8,8,128], index: 3, kind: output, shape index: {}]  }
   0x1   :  { %10 = vsyncpa [#allocation3 + $0x1], 0  ;;  %s5213_s12 = smov 0   ;;  %s5215_s13 = smov 0  }
   0x2   :  { %s5217_s14 = smov 0   ;;  %s5219_s15 = smov 0  }
   0x3 LB: > { %s5234_s16 = sadd.s32 4294967295, %s5189_s15   ;;  %s3906_s17 = sadd.s32 4294967294, %s5189_s15   ;;  %s5189_s15 = sphi %s5219_s15, %s6816_s15   ;;  %s5185_s14 = sphi %s5217_s14, %s6815_s14   ;;  %s5181_s13 = sphi %s5215_s13, %s6814_s13   ;;  %s5177_s12 = sphi %s5213_s12, %s6813_s12  }
   0x4   : > { %s5238_s18 = sadd.s32 1, %s5189_s15   ;;  %s91_s19 = sadd.s32 1, %s5185_s14 }
   0x5   : > { %s88_s20 = ssub.s32 %s5189_s15, %s5238_s18  ;;  %p101_p0 = scmp.ne.s32.totalorder %s5185_s14, %s5181_s13 }
   0x6   : > { %p89_p1 = scmp.eq.s32.totalorder %s88_s20, 0  ;;  %p102_p2 = scmp.eq.s32.totalorder %s5234_s16, 1 }
   0x7   : > { %p107_p3 = scmp.ne.s32.totalorder %s5181_s13, %s5177_s12  ;;  %p108_p4 = scmp.eq.s32.totalorder %s3906_s17, 1 }
   0x8   : > { %s5249_s21 = scalar_select %p89_p1, %s5185_s14, %s91_s19  }
   0x9   : > { %p5251_p5 = por %p102_p2, %p101_p0  ;;  %p5255_p6 = por %p108_p4, %p107_p3 }
   0xa   : > { %p3909_p7 = scmp.ge.s32.totalorder %s5189_s15, 1  ;;  %p140_p8 = scmp.lt.s32.totalorder %s5189_s15, 3 }
   0xc   : > { %p141_p9 = pnand %p3909_p7, %p140_p8 }
   0xe   : > { %144 = sbr.rel (%p141_p9) target bundleno = 1318 (0x526), region = 32 }
  0x13   : > { %v3928_v0 = vld [vmem:[%s6643_s1 + $0x4] sm:$0xf]  ;;  %vm271_vm0 = vcmask 1043456   ;;  %v4066_v1 = vld [vmem:[%s6643_s1 + $0xc] sm:$0xf]  ;;  %p164_p10 = scmp.lt.s32.totalorder %s5234_s16, 1 }
  0x14   : > { %v5269_v2 = vsel %vm271_vm0, %v3928_v0, 0  ;;  %v5272_v3 = vsel %vm271_vm0, %v4066_v1, 0  ;;  %v186_v4 = vld [vmem:[%s6643_s1] sm:$0xf]  ;;  %v4009_v6 = vld [vmem:[%s6643_s1 + $0x8] sm:$0xf] }
  0x15   : > { %282 = vmatpush.bf16.msra.mxu0 %v5269_v2  ;;  %724 = vmatpush.bf16.msra.mxu3 %v5272_v3  ;;  %v5280_v5 = vsel %vm271_vm0, %v186_v4, 0  ;;  %s165_s30 = scalar_select %p164_p10, %s5234_s16, 1  ;;  %v5288_v7 = vsel %vm271_vm0, %v4009_v6, 0  ;;  %v4222_v8 = vld [vmem:[%s6643_s1 + $0x18] sm:$0xf]  ;;  %vm246_vm1 = vcmask 64512  }
  0x16   : > { %390 = vmatpush.bf16.msra.mxu1 %v5280_v5  ;;  %v4123_v9 = vld [vmem:[%s6643_s1 + $0x10] sm:$0xf]  ;;  %589 = vmatpush.bf16.msra.mxu2 %v5288_v7  ;;  %v5298_v10 = vsel %vm271_vm0, %v4222_v8, 0  ;;  %v4279_v12 = vld [vmem:[%s6643_s1 + $0x1c] sm:$0xf]  ;;  %s161_s29 = sand.u32 1, %s5181_s13  }
  0x17   : > { %s5052_s10 = smul.u32 320, %s165_s30  ;;  %6705 = vst [vmem:[#allocation5_spill] sm:$0xff] %v5298_v10  ;;  %v5301_v11 = vsel %vm271_vm0, %v4123_v9, 0  ;;  %v5309_v13 = vsel %vm271_vm0, %v4279_v12, 0  ;;  %v4181_v14 = vld [vmem:[%s6643_s1 + $0x14] sm:$0xf] }
  0x18   : > { %v5321_v15 = vsel %vm271_vm0, %v4181_v14, 0  ;;  %vm486_vm2 = vsmask.f32 7424  ;;  %s3910_s5 = sshll.u32 %s161_s29, 6  ;;  %s5051_s7 = sshll.u32 %s5234_s16, 6 }
  0x19   : > { %859 = vmatpush.bf16.msrb.mxu0 %v5301_v11  ;;  %s5317_s26 = scalar_lea.vmem %s6642_s0, %s5052_s10  ;;  %1333 = vmatpush.bf16.msrb.mxu3 %v5309_v13  ;;  %s6577_s6 = scalar_lea.vmem [#allocation2], %s3910_s5 }
  0x1a   : > { %1199 = vmatpush.bf16.msrb.mxu2 %v5298_v10  ;;  %v5324_v16 = vld [vmem:[%s5317_s26 + $0x50] sm:$0xff]  ;;  %v4947_v17 = vld [vmem:[%s5317_s26 + $0xa0] sm:$0xff]  ;;  %1065 = vmatpush.bf16.msrb.mxu1 %v5321_v15  ;;  %v4940_v20 = vld [vmem:[%s5317_s26 + $0x8] sm:$0xff]  ;;  %s3840_s10 = scalar_lea.hbm %s6645_s3, %s5051_s7  ;;  %s3841_s11 = sshll.u32 %s6577_s6, 4  ;;  %s3842_s11 = int_to_ptr.vmem [resolvable:$true] %s3841_s11 }
  0x1b   : > { %v4923_v18 = vld [vmem:[%s5317_s26] sm:$0xff]  ;;  %3961 = vmatmul.msk.bf16.vlgmr.msra.gmra.mxu0 %vm246_vm1, %v5324_v16  ;;  %4099 = vmatmul.msk.bf16.vlgmr.msra.gmra.mxu3 %vm246_vm1, %v4947_v17  ;;  %v495_v23 = vshll.u32 %v4940_v20, 16  ;;  %v4941_v28 = vld [vmem:[%s5317_s26 + $0x10] sm:$0xff]  ;;  %v5345_v29 = vld [vmem:[%s5317_s26 + $0x58] sm:$0xff]  ;;  %v499_v32 = vshrl.u32 %v4940_v20, 16  ;;  %s3843_s17 = sshll.u32 %s3840_s10, 4  ;;  %s3844_s17 = int_to_ptr.hbm [resolvable:$true] %s3843_s17 }
  0x1c   : > { %v4939_v19 = vld [vmem:[%s5317_s26] sm:$0xff]  ;;  %4001 = vmatmul.msk.bf16.vlgmr.msra.gmra.mxu1 %vm246_vm1, %v4923_v18  ;;  %v4948_v30 = vld [vmem:[%s5317_s26 + $0xa8] sm:$0xff]  ;;  %v503_v33 = vshll.u32 %v4941_v28, 16  ;;  %v4942_v37 = vld [vmem:[%s5317_s26 + $0x18] sm:$0xff]  ;;  %v507_v41 = vshrl.u32 %v4941_v28, 16  ;;  %s3829_s16 = scalar_lea.sflag [#allocation3], %s161_s29 }
  0x1d   : > { %v488_v21 = vshrl.u32 %v4939_v19, 16  ;;  %v490_v22 = vshll.u32 %v4939_v19, 16  ;;  %1822 = vmatpush.bf16.msra.mxu3 %v5288_v7  ;;  %v497_v25 = vrot.slane %v495_v23, 1  ;;  %v4924_v31 = vld [vmem:[%s5317_s26 + $0x8] sm:$0xff]  ;;  %v5360_v38 = vld [vmem:[%s5317_s26 + $0x60] sm:$0xff]  ;;  %v4949_v39 = vld [vmem:[%s5317_s26 + $0xb0] sm:$0xff] }
  0x1e   : > { %1588 = vmatpush.bf16.msra.mxu1 %v5269_v2  ;;  %v505_v35 = vrot.slane %v503_v33, 1  ;;  %v4925_v40 = vld [vmem:[%s5317_s26 + $0x10] sm:$0xff]  ;;  %v511_v42 = vshll.u32 %v4942_v37, 16  ;;  %v4943_v46 = vld [vmem:[%s5317_s26 + $0x20] sm:$0xff]  ;;  %v5375_v47 = vld [vmem:[%s5317_s26 + $0x68] sm:$0xff]  ;;  %v515_v50 = vshrl.u32 %v4942_v37, 16 }
  0x1f   : > { %v492_v24 = vrot.slane %v490_v22, 1  ;;  %v501_v34 = vor.u32 %v499_v32, %v497_v25  ;;  %v4950_v48 = vld [vmem:[%s5317_s26 + $0xb8] sm:$0xff]  ;;  %v519_v51 = vshll.u32 %v4943_v46, 16  ;;  %v4944_v55 = vld [vmem:[%s5317_s26 + $0x28] sm:$0xff]  ;;  %v5390_v56 = vld [vmem:[%s5317_s26 + $0x70] sm:$0xff]  ;;  %v523_v59 = vshrl.u32 %v4943_v46, 16 }
  0x20   : > { %v509_v43 = vor.u32 %v507_v41, %v505_v35  ;;  %v513_v44 = vrot.slane %v511_v42, 1  ;;  %v4926_v49 = vld [vmem:[%s5317_s26 + $0x18] sm:$0xff]  ;;  %v4951_v57 = vld [vmem:[%s5317_s26 + $0xc0] sm:$0xff]  ;;  %v527_v60 = vshll.u32 %v4944_v55, 16  ;;  %v4945_v0 = vld [vmem:[%s5317_s26 + $0x30] sm:$0xff]  ;;  %v531_v8 = vshrl.u32 %v4944_v55, 16 }
  0x21   : > { %v493_v26 = vor.u32 %v492_v24, %v488_v21  ;;  %v5354_v36 = vsel %vm486_vm2, %v501_v34, %v505_v35  ;;  %v521_v53 = vrot.slane %v519_v51, 1  ;;  %v4927_v58 = vld [vmem:[%s5317_s26 + $0x20] sm:$0xff]  ;;  %v5405_v1 = vld [vmem:[%s5317_s26 + $0x78] sm:$0xff]  ;;  %v4952_v4 = vld [vmem:[%s5317_s26 + $0xc8] sm:$0xff]  ;;  %v535_v9 = vshll.u32 %v4945_v0, 16  ;;  %s5141_s19 = sshra.s32 %s3844_s17, 4  ;;  %s5142_s19 = int_to_ptr.hbm [resolvable:$true] %s5141_s19 }
  0x22   : > { %v5369_v45 = vsel %vm486_vm2, %v509_v43, %v513_v44  ;;  %v517_v52 = vor.u32 %v515_v50, %v513_v44  ;;  %v529_v62 = vrot.slane %v527_v60, 1  ;;  %v4928_v6 = vld [vmem:[%s5317_s26 + $0x28] sm:$0xff]  ;;  %v4946_v18 = vld [vmem:[%s5317_s26 + $0x38] sm:$0xff]  ;;  %v5420_v19 = vld [vmem:[%s5317_s26 + $0x80] sm:$0xff]  ;;  %v539_v22 = vshrl.u32 %v4945_v0, 16  ;;  %s5143_s20 = scalar_lea.hbm %s5142_s19, 64  ;;  %p5148_p0 = scmp.lt.s32.totalorder %s5142_s19, %s6645_s3 }
  0x23   : > { %v5338_v27 = vsel %vm486_vm2, %v493_v26, %v497_v25  ;;  %v525_v61 = vor.u32 %v523_v59, %v521_v53  ;;  %v537_v14 = vrot.slane %v535_v9, 1  ;;  %v4953_v20 = vld [vmem:[%s5317_s26 + $0xd0] sm:$0xff]  ;;  %v543_v23 = vshll.u32 %v4946_v18, 16  ;;  %v440_v26 = vld [vmem:[%s5317_s26 + $0x40] sm:$0x1]  ;;  %v5442_v34 = vld [vmem:[%s5317_s26 + $0x88] sm:$0xff]  ;;  %p5144_p11 = scmp.ne.s32.totalorder %s5142_s19, %s5143_s20 }
  0x24   : > { %4042 = vmatmul.msk.bf16.vlgmr.msra.gmra.mxu2 %vm246_vm1, %v5338_v27  ;;  %v5384_v54 = vsel %vm486_vm2, %v517_v52, %v521_v53  ;;  %v533_v12 = vor.u32 %v531_v8, %v529_v62  ;;  %v4929_v21 = vld [vmem:[%s5317_s26 + $0x30] sm:$0xff]  ;;  %v4954_v35 = vld [vmem:[%s5317_s26 + $0xd8] sm:$0xff]  ;;  %v4963_v41 = vld [vmem:[%s5317_s26 + $0xa0] sm:$0xff] }
  0x25   : > { %1629 = vmatpush.bf16.msra.mxu2 %v5280_v5  ;;  %v5399_v63 = vsel %vm486_vm2, %v525_v61, %v529_v62  ;;  %v541_v24 = vor.u32 %v539_v22, %v537_v14  ;;  %v545_v25 = vrot.slane %v543_v23, 1  ;;  %v4930_v37 = vld [vmem:[%s5317_s26 + $0x38] sm:$0xff]  ;;  %v4964_v44 = vld [vmem:[%s5317_s26 + $0xa8] sm:$0xff]  ;;  %v966_v46 = vshll.u32 %v4963_v41, 16  ;;  %v5458_v55 = vld [vmem:[%s5317_s26 + $0xf0] sm:$0xff]  ;;  %p5145_p12 = pnand %p5144_p11, %p5251_p5 }
  0x26   : > { %v5414_v17 = vsel %vm486_vm2, %v533_v12, %v537_v14  ;;  %v971_v51 = vshll.u32 %v4964_v44, 16  ;;  %v4965_v62 = vld [vmem:[%s5317_s26 + $0xb0] sm:$0xff]  ;;  %v975_v9 = vshrl.u32 %v4964_v44, 16  ;;  %v5480_v23 = vld [vmem:[%s5317_s26 + $0xf8] sm:$0xff] }
  0x27   : > { %v5430_v28 = vsel %vm486_vm2, %v541_v24, %v545_v25  ;;  %v968_v50 = vrot.slane %v966_v46, 1  ;;  %v979_v12 = vshll.u32 %v4965_v62, 16  ;;  %v5483_v24 = vld [vmem:[%s5317_s26 + $0x60] sm:$0xff]  ;;  %p5146_p13 = pneg %p5145_p12 }
  0x28   : > { %v973_v53 = vrot.slane %v971_v51, 1 }
  0x2a   : > { %v977_v14 = vor.u32 %v975_v9, %v973_v53 }
  0x2b   : > { %3962 = vmatmul.msk.bf16.gmra.mxu0 %vm246_vm1, %v5345_v29  ;;  %4100 = vmatmul.msk.bf16.gmra.mxu3 %vm246_vm1, %v4948_v30  ;;  %v476_v30 = vunpack.c.l.b16 %v440_v26 }
  0x2c   : > { %4002 = vmatmul.msk.bf16.gmra.mxu1 %vm246_vm1, %v4924_v31  ;;  %v4320_v31 = vld [vmem:[%s6643_s1 + $0x20] sm:$0xf] }
  0x2d   : > { %v485_v32 = vpack.c.b16 %v476_v30, %v476_v30  ;;  %v5438_v33 = vsel %vm271_vm0, %v4320_v31, 0 }
  0x2e   : > { %1539 = vmatpush.bf16.msra.mxu0 %v5438_v33 }
  0x34   : > { %4043 = vmatmul.msk.bf16.gmra.mxu2 %vm246_vm1, %v5354_v36 }
  0x3b   : > { %3963 = vmatmul.msk.bf16.gmra.mxu0 %vm246_vm1, %v5360_v38  ;;  %4101 = vmatmul.msk.bf16.gmra.mxu3 %vm246_vm1, %v4949_v39  ;;  %v547_v39 = vshrl.u32 %v4946_v18, 16  ;;  %v981_v18 = vrot.slane %v979_v12, 1  ;;  %v4973_v12 = vld [vmem:[%s5317_s26 + $0x18] sm:$0xff] }
  0x3c   : > { %4003 = vmatmul.msk.bf16.gmra.mxu1 %vm246_vm1, %v4925_v40  ;;  %v551_v40 = vshll.u32 %v485_v32, 16 }
  0x3d   : > { %v549_v42 = vor.u32 %v547_v39, %v545_v25  ;;  %v5486_v30 = vsel %vm486_vm2, %v977_v14, %v981_v18 }
  0x3e   : > { %v553_v43 = vrot.slane %v551_v40, 1  ;;  %v4972_v40 = vld [vmem:[%s5317_s26 + $0x10] sm:$0xff] }
  0x44   : > { %4044 = vmatmul.msk.bf16.gmra.mxu2 %vm246_vm1, %v5369_v45 }
  0x4b   : > { %3964 = vmatmul.msk.bf16.gmra.mxu0 %vm246_vm1, %v5375_v47  ;;  %4102 = vmatmul.msk.bf16.gmra.mxu3 %vm246_vm1, %v4950_v48  ;;  %v5453_v48 = vsel %vm486_vm2, %v549_v42, %v553_v43  ;;  %v983_v43 = vshrl.u32 %v4965_v62, 16 }
  0x4c   : > { %4004 = vmatmul.msk.bf16.gmra.mxu1 %vm246_vm1, %v4926_v49  ;;  %v964_v49 = vshrl.u32 %v4963_v41, 16 }
  0x4d   : > { %v985_v46 = vor.u32 %v983_v43, %v981_v18 }
  0x4e   : > { %v969_v52 = vor.u32 %v968_v50, %v964_v49 }
  0x50   : > { %v5464_v60 = vsel %vm486_vm2, %v969_v52, %v973_v53  ;;  %v5500_v53 = vld [vmem:[%s5317_s26 + $0x100] sm:$0xff] }
  0x54   : > { %4045 = vmatmul.msk.bf16.gmra.mxu2 %vm246_vm1, %v5384_v54 }
  0x5b   : > { %3965 = vmatmul.msk.bf16.gmra.mxu0 %vm246_vm1, %v5390_v56  ;;  %4103 = vmatmul.msk.bf16.gmra.mxu3 %vm246_vm1, %v4951_v57  ;;  %v5461_v57 = vld [vmem:[%s5317_s26 + $0x58] sm:$0xff] }
  0x5c   : > { %4005 = vmatmul.msk.bf16.gmra.mxu1 %vm246_vm1, %v4927_v58 }
  0x64   : > { %4046 = vmatmul.msk.bf16.gmra.mxu2 %vm246_vm1, %v5399_v63 }
  0x6b   : > { %3966 = vmatmul.msk.bf16.gmra.mxu0 %vm246_vm1, %v5405_v1  ;;  %4104 = vmatmul.msk.bf16.gmra.mxu3 %vm246_vm1, %v4952_v4  ;;  %v4971_v4 = vld [vmem:[%s5317_s26 + $0x8] sm:$0xff] }
  0x6c   : > { %4006 = vmatmul.msk.bf16.gmra.mxu1 %vm246_vm1, %v4928_v6 }
  0x74   : > { %4047 = vmatmul.msk.bf16.gmra.mxu2 %vm246_vm1, %v5414_v17 }
  0x7b   : > { %3967 = vmatmul.msk.bf16.gmra.mxu0 %vm246_vm1, %v5420_v19  ;;  %4105 = vmatmul.msk.bf16.gmra.mxu3 %vm246_vm1, %v4953_v20 }
  0x7c   : > { %4007 = vmatmul.msk.bf16.gmra.mxu1 %vm246_vm1, %v4929_v21 }
  0x84   : > { %4048 = vmatmul.msk.bf16.gmra.mxu2 %vm246_vm1, %v5430_v28 }
  0x8b   : > { %3968 = vmatmul.msk.bf16.gmra.mxu0 %vm246_vm1, %v5442_v34  ;;  %4106 = vmatmul.msk.bf16.gmra.mxu3 %vm246_vm1, %v4954_v35  ;;  %v4966_v35 = vld [vmem:[%s5317_s26 + $0xb8] sm:$0xff] }
  0x8c   : > { %4008 = vmatmul.msk.bf16.gmra.mxu1 %vm246_vm1, %v4930_v37  ;;  %v987_v44 = vshll.u32 %v4966_v35, 16 }
  0x8e   : > { %v989_v49 = vrot.slane %v987_v44, 1 }
  0x94   : > { %4049 = vmatmul.msk.bf16.gmra.mxu2 %vm246_vm1, %v5453_v48 }
  0x98   : > { %v284_v58 = vpop.f32.mrf.mxu0 }
  0x99   : > { %v392_v59 = vpop.f32.mrf.mxu1 }
  0x9a   : > { %v393_v61 = vadd.f32 %v392_v59, %v284_v58  ;;  %v5503_v58 = vld [vmem:[%s5317_s26 + $0x68] sm:$0xff] }
  0x9b   : > { %4156 = vmatmul.msk.bf16.vlgmr.msrb.gmra.mxu0 %vm246_vm1, %v5458_v55  ;;  %4312 = vmatmul.msk.bf16.vlgmr.msrb.gmra.mxu3 %vm246_vm1, %v5461_v57 }
  0x9c   : > { %4214 = vmatmul.msk.bf16.vlgmr.msrb.gmra.mxu1 %vm246_vm1, %v5464_v60  ;;  %1871 = vmatpush.bf16.msrb.mxu0 %v5272_v3 }
  0x9d   : > { %2170 = vmatpush.bf16.msrb.mxu3 %v5298_v10  ;;  %1920 = vmatpush.bf16.msrb.mxu1 %v5301_v11 }
  0x9e   : > { %v726_v0 = vpop.f32.mrf.mxu3 }
  0xa0   : > { %v286_v6 = vpop.f32.mrf.mxu0 }
  0xa1   : > { %v394_v8 = vpop.f32.mrf.mxu1  ;;  %v4967_v6 = vld [vmem:[%s5317_s26 + $0xc0] sm:$0xff] }
  0xa4   : > { %4255 = vmatmul.msk.bf16.vlgmr.msrb.gmra.mxu2 %vm246_vm1, %v4971_v4 }
  0xa5   : > { %2121 = vmatpush.bf16.msrb.mxu2 %v5321_v15 }
  0xa6   : > { %v728_v21 = vpop.f32.mrf.mxu3 }
  0xa7   : > { %v591_v20 = vpop.f32.mrf.mxu2  ;;  %v995_v21 = vshll.u32 %v4967_v6, 16 }
  0xa8   : > { %v623_v22 = vadd.f32 %v591_v20, %v393_v61  ;;  %v288_v25 = vpop.f32.mrf.mxu0  ;;  %v991_v20 = vshrl.u32 %v4966_v35, 16 }
  0xa9   : > { %v396_v26 = vpop.f32.mrf.mxu1 }
  0xaa   : > { %v5488_v31 = vadd.f32 %v726_v0, %v623_v22  ;;  %v397_v32 = vadd.f32 %v396_v26, %v288_v25  ;;  %v5506_v0 = vsel %vm486_vm2, %v985_v46, %v989_v49  ;;  %v993_v22 = vor.u32 %v991_v20, %v989_v49  ;;  %v4968_v46 = vld [vmem:[%s5317_s26 + $0xc8] sm:$0xff]  ;;  %v5540_v20 = vld [vmem:[%s5317_s26 + $0x110] sm:$0xff] }
  0xab   : > { %4157 = vmatmul.msk.bf16.gmra.mxu0 %vm246_vm1, %v5480_v23  ;;  %4313 = vmatmul.msk.bf16.gmra.mxu3 %vm246_vm1, %v5483_v24  ;;  %6706 = vst [vmem:[#allocation6_spill] sm:$0xff] %v5506_v0  ;;  %v997_v25 = vrot.slane %v995_v21, 1  ;;  %v5543_v21 = vld [vmem:[%s5317_s26 + $0x78] sm:$0xff] }
  0xac   : > { %4215 = vmatmul.msk.bf16.gmra.mxu1 %vm246_vm1, %v5486_v30  ;;  %6710 = vst [vmem:[#allocation10_spill] sm:$0xff] %v5540_v20 }
  0xad   : > { %v5526_v43 = vsel %vm486_vm2, %v993_v22, %v997_v25  ;;  %6711 = vst [vmem:[#allocation11_spill] sm:$0xff] %v5543_v21 }
  0xae   : > { %v730_v39 = vpop.f32.mrf.mxu3  ;;  %6709 = vst [vmem:[#allocation9_spill] sm:$0xff] %v5526_v43 }
  0xaf   : > { %v593_v37 = vpop.f32.mrf.mxu2 }
  0xb0   : > { %v290_v41 = vpop.f32.mrf.mxu0 }
  0xb1   : > { %v398_v42 = vpop.f32.mrf.mxu1 }
  0xb4   : > { %4256 = vmatmul.msk.bf16.gmra.mxu2 %vm246_vm1, %v4972_v40  ;;  %v5523_v40 = vld [vmem:[%s5317_s26 + $0x70] sm:$0xff] }
  0xb5   : > { %6708 = vst [vmem:[#allocation8_spill] sm:$0xff] %v5523_v40 }
  0xb6   : > { %v732_v51 = vpop.f32.mrf.mxu3 }
  0xb7   : > { %v595_v50 = vpop.f32.mrf.mxu2  ;;  %v4974_v51 = vld [vmem:[%s5317_s26 + $0x20] sm:$0xff] }
  0xb8   : > { %v624_v52 = vadd.f32 %v595_v50, %v397_v32  ;;  %v292_v59 = vpop.f32.mrf.mxu0 }
  0xb9   : > { %v400_v61 = vpop.f32.mrf.mxu1 }
  0xba   : > { %v5508_v62 = vadd.f32 %v730_v39, %v624_v52  ;;  %v401_v4 = vadd.f32 %v400_v61, %v292_v59  ;;  %v5520_v39 = vld [vmem:[%s5317_s26 + $0x108] sm:$0xff]  ;;  %v999_v61 = vshrl.u32 %v4967_v6, 16 }
  0xbb   : > { %4158 = vmatmul.msk.bf16.gmra.mxu0 %vm246_vm1, %v5500_v53  ;;  %4314 = vmatmul.msk.bf16.gmra.mxu3 %vm246_vm1, %v5503_v58  ;;  %6707 = vst [vmem:[#allocation7_spill] sm:$0xff] %v5520_v39 }
  0xbc   : > { %4216 = vmatmul.msk.bf16.gmra.mxu1 %vm246_vm1, %v5506_v0 }
  0xbe   : > { %v734_v9 = vpop.f32.mrf.mxu3 }
  0xbf   : > { %v597_v8 = vpop.f32.mrf.mxu2 }
  0xc0   : > { %v294_v14 = vpop.f32.mrf.mxu0  ;;  %v1001_v8 = vor.u32 %v999_v61, %v997_v25  ;;  %v4969_v25 = vld [vmem:[%s5317_s26 + $0xd0] sm:$0xff] }
  0xc1   : > { %v402_v18 = vpop.f32.mrf.mxu1 }
  0xc4   : > { %4257 = vmatmul.msk.bf16.gmra.mxu2 %vm246_vm1, %v4973_v12 }
  0xc6   : > { %v736_v32 = vpop.f32.mrf.mxu3 }
  0xc7   : > { %v599_v26 = vpop.f32.mrf.mxu2 }
  0xc8   : > { %v625_v37 = vadd.f32 %v599_v26, %v401_v4  ;;  %v296_v41 = vpop.f32.mrf.mxu0  ;;  %v1003_v4 = vshll.u32 %v4968_v46, 16 }
  0xc9   : > { %v404_v42 = vpop.f32.mrf.mxu1 }
  0xca   : > { %v5528_v35 = vadd.f32 %v734_v9, %v625_v37  ;;  %v405_v44 = vadd.f32 %v404_v42, %v296_v41  ;;  %v1005_v9 = vrot.slane %v1003_v4, 1 }
  0xcb   : > { %4159 = vmatmul.msk.bf16.gmra.mxu0 %vm246_vm1, %v5520_v39  ;;  %4315 = vmatmul.msk.bf16.gmra.mxu3 %vm246_vm1, %v5523_v40 }
  0xcc   : > { %4217 = vmatmul.msk.bf16.gmra.mxu1 %vm246_vm1, %v5526_v43  ;;  %v5546_v32 = vsel %vm486_vm2, %v1001_v8, %v1005_v9 }
  0xcd   : > { %6712 = vst [vmem:[#allocation12_spill] sm:$0xff] %v5546_v32 }
  0xce   : > { %v738_v50 = vpop.f32.mrf.mxu3 }
  0xcf   : > { %v601_v49 = vpop.f32.mrf.mxu2 }
  0xd0   : > { %v298_v52 = vpop.f32.mrf.mxu0 }
  0xd1   : > { %v406_v59 = vpop.f32.mrf.mxu1  ;;  %v1011_v52 = vshll.u32 %v4969_v25, 16 }
  0xd3   : > { %v1013_v61 = vrot.slane %v1011_v52, 1  ;;  %v1015_v52 = vshrl.u32 %v4969_v25, 16 }
  0xd4   : > { %4258 = vmatmul.msk.bf16.gmra.mxu2 %vm246_vm1, %v4974_v51 }
  0xd6   : > { %v740_v14 = vpop.f32.mrf.mxu3 }
  0xd7   : > { %v603_v12 = vpop.f32.mrf.mxu2  ;;  %v5560_v14 = vld [vmem:[%s5317_s26 + $0x118] sm:$0xff] }
  0xd8   : > { %v626_v18 = vadd.f32 %v603_v12, %v405_v44  ;;  %v300_v22 = vpop.f32.mrf.mxu0  ;;  %v4975_v44 = vld [vmem:[%s5317_s26 + $0x28] sm:$0xff]  ;;  %6713 = vst [vmem:[#allocation13_spill] sm:$0xff] %v5560_v14 }
  0xd9   : > { %v408_v26 = vpop.f32.mrf.mxu1 }
  0xda   : > { %v5548_v6 = vadd.f32 %v738_v50, %v626_v18  ;;  %v409_v37 = vadd.f32 %v408_v26, %v300_v22  ;;  %v1007_v50 = vshrl.u32 %v4968_v46, 16  ;;  %v5563_v18 = vld [vmem:[%s5317_s26 + $0x80] sm:$0xff] }
  0xdb   : > { %4160 = vmatmul.msk.bf16.gmra.mxu0 %vm246_vm1, %v5540_v20  ;;  %4316 = vmatmul.msk.bf16.gmra.mxu3 %vm246_vm1, %v5543_v21  ;;  %6714 = vst [vmem:[#allocation14_spill] sm:$0xff] %v5563_v18 }
  0xdc   : > { %4218 = vmatmul.msk.bf16.gmra.mxu1 %vm246_vm1, %v5546_v32  ;;  %v1009_v59 = vor.u32 %v1007_v50, %v1005_v9  ;;  %v4970_v9 = vld [vmem:[%s5317_s26 + $0xd8] sm:$0xff] }
  0xde   : > { %v742_v42 = vpop.f32.mrf.mxu3 }
  0xdf   : > { %v605_v41 = vpop.f32.mrf.mxu2 }
  0xe0   : > { %v302_v49 = vpop.f32.mrf.mxu0  ;;  %v5566_v41 = vsel %vm486_vm2, %v1009_v59, %v1013_v61  ;;  %v1019_v59 = vshll.u32 %v4970_v9, 16 }
  0xe1   : > { %v410_v51 = vpop.f32.mrf.mxu1  ;;  %6715 = vst [vmem:[#allocation15_spill] sm:$0xff] %v5566_v41 }
  0xe2   : > { %v4976_v51 = vld [vmem:[%s5317_s26 + $0x30] sm:$0xff] }
  0xe4   : > { %4259 = vmatmul.msk.bf16.gmra.mxu2 %vm246_vm1, %v4975_v44 }
  0xe6   : > { %v744_v8 = vpop.f32.mrf.mxu3 }
  0xe7   : > { %v607_v4 = vpop.f32.mrf.mxu2  ;;  %v1021_v8 = vrot.slane %v1019_v59, 1  ;;  %v4977_v59 = vld [vmem:[%s5317_s26 + $0x38] sm:$0xff] }
  0xe8   : > { %v627_v12 = vadd.f32 %v607_v4, %v409_v37  ;;  %v304_v22 = vpop.f32.mrf.mxu0  ;;  %v1017_v4 = vor.u32 %v1015_v52, %v1013_v61 }
  0xe9   : > { %v412_v26 = vpop.f32.mrf.mxu1 }
  0xea   : > { %v5568_v46 = vadd.f32 %v742_v42, %v627_v12  ;;  %v413_v49 = vadd.f32 %v412_v26, %v304_v22  ;;  %v4180_v26 = vld [vmem:[%s5317_s26 + $0xe0] sm:$0x1] }
  0xeb   : > { %4161 = vmatmul.msk.bf16.gmra.mxu0 %vm246_vm1, %v5560_v14  ;;  %4317 = vmatmul.msk.bf16.gmra.mxu3 %vm246_vm1, %v5563_v18  ;;  %v5584_v18 = vld [vmem:[%s5317_s26 + $0x88] sm:$0xff]  ;;  %v953_v25 = vunpack.c.l.b16 %v4180_v26 }
  0xec   : > { %4219 = vmatmul.msk.bf16.gmra.mxu1 %vm246_vm1, %v5566_v41  ;;  %v5581_v41 = vld [vmem:[%s5317_s26 + $0x120] sm:$0xff]  ;;  %6717 = vst [vmem:[#allocation17_spill] sm:$0xff] %v5584_v18 }
  0xed   : > { %6716 = vst [vmem:[#allocation16_spill] sm:$0xff] %v5581_v41  ;;  %v962_v61 = vpack.c.b16 %v953_v25, %v953_v25  ;;  %v5603_v25 = vld [vmem:[%s5317_s26 + $0x90] sm:$0xff] }
  0xee   : > { %v746_v44 = vpop.f32.mrf.mxu3  ;;  %6720 = vst [vmem:[#allocation20_spill] sm:$0xff] %v5603_v25 }
  0xef   : > { %v609_v37 = vpop.f32.mrf.mxu2 }
  0xf0   : > { %v306_v50 = vpop.f32.mrf.mxu0 }
  0xf1   : > { %v414_v42 = vpop.f32.mrf.mxu1  ;;  %v5587_v50 = vsel %vm486_vm2, %v1017_v4, %v1021_v8  ;;  %v1027_v4 = vshll.u32 %v962_v61, 16 }
  0xf2   : > { %6718 = vst [vmem:[#allocation18_spill] sm:$0xff] %v5587_v50 }
  0xf4   : > { %4260 = vmatmul.msk.bf16.gmra.mxu2 %vm246_vm1, %v4976_v51 }
  0xf6   : > { %v748_v22 = vpop.f32.mrf.mxu3 }
  0xf7   : > { %v611_v12 = vpop.f32.mrf.mxu2  ;;  %v1029_v22 = vrot.slane %v1027_v4, 1 }
  0xf8   : > { %v628_v10 = vadd.f32 %v611_v12, %v413_v49  ;;  %v308_v37 = vpop.f32.mrf.mxu0 }
  0xf9   : > { %v416_v14 = vpop.f32.mrf.mxu1 }
  0xfa   : > { %v5589_v42 = vadd.f32 %v746_v44, %v628_v10  ;;  %v417_v51 = vadd.f32 %v416_v14, %v308_v37  ;;  %v1023_v14 = vshrl.u32 %v4970_v9, 16 }
  0xfb   : > { %4162 = vmatmul.msk.bf16.gmra.mxu0 %vm246_vm1, %v5581_v41  ;;  %4318 = vmatmul.msk.bf16.gmra.mxu3 %vm246_vm1, %v5584_v18  ;;  %v5600_v18 = vld [vmem:[%s5317_s26 + $0x128] sm:$0xff] }
  0xfc   : > { %4220 = vmatmul.msk.bf16.gmra.mxu1 %vm246_vm1, %v5587_v50  ;;  %v1025_v12 = vor.u32 %v1023_v14, %v1021_v8  ;;  %6719 = vst [vmem:[#allocation19_spill] sm:$0xff] %v5600_v18  ;;  %v4996_v14 = vld [vmem:[%s5317_s26 + $0x58] sm:$0xff] }
  0xfe   : > { %v750_v52 = vpop.f32.mrf.mxu3  ;;  %v5608_v9 = vsel %vm486_vm2, %v1025_v12, %v1029_v22  ;;  %v4978_v12 = vld [vmem:[%s5317_s26 + $0x40] sm:$0xff] }
  0xff   : > { %v613_v49 = vpop.f32.mrf.mxu2  ;;  %6721 = vst [vmem:[#allocation21_spill] sm:$0xff] %v5608_v9 }
 0x100   : > { %v310_v10 = vpop.f32.mrf.mxu0  ;;  %v4987_v49 = vld [vmem:[%s5317_s26 + $0x8] sm:$0xff] }
 0x101   : > { %v418_v44 = vpop.f32.mrf.mxu1  ;;  %v4995_v10 = vld [vmem:[%s5317_s26 + $0x50] sm:$0xff]  ;;  %v1438_v22 = vshrl.u32 %v4987_v49, 16 }
 0x102   : > { %v1726_v4 = vshll.u32 %v4995_v10, 16 }
 0x104   : > { %4261 = vmatmul.msk.bf16.gmra.mxu2 %vm246_vm1, %v4977_v59  ;;  %v4988_v59 = vld [vmem:[%s5317_s26 + $0x10] sm:$0xff]  ;;  %v1728_v32 = vrot.slane %v1726_v4, 1 }
 0x106   : > { %v752_v37 = vpop.f32.mrf.mxu3 }
 0x107   : > { %v615_v26 = vpop.f32.mrf.mxu2 }
 0x108   : > { %v629_v50 = vadd.f32 %v615_v26, %v417_v51  ;;  %v312_v41 = vpop.f32.mrf.mxu0  ;;  %v1440_v51 = vshll.u32 %v4987_v49, 16 }
 0x109   : > { %v420_v44 = vpop.f32.mrf.mxu1 }
 0x10a   : > { %v5610_v61 = vadd.f32 %v750_v52, %v629_v50  ;;  %v421_v8 = vadd.f32 %v420_v44, %v312_v41  ;;  %v1442_v50 = vrot.slane %v1440_v51, 1  ;;  %v1445_v41 = vshll.u32 %v4988_v59, 16 }
 0x10b   : > { %4163 = vmatmul.msk.bf16.gmra.mxu0 %vm246_vm1, %v5600_v18  ;;  %4319 = vmatmul.msk.bf16.gmra.mxu3 %vm246_vm1, %v5603_v25  ;;  %v1724_v44 = vshrl.u32 %v4995_v10, 16  ;;  %v1731_v18 = vshll.u32 %v4996_v14, 16 }
 0x10c   : > { %4221 = vmatmul.msk.bf16.gmra.mxu1 %vm246_vm1, %v5608_v9  ;;  %v1443_v25 = vor.u32 %v1442_v50, %v1438_v22  ;;  %v1447_v20 = vrot.slane %v1445_v41, 1 }
 0x10d   : > { %v1729_v9 = vor.u32 %v1728_v32, %v1724_v44  ;;  %v1733_v43 = vrot.slane %v1731_v18, 1  ;;  %v4997_v32 = vld [vmem:[%s5317_s26 + $0x60] sm:$0xff]  ;;  %v1449_v18 = vshrl.u32 %v4988_v59, 16 }
 0x10e   : > { %v754_v37 = vpop.f32.mrf.mxu3  ;;  %v5623_v49 = vsel %vm486_vm2, %v1443_v25, %v1447_v20 }
 0x10f   : > { %v617_v26 = vpop.f32.mrf.mxu2  ;;  %v1734_v10 = vsel %vm486_vm2, %v1729_v9, %v1733_v43  ;;  %v1735_v9 = vshrl.u32 %v4996_v14, 16 }
 0x110   : > { %v314_v52 = vpop.f32.mrf.mxu0 }
 0x111   : > { %v422_v21 = vpop.f32.mrf.mxu1  ;;  %v1737_v50 = vor.u32 %v1735_v9, %v1733_v43 }
 0x114   : > { %4262 = vmatmul.msk.bf16.gmra.mxu2 %vm246_vm1, %v4978_v12 }
 0x116   : > { %v756_v26 = vpop.f32.mrf.mxu3 }
 0x117   : > { %v619_v40 = vpop.f32.mrf.mxu2 }
 0x118   : > { %v630_v39 = vadd.f32 %v619_v40, %v421_v8  ;;  %v861_v0 = vpop.f32.mrf.mxu0  ;;  %v4989_v40 = vld [vmem:[%s5317_s26 + $0x18] sm:$0xff]  ;;  %v1739_v8 = vshll.u32 %v4997_v32, 16 }
 0x119   : > { %v893_v51 = vadd.f32 %v861_v0, %v5488_v31  ;;  %v1067_v21 = vpop.f32.mrf.mxu1  ;;  %v1453_v25 = vshll.u32 %v4989_v40, 16 }
 0x11a   : > { %v5627_v4 = vadd.f32 %v754_v37, %v630_v39  ;;  %v1741_v52 = vrot.slane %v1739_v8, 1 }
 0x11b   : > { %v1099_v12 = vadd.f32 %v1067_v21, %v893_v51  ;;  %4353 = vmatmul.msk.bf16.vlgmr.msra.gmra.mxu0 %vm246_vm1, %v5623_v49  ;;  %4426 = vmatmul.msk.bf16.vlgmr.msra.gmra.mxu3 %vm246_vm1, %v1734_v10  ;;  %v1455_v22 = vrot.slane %v1453_v25, 1  ;;  %v4990_v21 = vld [vmem:[%s5317_s26 + $0x20] sm:$0xff]  ;;  %v1457_v25 = vshrl.u32 %v4989_v40, 16 }
 0x11c   : > { %4361 = vmatmul.msk.bf16.vlgmr.msra.gmra.mxu1 %vm246_vm1, %v5338_v27  ;;  %2219 = vmatpush.bf16.msra.mxu0 %v5309_v13  ;;  %v1451_v27 = vor.u32 %v1449_v18, %v1447_v20  ;;  %v1742_v14 = vsel %vm486_vm2, %v1737_v50, %v1741_v52  ;;  %v1461_v9 = vshll.u32 %v4990_v21, 16 }
 0x11d   : > { %2518 = vmatpush.bf16.msra.mxu3 %v5280_v5  ;;  %2420 = vmatpush.bf16.msra.mxu1 %v5438_v33 }
 0x11e   : > { %v1335_v0 = vpop.f32.mrf.mxu3  ;;  %v5643_v59 = vsel %vm486_vm2, %v1451_v27, %v1455_v22  ;;  %v1463_v27 = vrot.slane %v1461_v9, 1 }
 0x11f   : > { %v621_v31 = vpop.f32.mrf.mxu2 }
 0x120   : > { %v863_v39 = vpop.f32.mrf.mxu0 }
 0x121   : > { %v1069_v37 = vpop.f32.mrf.mxu1 }
 0x122   : > { %v1459_v37 = vor.u32 %v1457_v25, %v1455_v22  ;;  %v4991_v22 = vld [vmem:[%s5317_s26 + $0x28] sm:$0xff]  ;;  %v1465_v25 = vshrl.u32 %v4990_v21, 16 }
 0x123   : > { %v1469_v9 = vshll.u32 %v4991_v22, 16 }
 0x124   : > { %4369 = vmatmul.msk.bf16.vlgmr.msra.gmra.mxu2 %vm246_vm1, %v5324_v16 }
 0x125   : > { %2477 = vmatpush.bf16.msra.mxu2 %v5269_v2 }
 0x126   : > { %v1337_v44 = vpop.f32.mrf.mxu3 }
 0x127   : > { %v1201_v41 = vpop.f32.mrf.mxu2 }
 0x128   : > { %v1233_v26 = vadd.f32 %v1201_v41, %v1099_v12  ;;  %v865_v10 = vpop.f32.mrf.mxu0  ;;  %v4998_v12 = vld [vmem:[%s5317_s26 + $0x68] sm:$0xff] }
 0x129   : > { %v894_v51 = vadd.f32 %v865_v10, %v5508_v62  ;;  %v1071_v16 = vpop.f32.mrf.mxu1  ;;  %v1743_v62 = vshrl.u32 %v4997_v32, 16  ;;  %v1747_v8 = vshll.u32 %v4998_v12, 16 }
 0x12a   : > { %v5647_v20 = vadd.f32 %v1335_v0, %v1233_v26 }
 0x12b   : > { %v1100_v43 = vadd.f32 %v1071_v16, %v894_v51  ;;  %4354 = vmatmul.msk.bf16.gmra.mxu0 %vm246_vm1, %v5643_v59  ;;  %4427 = vmatmul.msk.bf16.gmra.mxu3 %vm246_vm1, %v1742_v14  ;;  %v1745_v50 = vor.u32 %v1743_v62, %v1741_v52  ;;  %v1749_v41 = vrot.slane %v1747_v8, 1  ;;  %v5659_v14 = vsel %vm486_vm2, %v1459_v37, %v1463_v27  ;;  %v4999_v52 = vld [vmem:[%s5317_s26 + $0x70] sm:$0xff] }
 0x12c   : > { %4362 = vmatmul.msk.bf16.gmra.mxu1 %vm246_vm1, %v5354_v36  ;;  %v1755_v62 = vshll.u32 %v4999_v52, 16  ;;  %v1467_v8 = vor.u32 %v1465_v25, %v1463_v27  ;;  %v4992_v27 = vld [vmem:[%s5317_s26 + $0x30] sm:$0xff] }
 0x12d   : > { %v1750_v40 = vsel %vm486_vm2, %v1745_v50, %v1749_v41  ;;  %v1477_v25 = vshll.u32 %v4992_v27, 16 }
 0x12e   : > { %v1339_v39 = vpop.f32.mrf.mxu3  ;;  %v1757_v50 = vrot.slane %v1755_v62, 1 }
 0x12f   : > { %v1203_v31 = vpop.f32.mrf.mxu2  ;;  %v1479_v62 = vrot.slane %v1477_v25, 1 }
 0x130   : > { %v867_v18 = vpop.f32.mrf.mxu0 }
 0x131   : > { %v1073_v0 = vpop.f32.mrf.mxu1 }
 0x132   : > { %v1471_v0 = vrot.slane %v1469_v9, 1 }
 0x134   : > { %4370 = vmatmul.msk.bf16.gmra.mxu2 %vm246_vm1, %v5345_v29 }
 0x136   : > { %v1341_v44 = vpop.f32.mrf.mxu3 }
 0x137   : > { %v1205_v36 = vpop.f32.mrf.mxu2 }
 0x138   : > { %v1234_v26 = vadd.f32 %v1205_v36, %v1100_v43  ;;  %v869_v10 = vpop.f32.mrf.mxu0 }
 0x139   : > { %v895_v32 = vadd.f32 %v869_v10, %v5528_v35  ;;  %v1075_v51 = vpop.f32.mrf.mxu1  ;;  %v1751_v35 = vshrl.u32 %v4998_v12, 16  ;;  %v5675_v10 = vsel %vm486_vm2, %v1467_v8, %v1471_v0 }
 0x13a   : > { %v5663_v16 = vadd.f32 %v1339_v39, %v1234_v26 }
 0x13b   : > { %v1101_v29 = vadd.f32 %v1075_v51, %v895_v32  ;;  %4355 = vmatmul.msk.bf16.gmra.mxu0 %vm246_vm1, %v5659_v14  ;;  %4428 = vmatmul.msk.bf16.gmra.mxu3 %vm246_vm1, %v1750_v40  ;;  %v1753_v37 = vor.u32 %v1751_v35, %v1749_v41  ;;  %v5000_v41 = vld [vmem:[%s5317_s26 + $0x78] sm:$0xff] }
 0x13c   : > { %4363 = vmatmul.msk.bf16.gmra.mxu1 %vm246_vm1, %v5369_v45  ;;  %v1763_v9 = vshll.u32 %v5000_v41, 16 }
 0x13d   : > { %v1758_v21 = vsel %vm486_vm2, %v1753_v37, %v1757_v50 }
 0x13e   : > { %v1343_v31 = vpop.f32.mrf.mxu3  ;;  %v1765_v8 = vrot.slane %v1763_v9, 1 }
 0x13f   : > { %v1207_v43 = vpop.f32.mrf.mxu2 }
 0x140   : > { %v871_v18 = vpop.f32.mrf.mxu0 }
 0x141   : > { %v1077_v39 = vpop.f32.mrf.mxu1  ;;  %v1473_v18 = vshrl.u32 %v4991_v22, 16 }
 0x143   : > { %v1475_v35 = vor.u32 %v1473_v18, %v1471_v0  ;;  %v4993_v0 = vld [vmem:[%s5317_s26 + $0x38] sm:$0xff] }
 0x144   : > { %4371 = vmatmul.msk.bf16.gmra.mxu2 %vm246_vm1, %v5360_v38 }
 0x146   : > { %v1345_v36 = vpop.f32.mrf.mxu3 }
 0x147   : > { %v1209_v45 = vpop.f32.mrf.mxu2 }
 0x148   : > { %v1235_v44 = vadd.f32 %v1209_v45, %v1101_v29  ;;  %v873_v26 = vpop.f32.mrf.mxu0 }
 0x149   : > { %v896_v12 = vadd.f32 %v873_v26, %v5548_v6  ;;  %v1079_v40 = vpop.f32.mrf.mxu1  ;;  %v1759_v6 = vshrl.u32 %v4999_v52, 16 }
 0x14a   : > { %v5679_v32 = vadd.f32 %v1343_v31, %v1235_v44  ;;  %v5691_v44 = vsel %vm486_vm2, %v1475_v35, %v1479_v62 }
 0x14b   : > { %v1102_v38 = vadd.f32 %v1079_v40, %v896_v12  ;;  %4356 = vmatmul.msk.bf16.gmra.mxu0 %vm246_vm1, %v5675_v10  ;;  %4429 = vmatmul.msk.bf16.gmra.mxu3 %vm246_vm1, %v1758_v21  ;;  %v1761_v39 = vor.u32 %v1759_v6, %v1757_v50  ;;  %v5001_v50 = vld [vmem:[%s5317_s26 + $0x80] sm:$0xff] }
 0x14c   : > { %4364 = vmatmul.msk.bf16.gmra.mxu1 %vm246_vm1, %v5384_v54  ;;  %v1771_v18 = vshll.u32 %v5001_v50, 16 }
 0x14d   : > { %v1766_v22 = vsel %vm486_vm2, %v1761_v39, %v1765_v8 }
 0x14e   : > { %v1347_v29 = vpop.f32.mrf.mxu3 }
 0x14f   : > { %v1211_v51 = vpop.f32.mrf.mxu2 }
 0x150   : > { %v875_v43 = vpop.f32.mrf.mxu0  ;;  %v1481_v51 = vshrl.u32 %v4992_v27, 16 }
 0x151   : > { %v1081_v31 = vpop.f32.mrf.mxu1  ;;  %v1485_v43 = vshll.u32 %v4993_v0, 16 }
 0x152   : > { %v1483_v25 = vor.u32 %v1481_v51, %v1479_v62  ;;  %v1773_v31 = vrot.slane %v1771_v18, 1  ;;  %v4994_v62 = vld [vmem:[%s5317_s26 + $0x40] sm:$0xff] }
 0x153   : > { %v1487_v6 = vrot.slane %v1485_v43, 1 }
 0x154   : > { %4372 = vmatmul.msk.bf16.gmra.mxu2 %vm246_vm1, %v5375_v47 }
 0x156   : > { %v1349_v37 = vpop.f32.mrf.mxu3 }
 0x157   : > { %v1213_v54 = vpop.f32.mrf.mxu2  ;;  %v5707_v37 = vsel %vm486_vm2, %v1483_v25, %v1487_v6 }
 0x158   : > { %v1236_v45 = vadd.f32 %v1213_v54, %v1102_v38  ;;  %v877_v36 = vpop.f32.mrf.mxu0 }
 0x159   : > { %v897_v52 = vadd.f32 %v877_v36, %v5568_v46  ;;  %v1083_v26 = vpop.f32.mrf.mxu1  ;;  %v1767_v46 = vshrl.u32 %v5000_v41, 16 }
 0x15a   : > { %v5695_v21 = vadd.f32 %v1347_v29, %v1236_v45 }
 0x15b   : > { %v1103_v47 = vadd.f32 %v1083_v26, %v897_v52  ;;  %4357 = vmatmul.msk.bf16.gmra.mxu0 %vm246_vm1, %v5691_v44  ;;  %4430 = vmatmul.msk.bf16.gmra.mxu3 %vm246_vm1, %v1766_v22  ;;  %v1769_v9 = vor.u32 %v1767_v46, %v1765_v8  ;;  %v5002_v8 = vld [vmem:[%s5317_s26 + $0x88] sm:$0xff] }
 0x15c   : > { %4365 = vmatmul.msk.bf16.gmra.mxu1 %vm246_vm1, %v5399_v63 }
 0x15d   : > { %v1774_v27 = vsel %vm486_vm2, %v1769_v9, %v1773_v31 }
 0x15e   : > { %v1351_v40 = vpop.f32.mrf.mxu3 }
 0x15f   : > { %v1215_v12 = vpop.f32.mrf.mxu2 }
 0x160   : > { %v879_v38 = vpop.f32.mrf.mxu0  ;;  %v1775_v12 = vshrl.u32 %v5001_v50, 16 }
 0x161   : > { %v1085_v29 = vpop.f32.mrf.mxu1 }
 0x162   : > { %v1777_v46 = vor.u32 %v1775_v12, %v1773_v31  ;;  %v4393_v29 = vld [vmem:[%s5317_s26 + $0x90] sm:$0x1] }
 0x164   : > { %4373 = vmatmul.msk.bf16.gmra.mxu2 %vm246_vm1, %v5390_v56 }
 0x166   : > { %v1353_v35 = vpop.f32.mrf.mxu3 }
 0x167   : > { %v1217_v63 = vpop.f32.mrf.mxu2 }
 0x168   : > { %v1237_v39 = vadd.f32 %v1217_v63, %v1103_v47  ;;  %v881_v54 = vpop.f32.mrf.mxu0  ;;  %v1493_v47 = vshll.u32 %v4994_v62, 16 }
 0x169   : > { %v898_v41 = vadd.f32 %v881_v54, %v5589_v42  ;;  %v1087_v45 = vpop.f32.mrf.mxu1  ;;  %v1489_v42 = vshrl.u32 %v4993_v0, 16  ;;  %v1713_v54 = vunpack.c.l.b16 %v4393_v29 }
 0x16a   : > { %v5711_v36 = vadd.f32 %v1351_v40, %v1237_v39  ;;  %v1779_v40 = vshll.u32 %v5002_v8, 16  ;;  %v1495_v43 = vrot.slane %v1493_v47, 1 }
 0x16b   : > { %v1104_v56 = vadd.f32 %v1087_v45, %v898_v41  ;;  %4358 = vmatmul.msk.bf16.gmra.mxu0 %vm246_vm1, %v5707_v37  ;;  %4431 = vmatmul.msk.bf16.gmra.mxu3 %vm246_vm1, %v1774_v27  ;;  %v1491_v51 = vor.u32 %v1489_v42, %v1487_v6  ;;  %v1722_v45 = vpack.c.b16 %v1713_v54, %v1713_v54  ;;  %v1497_v42 = vshrl.u32 %v4994_v62, 16 }
 0x16c   : > { %4366 = vmatmul.msk.bf16.gmra.mxu1 %vm246_vm1, %v5414_v17  ;;  %v1781_v18 = vrot.slane %v1779_v40, 1  ;;  %v1391_v17 = vld [vmem:[%s5317_s26 + $0x48] sm:$0x1] }
 0x16d   : > { %v5725_v39 = vsel %vm486_vm2, %v1491_v51, %v1495_v43  ;;  %v1427_v50 = vunpack.c.l.b16 %v1391_v17  ;;  %v1787_v12 = vshll.u32 %v1722_v45, 16  ;;  %v1499_v40 = vor.u32 %v1497_v42, %v1495_v43 }
 0x16e   : > { %v1355_v52 = vpop.f32.mrf.mxu3  ;;  %6722 = vst [vmem:[#allocation22_spill] sm:$0xff] %v5725_v39  ;;  %v1782_v0 = vsel %vm486_vm2, %v1777_v46, %v1781_v18 }
 0x16f   : > { %v1219_v22 = vpop.f32.mrf.mxu2  ;;  %v1436_v41 = vpack.c.b16 %v1427_v50, %v1427_v50  ;;  %v1789_v46 = vrot.slane %v1787_v12, 1  ;;  %v5003_v50 = vld [vmem:[%s5317_s26 + $0xf0] sm:$0xff] }
 0x170   : > { %v883_v26 = vpop.f32.mrf.mxu0 }
 0x171   : > { %v1089_v38 = vpop.f32.mrf.mxu1  ;;  %v1501_v47 = vshll.u32 %v1436_v41, 16 }
 0x173   : > { %v1503_v38 = vrot.slane %v1501_v47, 1 }
 0x174   : > { %4374 = vmatmul.msk.bf16.gmra.mxu2 %vm246_vm1, %v5405_v1 }
 0x176   : > { %v1357_v9 = vpop.f32.mrf.mxu3 }
 0x177   : > { %v1221_v25 = vpop.f32.mrf.mxu2  ;;  %v5739_v9 = vsel %vm486_vm2, %v1499_v40, %v1503_v38 }
 0x178   : > { %v1238_v63 = vadd.f32 %v1221_v25, %v1104_v56  ;;  %v885_v35 = vpop.f32.mrf.mxu0  ;;  %6723 = vst [vmem:[#allocation23_spill] sm:$0xff] %v5739_v9 }
 0x179   : > { %v899_v27 = vadd.f32 %v885_v35, %v5610_v61  ;;  %v1091_v1 = vpop.f32.mrf.mxu1  ;;  %v1783_v61 = vshrl.u32 %v5002_v8, 16 }
 0x17a   : > { %v5729_v6 = vadd.f32 %v1355_v52, %v1238_v63 }
 0x17b   : > { %v1105_v31 = vadd.f32 %v1091_v1, %v899_v27  ;;  %4359 = vmatmul.msk.bf16.gmra.mxu0 %vm246_vm1, %v5725_v39  ;;  %4432 = vmatmul.msk.bf16.gmra.mxu3 %vm246_vm1, %v1782_v0  ;;  %v1785_v51 = vor.u32 %v1783_v61, %v1781_v18  ;;  %v2025_v27 = vshll.u32 %v5003_v50, 16 }
 0x17c   : > { %4367 = vmatmul.msk.bf16.gmra.mxu1 %vm246_vm1, %v5430_v28 }
 0x17d   : > { %v1790_v62 = vsel %vm486_vm2, %v1785_v51, %v1789_v46 }
 0x17e   : > { %v1359_v22 = vpop.f32.mrf.mxu3 }
 0x17f   : > { %v1223_v56 = vpop.f32.mrf.mxu2 }
 0x180   : > { %v887_v26 = vpop.f32.mrf.mxu0  ;;  %v2023_v56 = vshrl.u32 %v5003_v50, 16 }
 0x181   : > { %v1093_v52 = vpop.f32.mrf.mxu1 }
 0x184   : > { %4375 = vmatmul.msk.bf16.gmra.mxu2 %vm246_vm1, %v5420_v19 }
 0x186   : > { %v1361_v28 = vpop.f32.mrf.mxu3 }
 0x187   : > { %v1225_v17 = vpop.f32.mrf.mxu2 }
 0x188   : > { %v1239_v29 = vadd.f32 %v1225_v17, %v1105_v31  ;;  %v889_v25 = vpop.f32.mrf.mxu0 }
 0x189   : > { %v900_v8 = vadd.f32 %v889_v25, %v5627_v4  ;;  %v1095_v63 = vpop.f32.mrf.mxu1  ;;  %v5004_v4 = vld [vmem:[%s5317_s26 + $0xf8] sm:$0xff] }
 0x18a   : > { %v5743_v35 = vadd.f32 %v1359_v22, %v1239_v29  ;;  %v2027_v22 = vrot.slane %v2025_v27, 1  ;;  %v2030_v26 = vshll.u32 %v5004_v4, 16  ;;  %v2034_v28 = vshrl.u32 %v5004_v4, 16 }
 0x18b   : > { %v1106_v19 = vadd.f32 %v1095_v63, %v900_v8  ;;  %4360 = vmatmul.msk.bf16.gmra.mxu0 %vm246_vm1, %v5739_v9  ;;  %4433 = vmatmul.msk.bf16.gmra.mxu3 %vm246_vm1, %v1790_v62 }
 0x18c   : > { %4368 = vmatmul.msk.bf16.gmra.mxu1 %vm246_vm1, %v5453_v48  ;;  %v2032_v61 = vrot.slane %v2030_v26, 1 }
 0x18e   : > { %v1363_v18 = vpop.f32.mrf.mxu3  ;;  %v2036_v63 = vor.u32 %v2034_v28, %v2032_v61 }
 0x18f   : > { %v1227_v43 = vpop.f32.mrf.mxu2 }
 0x190   : > { %v891_v0 = vpop.f32.mrf.mxu0 }
 0x191   : > { %v1097_v54 = vpop.f32.mrf.mxu1 }
 0x192   : > { %v5006_v54 = vld [vmem:[%s5317_s26 + $0x108] sm:$0xff] }
 0x194   : > { %4376 = vmatmul.msk.bf16.gmra.mxu2 %vm246_vm1, %v5442_v34  ;;  %v2028_v34 = vor.u32 %v2027_v22, %v2023_v56  ;;  %v6724_v22 = vld [vmem:[#allocation6_spill] sm:$0xff] }
 0x196   : > { %v1365_v31 = vpop.f32.mrf.mxu3  ;;  %v5769_v40 = vsel %vm486_vm2, %v2028_v34, %v2032_v61 }
 0x197   : > { %v1229_v1 = vpop.f32.mrf.mxu2  ;;  %v2046_v31 = vshll.u32 %v5006_v54, 16 }
 0x198   : > { %v1240_v41 = vadd.f32 %v1229_v1, %v1106_v19  ;;  %v1541_v45 = vpop.f32.mrf.mxu0 }
 0x199   : > { %v5755_v42 = vadd.f32 %v1541_v45, %v5647_v20  ;;  %v1590_v48 = vpop.f32.mrf.mxu1 }
 0x19a   : > { %v5757_v47 = vadd.f32 %v1363_v18, %v1240_v41 }
 0x19b   : > { %4434 = vmatmul.msk.bf16.vlgmr.msrb.gmra.mxu0 %vm246_vm1, %v5458_v55  ;;  %4507 = vmatmul.msk.bf16.vlgmr.msrb.gmra.mxu3 %vm246_vm1, %v5461_v57  ;;  %v5005_v57 = vld [vmem:[%s5317_s26 + $0x100] sm:$0xff] }
 0x19c   : > { %4442 = vmatmul.msk.bf16.vlgmr.msrb.gmra.mxu1 %vm246_vm1, %v5464_v60  ;;  %2559 = vmatpush.bf16.msrb.mxu0 %v5288_v7  ;;  %v2038_v29 = vshll.u32 %v5005_v57, 16  ;;  %v2042_v1 = vshrl.u32 %v5005_v57, 16 }
 0x19d   : > { %2706 = vmatpush.bf16.msrb.mxu3 %v5321_v15  ;;  %2608 = vmatpush.bf16.msrb.mxu1 %v5272_v3 }
 0x19e   : > { %v1824_v12 = vpop.f32.mrf.mxu3  ;;  %v2040_v19 = vrot.slane %v2038_v29, 1  ;;  %v6726_v29 = vld [vmem:[#allocation7_spill] sm:$0xff] }
 0x19f   : > { %v1231_v20 = vpop.f32.mrf.mxu2 }
 0x1a0   : > { %v1543_v52 = vpop.f32.mrf.mxu0  ;;  %v2044_v26 = vor.u32 %v2042_v1, %v2040_v19 }
 0x1a1   : > { %v1592_v55 = vpop.f32.mrf.mxu1  ;;  %v5007_v52 = vld [vmem:[%s5317_s26 + $0x110] sm:$0xff] }
 0x1a4   : > { %4499 = vmatmul.msk.bf16.vlgmr.msrb.gmra.mxu2 %vm246_vm1, %v5769_v40 }
 0x1a5   : > { %2657 = vmatpush.bf16.msrb.mxu2 %v5301_v11 }
 0x1a6   : > { %v1826_v51 = vpop.f32.mrf.mxu3 }
 0x1a7   : > { %v1631_v38 = vpop.f32.mrf.mxu2  ;;  %v2054_v51 = vshll.u32 %v5007_v52, 16 }
 0x1a8   : > { %v1632_v46 = vadd.f32 %v1631_v38, %v1590_v48  ;;  %v1545_v17 = vpop.f32.mrf.mxu0  ;;  %v2048_v48 = vrot.slane %v2046_v31, 1  ;;  %v2050_v38 = vshrl.u32 %v5006_v54, 16  ;;  %v2058_v31 = vshrl.u32 %v5007_v52, 16 }
 0x1a9   : > { %v5776_v25 = vadd.f32 %v1545_v17, %v5663_v16  ;;  %v1594_v62 = vpop.f32.mrf.mxu1  ;;  %v5787_v16 = vsel %vm486_vm2, %v2036_v63, %v2040_v19  ;;  %v6728_v63 = vld [vmem:[#allocation9_spill] sm:$0xff] }
 0x1aa   : > { %v5778_v8 = vadd.f32 %v1824_v12, %v1632_v46  ;;  %v2052_v19 = vor.u32 %v2050_v38, %v2048_v48 }
 0x1ab   : > { %4435 = vmatmul.msk.bf16.gmra.mxu0 %vm246_vm1, %v5480_v23  ;;  %4508 = vmatmul.msk.bf16.gmra.mxu3 %vm246_vm1, %v5483_v24 }
 0x1ac   : > { %4443 = vmatmul.msk.bf16.gmra.mxu1 %vm246_vm1, %v5486_v30 }
 0x1ae   : > { %v1828_v18 = vpop.f32.mrf.mxu3 }
 0x1af   : > { %v1633_v43 = vpop.f32.mrf.mxu2 }
 0x1b0   : > { %v1547_v0 = vpop.f32.mrf.mxu0  ;;  %v2056_v43 = vrot.slane %v2054_v51, 1  ;;  %v5009_v51 = vld [vmem:[%s5317_s26 + $0x120] sm:$0xff] }
 0x1b1   : > { %v1596_v50 = vpop.f32.mrf.mxu1 }
 0x1b4   : > { %4500 = vmatmul.msk.bf16.gmra.mxu2 %vm246_vm1, %v5787_v16 }
 0x1b6   : > { %v1830_v4 = vpop.f32.mrf.mxu3 }
 0x1b7   : > { %v1635_v23 = vpop.f32.mrf.mxu2 }
 0x1b8   : > { %v1636_v27 = vadd.f32 %v1635_v23, %v1594_v62  ;;  %v1549_v24 = vpop.f32.mrf.mxu0  ;;  %v6727_v62 = vld [vmem:[#allocation8_spill] sm:$0xff] }
 0x1b9   : > { %v5793_v41 = vadd.f32 %v1549_v24, %v5679_v32  ;;  %v1598_v45 = vpop.f32.mrf.mxu1  ;;  %v5804_v32 = vsel %vm486_vm2, %v2044_v26, %v2048_v48  ;;  %v5008_v23 = vld [vmem:[%s5317_s26 + $0x118] sm:$0xff] }
 0x1ba   : > { %v5795_v56 = vadd.f32 %v1828_v18, %v1636_v27  ;;  %6725 = vst [vmem:[#allocation6_spill] sm:$0xff] %v5804_v32 }
 0x1bb   : > { %4436 = vmatmul.msk.bf16.gmra.mxu0 %vm246_vm1, %v5500_v53  ;;  %4509 = vmatmul.msk.bf16.gmra.mxu3 %vm246_vm1, %v5503_v58 }
 0x1bc   : > { %4444 = vmatmul.msk.bf16.gmra.mxu1 %vm246_vm1, %v6724_v22 }
 0x1be   : > { %v1832_v61 = vpop.f32.mrf.mxu3 }
 0x1bf   : > { %v1637_v34 = vpop.f32.mrf.mxu2 }
 0x1c0   : > { %v1551_v20 = vpop.f32.mrf.mxu0 }
 0x1c1   : > { %v1600_v12 = vpop.f32.mrf.mxu1  ;;  %v6731_v20 = vld [vmem:[#allocation11_spill] sm:$0xff] }
 0x1c2   : > { %v6732_v12 = vld [vmem:[#allocation12_spill] sm:$0xff] }
 0x1c4   : > { %4501 = vmatmul.msk.bf16.gmra.mxu2 %vm246_vm1, %v5804_v32 }
 0x1c6   : > { %v1834_v55 = vpop.f32.mrf.mxu3 }
 0x1c7   : > { %v1639_v53 = vpop.f32.mrf.mxu2 }
 0x1c8   : > { %v1640_v57 = vadd.f32 %v1639_v53, %v1598_v45  ;;  %v1553_v58 = vpop.f32.mrf.mxu0  ;;  %v2062_v45 = vshll.u32 %v5008_v23, 16  ;;  %v2060_v53 = vor.u32 %v2058_v31, %v2056_v43 }
 0x1c9   : > { %v5810_v46 = vadd.f32 %v1553_v58, %v5695_v21  ;;  %v1602_v17 = vpop.f32.mrf.mxu1  ;;  %v5821_v21 = vsel %vm486_vm2, %v2052_v19, %v2056_v43 }
 0x1ca   : > { %v5812_v28 = vadd.f32 %v1832_v61, %v1640_v57  ;;  %6729 = vst [vmem:[#allocation7_spill] sm:$0xff] %v5821_v21  ;;  %v6730_v61 = vld [vmem:[#allocation10_spill] sm:$0xff]  ;;  %v2064_v55 = vrot.slane %v2062_v45, 1 }
 0x1cb   : > { %4437 = vmatmul.msk.bf16.gmra.mxu0 %vm246_vm1, %v6726_v29  ;;  %4510 = vmatmul.msk.bf16.gmra.mxu3 %vm246_vm1, %v6727_v62 }
 0x1cc   : > { %4445 = vmatmul.msk.bf16.gmra.mxu1 %vm246_vm1, %v6728_v63 }
 0x1ce   : > { %v1836_v0 = vpop.f32.mrf.mxu3 }
 0x1cf   : > { %v1641_v18 = vpop.f32.mrf.mxu2 }
 0x1d0   : > { %v1555_v50 = vpop.f32.mrf.mxu0  ;;  %v2066_v18 = vshrl.u32 %v5008_v23, 16 }
 0x1d1   : > { %v1604_v54 = vpop.f32.mrf.mxu1 }
 0x1d4   : > { %4502 = vmatmul.msk.bf16.gmra.mxu2 %vm246_vm1, %v5821_v21  ;;  %v5103_v21 = vld [vmem:[%s5317_s26 + $0xc0] sm:$0xff] }
 0x1d6   : > { %v1838_v27 = vpop.f32.mrf.mxu3 }
 0x1d7   : > { %v1643_v4 = vpop.f32.mrf.mxu2  ;;  %v6736_v27 = vld [vmem:[#allocation14_spill] sm:$0xff] }
 0x1d8   : > { %v1644_v24 = vadd.f32 %v1643_v4, %v1602_v17  ;;  %v1557_v1 = vpop.f32.mrf.mxu0  ;;  %v6735_v4 = vld [vmem:[#allocation13_spill] sm:$0xff] }
 0x1d9   : > { %v5827_v26 = vadd.f32 %v1557_v1, %v5711_v36  ;;  %v1606_v48 = vpop.f32.mrf.mxu1  ;;  %v5838_v36 = vsel %vm486_vm2, %v2060_v53, %v2064_v55  ;;  %v2068_v1 = vor.u32 %v2066_v18, %v2064_v55  ;;  %v6741_v18 = vld [vmem:[#allocation17_spill] sm:$0xff] }
 0x1da   : > { %v5829_v34 = vadd.f32 %v1836_v0, %v1644_v24  ;;  %6733 = vst [vmem:[#allocation8_spill] sm:$0xff] %v5838_v36  ;;  %v2070_v0 = vshll.u32 %v5009_v51, 16  ;;  %v6737_v24 = vld [vmem:[#allocation15_spill] sm:$0xff] }
 0x1db   : > { %4438 = vmatmul.msk.bf16.gmra.mxu0 %vm246_vm1, %v6730_v61  ;;  %4511 = vmatmul.msk.bf16.gmra.mxu3 %vm246_vm1, %v6731_v20  ;;  %v5010_v20 = vld [vmem:[%s5317_s26 + $0x128] sm:$0xff] }
 0x1dc   : > { %4446 = vmatmul.msk.bf16.gmra.mxu1 %vm246_vm1, %v6732_v12  ;;  %v2072_v31 = vrot.slane %v2070_v0, 1  ;;  %v6742_v0 = vld [vmem:[#allocation18_spill] sm:$0xff] }
 0x1de   : > { %v1840_v57 = vpop.f32.mrf.mxu3 }
 0x1df   : > { %v1645_v52 = vpop.f32.mrf.mxu2 }
 0x1e0   : > { %v1559_v58 = vpop.f32.mrf.mxu0 }
 0x1e1   : > { %v1608_v38 = vpop.f32.mrf.mxu1 }
 0x1e2   : > { %v2074_v38 = vshrl.u32 %v5009_v51, 16 }
 0x1e4   : > { %4503 = vmatmul.msk.bf16.gmra.mxu2 %vm246_vm1, %v5838_v36  ;;  %v5101_v36 = vld [vmem:[%s5317_s26 + $0xb8] sm:$0xff] }
 0x1e6   : > { %v1842_v29 = vpop.f32.mrf.mxu3 }
 0x1e7   : > { %v1647_v17 = vpop.f32.mrf.mxu2 }
 0x1e8   : > { %v1648_v62 = vadd.f32 %v1647_v17, %v1606_v48  ;;  %v1561_v19 = vpop.f32.mrf.mxu0  ;;  %v2078_v17 = vshll.u32 %v5010_v20, 16 }
 0x1e9   : > { %v5844_v43 = vadd.f32 %v1561_v19, %v5729_v6  ;;  %v1610_v50 = vpop.f32.mrf.mxu1  ;;  %v5855_v6 = vsel %vm486_vm2, %v2068_v1, %v2072_v31  ;;  %v6740_v19 = vld [vmem:[#allocation16_spill] sm:$0xff] }
 0x1ea   : > { %v5846_v54 = vadd.f32 %v1840_v57, %v1648_v62  ;;  %6738 = vst [vmem:[#allocation10_spill] sm:$0xff] %v5855_v6 }
 0x1eb   : > { %6734 = vst [vmem:[#allocation9_spill] sm:$0xff] %v5844_v43  ;;  %4439 = vmatmul.msk.bf16.gmra.mxu0 %vm246_vm1, %v6735_v4  ;;  %4512 = vmatmul.msk.bf16.gmra.mxu3 %vm246_vm1, %v6736_v27  ;;  %v2076_v4 = vor.u32 %v2074_v38, %v2072_v31  ;;  %v4466_v27 = vld [vmem:[%s5317_s26 + $0x130] sm:$0x1]  ;;  %v6196_v43 = vld [vmem:[%s5317_s26 + $0xf8] sm:$0xff] }
 0x1ec   : > { %4447 = vmatmul.msk.bf16.gmra.mxu1 %vm246_vm1, %v6737_v24 }
 0x1ee   : > { %v1844_v45 = vpop.f32.mrf.mxu3 }
 0x1ef   : > { %v1649_v23 = vpop.f32.mrf.mxu2 }
 0x1f0   : > { %v1563_v48 = vpop.f32.mrf.mxu0 }
 0x1f1   : > { %v1612_v61 = vpop.f32.mrf.mxu1 }
 0x1f4   : > { %4504 = vmatmul.msk.bf16.gmra.mxu2 %vm246_vm1, %v5855_v6 }
 0x1f6   : > { %v1846_v52 = vpop.f32.mrf.mxu3 }
 0x1f7   : > { %v1651_v53 = vpop.f32.mrf.mxu2 }
 0x1f8   : > { %v1652_v57 = vadd.f32 %v1651_v53, %v1610_v50  ;;  %v1565_v58 = vpop.f32.mrf.mxu0  ;;  %v2080_v50 = vrot.slane %v2078_v17, 1 }
 0x1f9   : > { %v5861_v55 = vadd.f32 %v1565_v58, %v5743_v35  ;;  %v1614_v29 = vpop.f32.mrf.mxu1  ;;  %v2082_v58 = vshrl.u32 %v5010_v20, 16  ;;  %v5012_v20 = vld [vmem:[%s5317_s26 + $0x60] sm:$0xff] }
 0x1fa   : > { %v5863_v62 = vadd.f32 %v1844_v45, %v1652_v57  ;;  %v5873_v23 = vsel %vm486_vm2, %v2076_v4, %v2080_v50  ;;  %v2012_v45 = vunpack.c.l.b16 %v4466_v27  ;;  %v6745_v27 = vld [vmem:[#allocation19_spill] sm:$0xff] }
 0x1fb   : > { %6739 = vst [vmem:[#allocation11_spill] sm:$0xff] %v5861_v55  ;;  %4440 = vmatmul.msk.bf16.gmra.mxu0 %vm246_vm1, %v6740_v19  ;;  %4513 = vmatmul.msk.bf16.gmra.mxu3 %vm246_vm1, %v6741_v18  ;;  %v5011_v18 = vld [vmem:[%s5317_s26 + $0x58] sm:$0xff] }
 0x1fc   : > { %4448 = vmatmul.msk.bf16.gmra.mxu1 %vm246_vm1, %v6742_v0  ;;  %6743 = vst [vmem:[#allocation12_spill] sm:$0xff] %v5873_v23  ;;  %v2021_v61 = vpack.c.b16 %v2012_v45, %v2012_v45 }
 0x1fe   : > { %v1848_v1 = vpop.f32.mrf.mxu3  ;;  %v2086_v38 = vshll.u32 %v2021_v61, 16 }
 0x1ff   : > { %v1653_v51 = vpop.f32.mrf.mxu2 }
 0x200   : > { %v1567_v35 = vpop.f32.mrf.mxu0  ;;  %v6746_v51 = vld [vmem:[#allocation20_spill] sm:$0xff]  ;;  %v2088_v45 = vrot.slane %v2086_v38, 1 }
 0x201   : > { %v1616_v48 = vpop.f32.mrf.mxu1  ;;  %v6747_v35 = vld [vmem:[#allocation21_spill] sm:$0xff] }
 0x202   : > { %v2324_v48 = vshll.u32 %v5011_v18, 16 }
 0x204   : > { %4505 = vmatmul.msk.bf16.gmra.mxu2 %vm246_vm1, %v5873_v23 }
 0x206   : > { %v1850_v52 = vpop.f32.mrf.mxu3 }
 0x207   : > { %v1655_v53 = vpop.f32.mrf.mxu2 }
 0x208   : > { %v1656_v57 = vadd.f32 %v1655_v53, %v1614_v29  ;;  %v1569_v31 = vpop.f32.mrf.mxu0  ;;  %v2084_v29 = vor.u32 %v2082_v58, %v2080_v50 }
 0x209   : > { %v5878_v17 = vadd.f32 %v1569_v31, %v5757_v47  ;;  %v1618_v19 = vpop.f32.mrf.mxu1  ;;  %v2326_v31 = vrot.slane %v2324_v48, 1  ;;  %v5095_v48 = vld [vmem:[%s5317_s26 + $0xa0] sm:$0xff] }
 0x20a   : > { %v5881_v4 = vadd.f32 %v1848_v1, %v1656_v57  ;;  %v5891_v52 = vsel %vm486_vm2, %v2084_v29, %v2088_v45  ;;  %v2322_v57 = vshrl.u32 %v5011_v18, 16 }
 0x20b   : > { %6744 = vst [vmem:[#allocation13_spill] sm:$0xff] %v5878_v17  ;;  %4441 = vmatmul.msk.bf16.gmra.mxu0 %vm246_vm1, %v6745_v27  ;;  %4514 = vmatmul.msk.bf16.gmra.mxu3 %vm246_vm1, %v6746_v51  ;;  %v2329_v27 = vshll.u32 %v5012_v20, 16 }
 0x20c   : > { %4449 = vmatmul.msk.bf16.gmra.mxu1 %vm246_vm1, %v6747_v35  ;;  %6748 = vst [vmem:[#allocation14_spill] sm:$0xff] %v5891_v52  ;;  %v2327_v51 = vor.u32 %v2326_v31, %v2322_v57  ;;  %v2333_v57 = vshrl.u32 %v5012_v20, 16 }
 0x20d   : > { %v2331_v50 = vrot.slane %v2329_v27, 1  ;;  %v5912_v27 = vld [vmem:[%s5317_s26 + $0xf0] sm:$0xff] }
 0x20e   : > { %v1852_v47 = vpop.f32.mrf.mxu3 }
 0x20f   : > { %v1657_v61 = vpop.f32.mrf.mxu2  ;;  %v5897_v29 = vsel %vm486_vm2, %v2327_v51, %v2331_v50  ;;  %v2335_v51 = vor.u32 %v2333_v57, %v2331_v50  ;;  %v5014_v50 = vld [vmem:[%s5317_s26 + $0x70] sm:$0xff] }
 0x210   : > { %v1571_v53 = vpop.f32.mrf.mxu0  ;;  %6749 = vst [vmem:[#allocation15_spill] sm:$0xff] %v5897_v29 }
 0x211   : > { %v1620_v1 = vpop.f32.mrf.mxu1 }
 0x214   : > { %4506 = vmatmul.msk.bf16.gmra.mxu2 %vm246_vm1, %v5891_v52  ;;  %v5099_v52 = vld [vmem:[%s5317_s26 + $0xb0] sm:$0xff] }
 0x216   : > { %v1854_v38 = vpop.f32.mrf.mxu3 }
 0x217   : > { %v1659_v58 = vpop.f32.mrf.mxu2 }
 0x218   : > { %v1660_v23 = vadd.f32 %v1659_v58, %v1618_v19  ;;  %v1873_v61 = vpop.f32.mrf.mxu0  ;;  %v6750_v19 = vld [vmem:[#allocation5_spill] sm:$0xff] }
 0x219   : > { %v1905_v53 = vadd.f32 %v1873_v61, %v5778_v8  ;;  %v1922_v6 = vpop.f32.mrf.mxu1  ;;  %v5013_v8 = vld [vmem:[%s5317_s26 + $0x68] sm:$0xff] }
 0x21a   : > { %v5899_v18 = vadd.f32 %v1852_v47, %v1660_v23  ;;  %v2337_v31 = vshll.u32 %v5013_v8, 16 }
 0x21b   : > { %v1954_v45 = vadd.f32 %v1922_v6, %v1905_v53  ;;  %4515 = vmatmul.msk.bf16.vlgmr.msra.gmra.mxu0 %vm246_vm1, %v5623_v49  ;;  %4588 = vmatmul.msk.bf16.vlgmr.msra.gmra.mxu3 %vm246_vm1, %v5095_v48 }
 0x21c   : > { %4572 = vmatmul.msk.bf16.vlgmr.msra.gmra.mxu1 %vm246_vm1, %v5897_v29  ;;  %2835 = vmatpush.bf16.msra.mxu0 %v6750_v19  ;;  %v2339_v58 = vrot.slane %v2337_v31, 1  ;;  %v5097_v29 = vld [vmem:[%s5317_s26 + $0xa8] sm:$0xff] }
 0x21d   : > { %3222 = vmatpush.bf16.msra.mxu3 %v5269_v2  ;;  %2964 = vmatpush.bf16.msra.mxu1 %v5309_v13 }
 0x21e   : > { %v2172_v47 = vpop.f32.mrf.mxu3 }
 0x21f   : > { %v1661_v23 = vpop.f32.mrf.mxu2 }
 0x220   : > { %v1875_v1 = vpop.f32.mrf.mxu0  ;;  %v5919_v23 = vsel %vm486_vm2, %v2335_v51, %v2339_v58  ;;  %v2345_v51 = vshll.u32 %v5014_v50, 16 }
 0x221   : > { %v1924_v6 = vpop.f32.mrf.mxu1  ;;  %6751 = vst [vmem:[#allocation16_spill] sm:$0xff] %v5919_v23 }
 0x224   : > { %4580 = vmatmul.msk.bf16.vlgmr.msra.gmra.mxu2 %vm246_vm1, %v5912_v27 }
 0x225   : > { %3165 = vmatpush.bf16.msra.mxu2 %v5438_v33 }
 0x226   : > { %v2174_v38 = vpop.f32.mrf.mxu3 }
 0x227   : > { %v2123_v2 = vpop.f32.mrf.mxu2 }
 0x228   : > { %v2155_v61 = vadd.f32 %v2123_v2, %v1954_v45  ;;  %v1877_v53 = vpop.f32.mrf.mxu0  ;;  %v2341_v2 = vshrl.u32 %v5013_v8, 16 }
 0x229   : > { %v1906_v48 = vadd.f32 %v1877_v53, %v5795_v56  ;;  %v1926_v20 = vpop.f32.mrf.mxu1 }
 0x22a   : > { %v5921_v1 = vadd.f32 %v2172_v47, %v2155_v61  ;;  %v5931_v47 = vld [vmem:[%s5317_s26 + $0xf8] sm:$0xff]  ;;  %v2343_v38 = vor.u32 %v2341_v2, %v2339_v58  ;;  %v2347_v61 = vrot.slane %v2345_v51, 1 }
 0x22b   : > { %v1955_v6 = vadd.f32 %v1926_v20, %v1906_v48  ;;  %4516 = vmatmul.msk.bf16.gmra.mxu0 %vm246_vm1, %v5643_v59  ;;  %4589 = vmatmul.msk.bf16.gmra.mxu3 %vm246_vm1, %v5097_v29  ;;  %v5015_v58 = vld [vmem:[%s5317_s26 + $0x78] sm:$0xff] }
 0x22c   : > { %4573 = vmatmul.msk.bf16.gmra.mxu1 %vm246_vm1, %v5919_v23  ;;  %v5937_v8 = vsel %vm486_vm2, %v2343_v38, %v2347_v61  ;;  %v2353_v38 = vshll.u32 %v5015_v58, 16 }
 0x22d   : > { %6752 = vst [vmem:[#allocation17_spill] sm:$0xff] %v5937_v8 }
 0x22e   : > { %v2176_v56 = vpop.f32.mrf.mxu3 }
 0x22f   : > { %v2125_v45 = vpop.f32.mrf.mxu2 }
 0x230   : > { %v1879_v57 = vpop.f32.mrf.mxu0 }
 0x231   : > { %v1928_v31 = vpop.f32.mrf.mxu1 }
 0x234   : > { %4581 = vmatmul.msk.bf16.gmra.mxu2 %vm246_vm1, %v5931_v47 }
 0x236   : > { %v2178_v53 = vpop.f32.mrf.mxu3 }
 0x237   : > { %v2127_v29 = vpop.f32.mrf.mxu2 }
 0x238   : > { %v2156_v48 = vadd.f32 %v2127_v29, %v1955_v6  ;;  %v1881_v20 = vpop.f32.mrf.mxu0  ;;  %v2349_v29 = vshrl.u32 %v5014_v50, 16 }
 0x239   : > { %v1907_v45 = vadd.f32 %v1881_v20, %v5812_v28  ;;  %v1930_v57 = vpop.f32.mrf.mxu1 }
 0x23a   : > { %v5939_v31 = vadd.f32 %v2176_v56, %v2156_v48  ;;  %v5949_v56 = vld [vmem:[%s5317_s26 + $0x100] sm:$0xff]  ;;  %v2351_v53 = vor.u32 %v2349_v29, %v2347_v61  ;;  %v2355_v48 = vrot.slane %v2353_v38, 1 }
 0x23b   : > { %v1956_v23 = vadd.f32 %v1930_v57, %v1907_v45  ;;  %4517 = vmatmul.msk.bf16.gmra.mxu0 %vm246_vm1, %v5659_v14  ;;  %4590 = vmatmul.msk.bf16.gmra.mxu3 %vm246_vm1, %v5099_v52 }
 0x23c   : > { %4574 = vmatmul.msk.bf16.gmra.mxu1 %vm246_vm1, %v5937_v8  ;;  %v5955_v50 = vsel %vm486_vm2, %v2351_v53, %v2355_v48 }
 0x23d   : > { %6753 = vst [vmem:[#allocation18_spill] sm:$0xff] %v5955_v50 }
 0x23e   : > { %v2180_v28 = vpop.f32.mrf.mxu3 }
 0x23f   : > { %v2129_v6 = vpop.f32.mrf.mxu2 }
 0x240   : > { %v1883_v2 = vpop.f32.mrf.mxu0 }
 0x241   : > { %v1932_v51 = vpop.f32.mrf.mxu1 }
 0x244   : > { %4582 = vmatmul.msk.bf16.gmra.mxu2 %vm246_vm1, %v5949_v56 }
 0x246   : > { %v2182_v20 = vpop.f32.mrf.mxu3 }
 0x247   : > { %v2131_v52 = vpop.f32.mrf.mxu2 }
 0x248   : > { %v2157_v45 = vadd.f32 %v2131_v52, %v1956_v23  ;;  %v1885_v57 = vpop.f32.mrf.mxu0  ;;  %v5016_v23 = vld [vmem:[%s5317_s26 + $0x80] sm:$0xff]  ;;  %v2357_v52 = vshrl.u32 %v5015_v58, 16 }
 0x249   : > { %v1908_v6 = vadd.f32 %v1885_v57, %v5829_v34  ;;  %v1934_v2 = vpop.f32.mrf.mxu1  ;;  %v2361_v53 = vshll.u32 %v5016_v23, 16 }
 0x24a   : > { %v5957_v51 = vadd.f32 %v2180_v28, %v2157_v45  ;;  %v5967_v28 = vld [vmem:[%s5317_s26 + $0x108] sm:$0xff]  ;;  %v2359_v20 = vor.u32 %v2357_v52, %v2355_v48 }
 0x24b   : > { %v1957_v8 = vadd.f32 %v1934_v2, %v1908_v6  ;;  %4518 = vmatmul.msk.bf16.gmra.mxu0 %vm246_vm1, %v5675_v10  ;;  %4591 = vmatmul.msk.bf16.gmra.mxu3 %vm246_vm1, %v5101_v36  ;;  %6754 = vst [vmem:[#allocation19_spill] sm:$0xff] %v5967_v28  ;;  %v2363_v45 = vrot.slane %v2361_v53, 1 }
 0x24c   : > { %4575 = vmatmul.msk.bf16.gmra.mxu1 %vm246_vm1, %v5955_v50 }
 0x24d   : > { %v5973_v58 = vsel %vm486_vm2, %v2359_v20, %v2363_v45 }
 0x24e   : > { %v2184_v34 = vpop.f32.mrf.mxu3  ;;  %6755 = vst [vmem:[#allocation20_spill] sm:$0xff] %v5973_v58 }
 0x24f   : > { %v2133_v61 = vpop.f32.mrf.mxu2 }
 0x250   : > { %v1887_v29 = vpop.f32.mrf.mxu0 }
 0x251   : > { %v1936_v38 = vpop.f32.mrf.mxu1 }
 0x254   : > { %4583 = vmatmul.msk.bf16.gmra.mxu2 %vm246_vm1, %v5967_v28 }
 0x256   : > { %v2186_v57 = vpop.f32.mrf.mxu3 }
 0x257   : > { %v2135_v36 = vpop.f32.mrf.mxu2 }
 0x258   : > { %v2158_v6 = vadd.f32 %v2135_v36, %v1957_v8  ;;  %v1889_v2 = vpop.f32.mrf.mxu0  ;;  %v5017_v8 = vld [vmem:[%s5317_s26 + $0x88] sm:$0xff]  ;;  %v2365_v36 = vshrl.u32 %v5016_v23, 16 }
 0x259   : > { %v1909_v61 = vadd.f32 %v1889_v2, %v5846_v54  ;;  %v1938_v29 = vpop.f32.mrf.mxu1  ;;  %v2369_v20 = vshll.u32 %v5017_v8, 16 }
 0x25a   : > { %v5975_v38 = vadd.f32 %v2184_v34, %v2158_v6  ;;  %v5985_v34 = vld [vmem:[%s5317_s26 + $0x110] sm:$0xff]  ;;  %v2367_v57 = vor.u32 %v2365_v36, %v2363_v45 }
 0x25b   : > { %v1958_v50 = vadd.f32 %v1938_v29, %v1909_v61  ;;  %4519 = vmatmul.msk.bf16.gmra.mxu0 %vm246_vm1, %v5691_v44  ;;  %4592 = vmatmul.msk.bf16.gmra.mxu3 %vm246_vm1, %v5103_v21  ;;  %6756 = vst [vmem:[#allocation21_spill] sm:$0xff] %v5985_v34  ;;  %v2371_v6 = vrot.slane %v2369_v20, 1 }
 0x25c   : > { %4576 = vmatmul.msk.bf16.gmra.mxu1 %vm246_vm1, %v5973_v58 }
 0x25d   : > { %v5991_v23 = vsel %vm486_vm2, %v2367_v57, %v2371_v6  ;;  %v2373_v57 = vshrl.u32 %v5017_v8, 16 }
 0x25e   : > { %v2188_v54 = vpop.f32.mrf.mxu3  ;;  %6757 = vst [vmem:[#allocation5_spill] sm:$0xff] %v5991_v23 }
 0x25f   : > { %v2137_v48 = vpop.f32.mrf.mxu2 }
 0x260   : > { %v1891_v52 = vpop.f32.mrf.mxu0 }
 0x261   : > { %v1940_v53 = vpop.f32.mrf.mxu1 }
 0x264   : > { %4584 = vmatmul.msk.bf16.gmra.mxu2 %vm246_vm1, %v5985_v34  ;;  %v5105_v34 = vld [vmem:[%s5317_s26 + $0xc8] sm:$0xff] }
 0x266   : > { %v2190_v2 = vpop.f32.mrf.mxu3 }
 0x267   : > { %v2139_v21 = vpop.f32.mrf.mxu2  ;;  %v2375_v2 = vor.u32 %v2373_v57, %v2371_v6  ;;  %v5107_v6 = vld [vmem:[%s5317_s26 + $0xd0] sm:$0xff] }
 0x268   : > { %v2159_v61 = vadd.f32 %v2139_v21, %v1958_v50  ;;  %v1893_v29 = vpop.f32.mrf.mxu0  ;;  %v5018_v50 = vld [vmem:[%s5317_s26 + $0x90] sm:$0xff] }
 0x269   : > { %v1910_v48 = vadd.f32 %v1893_v29, %v5863_v62  ;;  %v1942_v52 = vpop.f32.mrf.mxu1  ;;  %v2377_v21 = vshll.u32 %v5018_v50, 16 }
 0x26a   : > { %v5993_v53 = vadd.f32 %v2188_v54, %v2159_v61  ;;  %v6003_v54 = vld [vmem:[%s5317_s26 + $0x118] sm:$0xff] }
 0x26b   : > { %v1959_v58 = vadd.f32 %v1942_v52, %v1910_v48  ;;  %4520 = vmatmul.msk.bf16.gmra.mxu0 %vm246_vm1, %v5707_v37  ;;  %4593 = vmatmul.msk.bf16.gmra.mxu3 %vm246_vm1, %v5105_v34  ;;  %v2379_v61 = vrot.slane %v2377_v21, 1  ;;  %v4539_v48 = vld [vmem:[%s5317_s26 + $0x98] sm:$0x1] }
 0x26c   : > { %4577 = vmatmul.msk.bf16.gmra.mxu1 %vm246_vm1, %v5991_v23 }
 0x26d   : > { %v6010_v8 = vsel %vm486_vm2, %v2375_v2, %v2379_v61  ;;  %v2381_v2 = vshrl.u32 %v5018_v50, 16 }
 0x26e   : > { %v2192_v45 = vpop.f32.mrf.mxu3  ;;  %6758 = vst [vmem:[#allocation24_spill] sm:$0xff] %v6010_v8 }
 0x26f   : > { %v2141_v62 = vpop.f32.mrf.mxu2 }
 0x270   : > { %v1895_v36 = vpop.f32.mrf.mxu0 }
 0x271   : > { %v1944_v20 = vpop.f32.mrf.mxu1  ;;  %v2311_v36 = vunpack.c.l.b16 %v4539_v48 }
 0x274   : > { %4585 = vmatmul.msk.bf16.gmra.mxu2 %vm246_vm1, %v6003_v54 }
 0x276   : > { %v2194_v34 = vpop.f32.mrf.mxu3 }
 0x277   : > { %v2143_v29 = vpop.f32.mrf.mxu2 }
 0x278   : > { %v2160_v52 = vadd.f32 %v2143_v29, %v1959_v58  ;;  %v1897_v23 = vpop.f32.mrf.mxu0  ;;  %v2320_v58 = vpack.c.b16 %v2311_v36, %v2311_v36 }
 0x279   : > { %v1911_v62 = vadd.f32 %v1897_v23, %v5881_v4  ;;  %v1946_v28 = vpop.f32.mrf.mxu1 }
 0x27a   : > { %v6012_v20 = vadd.f32 %v2192_v45, %v2160_v52  ;;  %v2385_v29 = vshll.u32 %v2320_v58, 16  ;;  %v6021_v45 = vld [vmem:[%s5317_s26 + $0x120] sm:$0xff] }
 0x27b   : > { %v1960_v32 = vadd.f32 %v1946_v28, %v1911_v62  ;;  %4521 = vmatmul.msk.bf16.gmra.mxu0 %vm246_vm1, %v5725_v39  ;;  %4594 = vmatmul.msk.bf16.gmra.mxu3 %vm246_vm1, %v5107_v6  ;;  %6759 = vst [vmem:[#allocation25_spill] sm:$0xff] %v6021_v45  ;;  %v2383_v28 = vor.u32 %v2381_v2, %v2379_v61 }
 0x27c   : > { %4578 = vmatmul.msk.bf16.gmra.mxu1 %vm246_vm1, %v6010_v8  ;;  %v2387_v34 = vrot.slane %v2385_v29, 1  ;;  %v6038_v29 = vld [vmem:[%s5317_s26 + $0x128] sm:$0xff] }
 0x27d   : > { %6761 = vst [vmem:[#allocation27_spill] sm:$0xff] %v6038_v29 }
 0x27e   : > { %v2196_v23 = vpop.f32.mrf.mxu3 }
 0x27f   : > { %v2145_v4 = vpop.f32.mrf.mxu2 }
 0x280   : > { %v1899_v57 = vpop.f32.mrf.mxu0 }
 0x281   : > { %v1948_v21 = vpop.f32.mrf.mxu1  ;;  %v6027_v57 = vsel %vm486_vm2, %v2383_v28, %v2387_v34 }
 0x282   : > { %6760 = vst [vmem:[#allocation26_spill] sm:$0xff] %v6027_v57  ;;  %v5109_v21 = vld [vmem:[%s5317_s26 + $0xd8] sm:$0xff] }
 0x284   : > { %4586 = vmatmul.msk.bf16.gmra.mxu2 %vm246_vm1, %v6021_v45 }
 0x286   : > { %v2198_v52 = vpop.f32.mrf.mxu3 }
 0x287   : > { %v2147_v48 = vpop.f32.mrf.mxu2 }
 0x288   : > { %v2161_v62 = vadd.f32 %v2147_v48, %v1960_v32  ;;  %v1901_v6 = vpop.f32.mrf.mxu0 }
 0x289   : > { %v1912_v36 = vadd.f32 %v1901_v6, %v5899_v18  ;;  %v1950_v4 = vpop.f32.mrf.mxu1 }
 0x28a   : > { %v6029_v50 = vadd.f32 %v2196_v23, %v2161_v62 }
 0x28b   : > { %v1961_v58 = vadd.f32 %v1950_v4, %v1912_v36  ;;  %4522 = vmatmul.msk.bf16.gmra.mxu0 %vm246_vm1, %v5739_v9  ;;  %4595 = vmatmul.msk.bf16.gmra.mxu3 %vm246_vm1, %v5109_v21  ;;  %v5111_v4 = vld [vmem:[%s5317_s26 + $0x8] sm:$0xff] }
 0x28c   : > { %4579 = vmatmul.msk.bf16.gmra.mxu1 %vm246_vm1, %v6027_v57 }
 0x28e   : > { %v2200_v61 = vpop.f32.mrf.mxu3 }
 0x28f   : > { %v2149_v32 = vpop.f32.mrf.mxu2 }
 0x290   : > { %v1903_v18 = vpop.f32.mrf.mxu0 }
 0x291   : > { %v1952_v2 = vpop.f32.mrf.mxu1  ;;  %v6059_v18 = vld [vmem:[%s5317_s26 + $0x58] sm:$0xff] }
 0x294   : > { %4587 = vmatmul.msk.bf16.gmra.mxu2 %vm246_vm1, %v6038_v29 }
 0x296   : > { %v2202_v28 = vpop.f32.mrf.mxu3 }
 0x297   : > { %v2151_v23 = vpop.f32.mrf.mxu2 }
 0x298   : > { %v2162_v34 = vadd.f32 %v2151_v23, %v1961_v58  ;;  %v2221_v48 = vpop.f32.mrf.mxu0 }
 0x299   : > { %v2253_v52 = vadd.f32 %v2221_v48, %v5921_v1  ;;  %v2422_v62 = vpop.f32.mrf.mxu1  ;;  %v5113_v48 = vld [vmem:[%s5317_s26 + $0x10] sm:$0xff] }
 0x29a   : > { %v6043_v6 = vadd.f32 %v2200_v61, %v2162_v34 }
 0x29b   : > { %v6045_v36 = vadd.f32 %v2422_v62, %v2253_v52  ;;  %4596 = vmatmul.msk.bf16.vlgmr.msrb.gmra.mxu0 %vm246_vm1, %v5464_v60  ;;  %4620 = vmatmul.msk.bf16.vlgmr.msrb.gmra.mxu3 %vm246_vm1, %v5623_v49 }
 0x29c   : > { %4604 = vmatmul.msk.bf16.vlgmr.msrb.gmra.mxu1 %vm246_vm1, %v5111_v4  ;;  %3263 = vmatpush.bf16.msrb.mxu0 %v5280_v5 }
 0x29d   : > { %3402 = vmatpush.bf16.msrb.mxu3 %v5301_v11  ;;  %3304 = vmatpush.bf16.msrb.mxu1 %v5288_v7 }
 0x29e   : > { %v2520_v21 = vpop.f32.mrf.mxu3 }
 0x29f   : > { %v2153_v58 = vpop.f32.mrf.mxu2 }
 0x2a0   : > { %v2223_v32 = vpop.f32.mrf.mxu0  ;;  %v6078_v58 = vld [vmem:[%s5317_s26 + $0x60] sm:$0xff] }
 0x2a1   : > { %v2424_v61 = vpop.f32.mrf.mxu1 }
 0x2a4   : > { %4612 = vmatmul.msk.bf16.vlgmr.msrb.gmra.mxu2 %vm246_vm1, %v6059_v18 }
 0x2a5   : > { %3353 = vmatpush.bf16.msrb.mxu2 %v5272_v3 }
 0x2a6   : > { %v2522_v2 = vpop.f32.mrf.mxu3 }
 0x2a7   : > { %v2479_v5 = vpop.f32.mrf.mxu2 }
 0x2a8   : > { %v6064_v23 = vadd.f32 %v2520_v21, %v2479_v5  ;;  %v2225_v11 = vpop.f32.mrf.mxu0 }
 0x2a9   : > { %v2254_v7 = vadd.f32 %v2225_v11, %v5939_v31  ;;  %v2426_v28 = vpop.f32.mrf.mxu1 }
 0x2ab   : > { %v6067_v34 = vadd.f32 %v2426_v28, %v2254_v7  ;;  %4597 = vmatmul.msk.bf16.gmra.mxu0 %vm246_vm1, %v5486_v30  ;;  %4621 = vmatmul.msk.bf16.gmra.mxu3 %vm246_vm1, %v5643_v59  ;;  %v5115_v28 = vld [vmem:[%s5317_s26 + $0x18] sm:$0xff] }
 0x2ac   : > { %4605 = vmatmul.msk.bf16.gmra.mxu1 %vm246_vm1, %v5113_v48 }
 0x2ae   : > { %v2524_v62 = vpop.f32.mrf.mxu3 }
 0x2af   : > { %v2481_v52 = vpop.f32.mrf.mxu2 }
 0x2b0   : > { %v2227_v4 = vpop.f32.mrf.mxu0 }
 0x2b1   : > { %v2428_v31 = vpop.f32.mrf.mxu1 }
 0x2b2   : > { %v6096_v31 = vld [vmem:[%s5317_s26 + $0x68] sm:$0xff] }
 0x2b4   : > { %4613 = vmatmul.msk.bf16.gmra.mxu2 %vm246_vm1, %v6078_v58 }
 0x2b6   : > { %v2526_v32 = vpop.f32.mrf.mxu3 }
 0x2b7   : > { %v2483_v21 = vpop.f32.mrf.mxu2 }
 0x2b8   : > { %v6082_v61 = vadd.f32 %v2524_v62, %v2483_v21  ;;  %v2229_v5 = vpop.f32.mrf.mxu0 }
 0x2b9   : > { %v2255_v2 = vadd.f32 %v2229_v5, %v5957_v51  ;;  %v2430_v11 = vpop.f32.mrf.mxu1 }
 0x2bb   : > { %v6085_v7 = vadd.f32 %v2430_v11, %v2255_v2  ;;  %4598 = vmatmul.msk.bf16.gmra.mxu0 %vm246_vm1, %v6724_v22  ;;  %4622 = vmatmul.msk.bf16.gmra.mxu3 %vm246_vm1, %v5659_v14 }
 0x2bc   : > { %4606 = vmatmul.msk.bf16.gmra.mxu1 %vm246_vm1, %v5115_v28 }
 0x2be   : > { %v2528_v62 = vpop.f32.mrf.mxu3 }
 0x2bf   : > { %v2485_v52 = vpop.f32.mrf.mxu2 }
 0x2c0   : > { %v2231_v4 = vpop.f32.mrf.mxu0  ;;  %v5117_v52 = vld [vmem:[%s5317_s26 + $0x20] sm:$0xff] }
 0x2c1   : > { %v2432_v51 = vpop.f32.mrf.mxu1 }
 0x2c4   : > { %4614 = vmatmul.msk.bf16.gmra.mxu2 %vm246_vm1, %v6096_v31 }
 0x2c6   : > { %v2530_v32 = vpop.f32.mrf.mxu3 }
 0x2c7   : > { %v2487_v21 = vpop.f32.mrf.mxu2  ;;  %v6114_v32 = vld [vmem:[%s5317_s26 + $0x70] sm:$0xff] }
 0x2c8   : > { %v6100_v5 = vadd.f32 %v2528_v62, %v2487_v21  ;;  %v2233_v2 = vpop.f32.mrf.mxu0 }
 0x2c9   : > { %v2256_v11 = vadd.f32 %v2233_v2, %v5975_v38  ;;  %v2434_v28 = vpop.f32.mrf.mxu1 }
 0x2cb   : > { %v6103_v48 = vadd.f32 %v2434_v28, %v2256_v11  ;;  %4599 = vmatmul.msk.bf16.gmra.mxu0 %vm246_vm1, %v6728_v63  ;;  %4623 = vmatmul.msk.bf16.gmra.mxu3 %vm246_vm1, %v5675_v10 }
 0x2cc   : > { %4607 = vmatmul.msk.bf16.gmra.mxu1 %vm246_vm1, %v5117_v52 }
 0x2ce   : > { %v2532_v51 = vpop.f32.mrf.mxu3 }
 0x2cf   : > { %v2489_v62 = vpop.f32.mrf.mxu2 }
 0x2d0   : > { %v2235_v21 = vpop.f32.mrf.mxu0  ;;  %v5119_v62 = vld [vmem:[%s5317_s26 + $0x28] sm:$0xff] }
 0x2d1   : > { %v2436_v38 = vpop.f32.mrf.mxu1 }
 0x2d4   : > { %4615 = vmatmul.msk.bf16.gmra.mxu2 %vm246_vm1, %v6114_v32 }
 0x2d6   : > { %v2534_v11 = vpop.f32.mrf.mxu3 }
 0x2d7   : > { %v2491_v2 = vpop.f32.mrf.mxu2 }
 0x2d8   : > { %v6118_v28 = vadd.f32 %v2532_v51, %v2491_v2  ;;  %v2237_v3 = vpop.f32.mrf.mxu0 }
 0x2d9   : > { %v2257_v52 = vadd.f32 %v2237_v3, %v5993_v53  ;;  %v2438_v1 = vpop.f32.mrf.mxu1  ;;  %v6132_v3 = vld [vmem:[%s5317_s26 + $0x78] sm:$0xff] }
 0x2db   : > { %v6121_v4 = vadd.f32 %v2438_v1, %v2257_v52  ;;  %4600 = vmatmul.msk.bf16.gmra.mxu0 %vm246_vm1, %v6732_v12  ;;  %4624 = vmatmul.msk.bf16.gmra.mxu3 %vm246_vm1, %v5691_v44 }
 0x2dc   : > { %4608 = vmatmul.msk.bf16.gmra.mxu1 %vm246_vm1, %v5119_v62 }
 0x2de   : > { %v2536_v38 = vpop.f32.mrf.mxu3 }
 0x2df   : > { %v2493_v51 = vpop.f32.mrf.mxu2 }
 0x2e0   : > { %v2239_v2 = vpop.f32.mrf.mxu0  ;;  %v5121_v51 = vld [vmem:[%s5317_s26 + $0x30] sm:$0xff] }
 0x2e1   : > { %v2440_v53 = vpop.f32.mrf.mxu1 }
 0x2e4   : > { %4616 = vmatmul.msk.bf16.gmra.mxu2 %vm246_vm1, %v6132_v3 }
 0x2e6   : > { %v2538_v11 = vpop.f32.mrf.mxu3 }
 0x2e7   : > { %v2495_v1 = vpop.f32.mrf.mxu2 }
 0x2e8   : > { %v6136_v52 = vadd.f32 %v2536_v38, %v2495_v1  ;;  %v2241_v57 = vpop.f32.mrf.mxu0 }
 0x2e9   : > { %v2258_v62 = vadd.f32 %v2241_v57, %v6012_v20  ;;  %v2442_v8 = vpop.f32.mrf.mxu1  ;;  %v6150_v57 = vld [vmem:[%s5317_s26 + $0x80] sm:$0xff] }
 0x2eb   : > { %v6139_v21 = vadd.f32 %v2442_v8, %v2258_v62  ;;  %4601 = vmatmul.msk.bf16.gmra.mxu0 %vm246_vm1, %v6737_v24  ;;  %4625 = vmatmul.msk.bf16.gmra.mxu3 %vm246_vm1, %v5707_v37 }
 0x2ec   : > { %4609 = vmatmul.msk.bf16.gmra.mxu1 %vm246_vm1, %v5121_v51 }
 0x2ed   : > { %6762 = vst [vmem:[#allocation28_spill] sm:$0xff] %v6139_v21 }
 0x2ee   : > { %v2540_v53 = vpop.f32.mrf.mxu3 }
 0x2ef   : > { %v2497_v38 = vpop.f32.mrf.mxu2 }
 0x2f0   : > { %v2243_v1 = vpop.f32.mrf.mxu0  ;;  %v5123_v38 = vld [vmem:[%s5317_s26 + $0x38] sm:$0xff] }
 0x2f1   : > { %v2444_v20 = vpop.f32.mrf.mxu1 }
 0x2f4   : > { %4617 = vmatmul.msk.bf16.gmra.mxu2 %vm246_vm1, %v6150_v57 }
 0x2f6   : > { %v2542_v11 = vpop.f32.mrf.mxu3 }
 0x2f7   : > { %v2499_v8 = vpop.f32.mrf.mxu2 }
 0x2f8   : > { %v6154_v62 = vadd.f32 %v2540_v53, %v2499_v8  ;;  %v2245_v29 = vpop.f32.mrf.mxu0 }
 0x2f9   : > { %v2259_v51 = vadd.f32 %v2245_v29, %v6029_v50  ;;  %v2446_v45 = vpop.f32.mrf.mxu1  ;;  %v6168_v29 = vld [vmem:[%s5317_s26 + $0x88] sm:$0xff] }
 0x2fa   : > { %6764 = vst [vmem:[#allocation30_spill] sm:$0xff] %v6168_v29 }
 0x2fb   : > { %v6157_v2 = vadd.f32 %v2446_v45, %v2259_v51  ;;  %4602 = vmatmul.msk.bf16.gmra.mxu0 %vm246_vm1, %v6742_v0  ;;  %4626 = vmatmul.msk.bf16.gmra.mxu3 %vm246_vm1, %v5725_v39 }
 0x2fc   : > { %4610 = vmatmul.msk.bf16.gmra.mxu1 %vm246_vm1, %v5123_v38 }
 0x2fd   : > { %6763 = vst [vmem:[#allocation29_spill] sm:$0xff] %v6157_v2 }
 0x2fe   : > { %v2544_v20 = vpop.f32.mrf.mxu3 }
 0x2ff   : > { %v2501_v53 = vpop.f32.mrf.mxu2 }
 0x300   : > { %v2247_v8 = vpop.f32.mrf.mxu0 }
 0x301   : > { %v2448_v50 = vpop.f32.mrf.mxu1  ;;  %v5125_v8 = vld [vmem:[%s5317_s26 + $0x40] sm:$0xff] }
 0x304   : > { %4618 = vmatmul.msk.bf16.gmra.mxu2 %vm246_vm1, %v6168_v29 }
 0x306   : > { %v2546_v11 = vpop.f32.mrf.mxu3 }
 0x307   : > { %v2503_v45 = vpop.f32.mrf.mxu2  ;;  %v5035_v11 = vld [vmem:[%s5317_s26 + $0xa8] sm:$0xff] }
 0x308   : > { %v6172_v51 = vadd.f32 %v2544_v20, %v2503_v45  ;;  %v2249_v38 = vpop.f32.mrf.mxu0 }
 0x309   : > { %v2260_v1 = vadd.f32 %v2249_v38, %v6043_v6  ;;  %v2450_v2 = vpop.f32.mrf.mxu1  ;;  %v5036_v38 = vld [vmem:[%s5317_s26 + $0xb0] sm:$0xff] }
 0x30b   : > { %v6175_v53 = vadd.f32 %v2450_v2, %v2260_v1  ;;  %4603 = vmatmul.msk.bf16.gmra.mxu0 %vm246_vm1, %v6747_v35  ;;  %4627 = vmatmul.msk.bf16.gmra.mxu3 %vm246_vm1, %v5739_v9  ;;  %v6187_v1 = vld [vmem:[%s5317_s26 + $0x90] sm:$0xff]  ;;  %v3069_v9 = vshll.u32 %v5035_v11, 16 }
 0x30c   : > { %4611 = vmatmul.msk.bf16.gmra.mxu1 %vm246_vm1, %v5125_v8  ;;  %v5019_v8 = vld [vmem:[%s5317_s26 + $0xa8] sm:$0xff] }
 0x30d   : > { %6765 = vst [vmem:[#allocation31_spill] sm:$0xff] %v6175_v53  ;;  %v3071_v20 = vrot.slane %v3069_v9, 1 }
 0x30e   : > { %v2548_v45 = vpop.f32.mrf.mxu3 }
 0x30f   : > { %v2505_v50 = vpop.f32.mrf.mxu2 }
 0x310   : > { %v2251_v6 = vpop.f32.mrf.mxu0  ;;  %v3067_v50 = vshrl.u32 %v5035_v11, 16 }
 0x311   : > { %v2452_v2 = vpop.f32.mrf.mxu1  ;;  %v3074_v6 = vshll.u32 %v5036_v38, 16 }
 0x314   : > { %4619 = vmatmul.msk.bf16.gmra.mxu2 %vm246_vm1, %v6187_v1 }
 0x316   : > { %v2550_v29 = vpop.f32.mrf.mxu3 }
 0x317   : > { %v2507_v55 = vpop.f32.mrf.mxu2  ;;  %v3076_v29 = vrot.slane %v3074_v6, 1 }
 0x318   : > { %v6192_v39 = vadd.f32 %v2548_v45, %v2507_v55  ;;  %v2561_v21 = vpop.f32.mrf.mxu0  ;;  %v3072_v55 = vor.u32 %v3071_v20, %v3067_v50  ;;  %v5037_v20 = vld [vmem:[%s5317_s26 + $0xb8] sm:$0xff]  ;;  %v6216_v50 = vld [vmem:[%s5317_s26 + $0x100] sm:$0xff] }
 0x319   : > { %v2593_v2 = vadd.f32 %v2561_v21, %v6064_v23  ;;  %v2610_v53 = vpop.f32.mrf.mxu1  ;;  %v3082_v6 = vshll.u32 %v5037_v20, 16 }
 0x31b   : > { %v2642_v17 = vadd.f32 %v2610_v53, %v2593_v2  ;;  %4676 = vmatmul.msk.bf16.vlgmr.msra.gmra.mxu0 %vm246_vm1, %v5019_v8  ;;  %4797 = vmatmul.msk.bf16.vlgmr.msra.gmra.mxu3 %vm246_vm1, %v5464_v60  ;;  %v6208_v53 = vsel %vm486_vm2, %v3072_v55, %v3076_v29  ;;  %v5020_v8 = vld [vmem:[%s5317_s26 + $0xb0] sm:$0xff] }
 0x31c   : > { %4732 = vmatmul.msk.bf16.vlgmr.msra.gmra.mxu1 %vm246_vm1, %v6196_v43  ;;  %3451 = vmatpush.bf16.msra.mxu0 %v5321_v15 }
 0x31d   : > { %3750 = vmatpush.bf16.msra.mxu3 %v5438_v33  ;;  %3500 = vmatpush.bf16.msra.mxu1 %v6750_v19  ;;  %v3078_v19 = vshrl.u32 %v5036_v38, 16 }
 0x31e   : > { %v2708_v23 = vpop.f32.mrf.mxu3 }
 0x31f   : > { %v2509_v9 = vpop.f32.mrf.mxu2 }
 0x320   : > { %v2563_v21 = vpop.f32.mrf.mxu0 }
 0x321   : > { %v2612_v60 = vpop.f32.mrf.mxu1 }
 0x324   : > { %4789 = vmatmul.msk.bf16.vlgmr.msra.gmra.mxu2 %vm246_vm1, %v6208_v53 }
 0x325   : > { %3549 = vmatpush.bf16.msra.mxu2 %v5309_v13  ;;  %v3080_v13 = vor.u32 %v3078_v19, %v3076_v29  ;;  %v3086_v29 = vshrl.u32 %v5037_v20, 16 }
 0x326   : > { %v2710_v15 = vpop.f32.mrf.mxu3 }
 0x327   : > { %v2659_v45 = vpop.f32.mrf.mxu2  ;;  %v5038_v15 = vld [vmem:[%s5317_s26 + $0xc0] sm:$0xff] }
 0x328   : > { %v2691_v11 = vadd.f32 %v2659_v45, %v2642_v17  ;;  %v2565_v33 = vpop.f32.mrf.mxu0  ;;  %v3084_v17 = vrot.slane %v3082_v6, 1  ;;  %v3090_v19 = vshll.u32 %v5038_v15, 16 }
 0x329   : > { %v2594_v2 = vadd.f32 %v2565_v33, %v6082_v61  ;;  %v2614_v55 = vpop.f32.mrf.mxu1  ;;  %v5021_v33 = vld [vmem:[%s5317_s26 + $0xb8] sm:$0xff] }
 0x32a   : > { %v6219_v9 = vadd.f32 %v2708_v23, %v2691_v11  ;;  %v6227_v61 = vsel %vm486_vm2, %v3080_v13, %v3084_v17  ;;  %v3092_v20 = vrot.slane %v3090_v19, 1 }
 0x32b   : > { %v2643_v21 = vadd.f32 %v2614_v55, %v2594_v2  ;;  %4677 = vmatmul.msk.bf16.gmra.mxu0 %vm246_vm1, %v5020_v8  ;;  %4798 = vmatmul.msk.bf16.gmra.mxu3 %vm246_vm1, %v5486_v30  ;;  %6766 = vst [vmem:[#allocation32_spill] sm:$0xff] %v6227_v61  ;;  %v6234_v55 = vld [vmem:[%s5317_s26 + $0x108] sm:$0xff] }
 0x32c   : > { %4733 = vmatmul.msk.bf16.gmra.mxu1 %vm246_vm1, %v6216_v50 }
 0x32e   : > { %v2712_v60 = vpop.f32.mrf.mxu3 }
 0x32f   : > { %v2661_v38 = vpop.f32.mrf.mxu2 }
 0x330   : > { %v2567_v45 = vpop.f32.mrf.mxu0 }
 0x331   : > { %v2616_v23 = vpop.f32.mrf.mxu1 }
 0x334   : > { %4790 = vmatmul.msk.bf16.gmra.mxu2 %vm246_vm1, %v6227_v61  ;;  %v6252_v61 = vld [vmem:[%s5317_s26 + $0x110] sm:$0xff] }
 0x336   : > { %v2714_v8 = vpop.f32.mrf.mxu3 }
 0x337   : > { %v2663_v11 = vpop.f32.mrf.mxu2 }
 0x338   : > { %v2692_v30 = vadd.f32 %v2663_v11, %v2643_v21  ;;  %v2569_v2 = vpop.f32.mrf.mxu0  ;;  %v3088_v21 = vor.u32 %v3086_v29, %v3084_v17  ;;  %v3094_v17 = vshrl.u32 %v5038_v15, 16 }
 0x339   : > { %v2595_v6 = vadd.f32 %v2569_v2, %v6100_v5  ;;  %v2618_v38 = vpop.f32.mrf.mxu1 }
 0x33a   : > { %v6237_v13 = vadd.f32 %v2712_v60, %v2692_v30  ;;  %v6245_v5 = vsel %vm486_vm2, %v3088_v21, %v3092_v20  ;;  %v5039_v30 = vld [vmem:[%s5317_s26 + $0xc8] sm:$0xff] }
 0x33b   : > { %v2644_v45 = vadd.f32 %v2618_v38, %v2595_v6  ;;  %4678 = vmatmul.msk.bf16.gmra.mxu0 %vm246_vm1, %v5021_v33  ;;  %4799 = vmatmul.msk.bf16.gmra.mxu3 %vm246_vm1, %v6724_v22  ;;  %6767 = vst [vmem:[#allocation33_spill] sm:$0xff] %v6245_v5  ;;  %v5022_v6 = vld [vmem:[%s5317_s26 + $0xc0] sm:$0xff]  ;;  %v3098_v29 = vshll.u32 %v5039_v30, 16 }
 0x33c   : > { %4734 = vmatmul.msk.bf16.gmra.mxu1 %vm246_vm1, %v6234_v55 }
 0x33d   : > { %v3100_v15 = vrot.slane %v3098_v29, 1 }
 0x33e   : > { %v2716_v11 = vpop.f32.mrf.mxu3 }
 0x33f   : > { %v2665_v23 = vpop.f32.mrf.mxu2 }
 0x340   : > { %v2571_v8 = vpop.f32.mrf.mxu0 }
 0x341   : > { %v2620_v60 = vpop.f32.mrf.mxu1 }
 0x344   : > { %4791 = vmatmul.msk.bf16.gmra.mxu2 %vm246_vm1, %v6245_v5  ;;  %v6270_v5 = vld [vmem:[%s5317_s26 + $0x118] sm:$0xff] }
 0x346   : > { %v2718_v2 = vpop.f32.mrf.mxu3 }
 0x347   : > { %v2667_v33 = vpop.f32.mrf.mxu2 }
 0x348   : > { %v2693_v22 = vadd.f32 %v2667_v33, %v2644_v45  ;;  %v2573_v38 = vpop.f32.mrf.mxu0  ;;  %v3096_v45 = vor.u32 %v3094_v17, %v3092_v20  ;;  %v3102_v20 = vshrl.u32 %v5039_v30, 16 }
 0x349   : > { %v2596_v19 = vadd.f32 %v2573_v38, %v6118_v28  ;;  %v2622_v23 = vpop.f32.mrf.mxu1 }
 0x34a   : > { %v6255_v21 = vadd.f32 %v2716_v11, %v2693_v22  ;;  %v6263_v28 = vsel %vm486_vm2, %v3096_v45, %v3100_v15  ;;  %v5040_v22 = vld [vmem:[%s5317_s26 + $0xd0] sm:$0xff] }
 0x34b   : > { %v2645_v8 = vadd.f32 %v2622_v23, %v2596_v19  ;;  %4679 = vmatmul.msk.bf16.gmra.mxu0 %vm246_vm1, %v5022_v6  ;;  %4800 = vmatmul.msk.bf16.gmra.mxu3 %vm246_vm1, %v6728_v63  ;;  %6768 = vst [vmem:[#allocation34_spill] sm:$0xff] %v6263_v28  ;;  %v5023_v19 = vld [vmem:[%s5317_s26 + $0xc8] sm:$0xff]  ;;  %v3106_v17 = vshll.u32 %v5040_v22, 16 }
 0x34c   : > { %4735 = vmatmul.msk.bf16.gmra.mxu1 %vm246_vm1, %v6252_v61 }
 0x34d   : > { %v3108_v30 = vrot.slane %v3106_v17, 1 }
 0x34e   : > { %v2720_v33 = vpop.f32.mrf.mxu3 }
 0x34f   : > { %v2669_v60 = vpop.f32.mrf.mxu2 }
 0x350   : > { %v2575_v2 = vpop.f32.mrf.mxu0 }
 0x351   : > { %v2624_v11 = vpop.f32.mrf.mxu1 }
 0x354   : > { %4792 = vmatmul.msk.bf16.gmra.mxu2 %vm246_vm1, %v6263_v28  ;;  %v6288_v28 = vld [vmem:[%s5317_s26 + $0x120] sm:$0xff] }
 0x355   : > { %6769 = vst [vmem:[#allocation35_spill] sm:$0xff] %v6288_v28 }
 0x356   : > { %v2722_v38 = vpop.f32.mrf.mxu3 }
 0x357   : > { %v2671_v6 = vpop.f32.mrf.mxu2 }
 0x358   : > { %v2694_v63 = vadd.f32 %v2671_v6, %v2645_v8  ;;  %v2577_v23 = vpop.f32.mrf.mxu0  ;;  %v3104_v8 = vor.u32 %v3102_v20, %v3100_v15  ;;  %v3110_v15 = vshrl.u32 %v5040_v22, 16 }
 0x359   : > { %v2597_v29 = vadd.f32 %v2577_v23, %v6136_v52  ;;  %v2626_v60 = vpop.f32.mrf.mxu1 }
 0x35a   : > { %v6273_v45 = vadd.f32 %v2720_v33, %v2694_v63  ;;  %v6281_v52 = vsel %vm486_vm2, %v3104_v8, %v3108_v30  ;;  %v5041_v63 = vld [vmem:[%s5317_s26 + $0xd8] sm:$0xff] }
 0x35b   : > { %v2646_v2 = vadd.f32 %v2626_v60, %v2597_v29  ;;  %4680 = vmatmul.msk.bf16.gmra.mxu0 %vm246_vm1, %v5023_v19  ;;  %4801 = vmatmul.msk.bf16.gmra.mxu3 %vm246_vm1, %v6732_v12  ;;  %v5024_v29 = vld [vmem:[%s5317_s26 + $0xd0] sm:$0xff]  ;;  %v3114_v20 = vshll.u32 %v5041_v63, 16 }
 0x35c   : > { %4736 = vmatmul.msk.bf16.gmra.mxu1 %vm246_vm1, %v6270_v5 }
 0x35d   : > { %v3116_v22 = vrot.slane %v3114_v20, 1 }
 0x35e   : > { %v2724_v6 = vpop.f32.mrf.mxu3 }
 0x35f   : > { %v2673_v11 = vpop.f32.mrf.mxu2 }
 0x360   : > { %v2579_v38 = vpop.f32.mrf.mxu0 }
 0x361   : > { %v2628_v33 = vpop.f32.mrf.mxu1 }
 0x364   : > { %4793 = vmatmul.msk.bf16.gmra.mxu2 %vm246_vm1, %v6281_v52 }
 0x366   : > { %v2726_v23 = vpop.f32.mrf.mxu3 }
 0x367   : > { %v2675_v19 = vpop.f32.mrf.mxu2 }
 0x368   : > { %v2695_v12 = vadd.f32 %v2675_v19, %v2646_v2  ;;  %v2581_v60 = vpop.f32.mrf.mxu0  ;;  %v3112_v2 = vor.u32 %v3110_v15, %v3108_v30  ;;  %v3118_v30 = vshrl.u32 %v5041_v63, 16  ;;  %v4756_v63 = vld [vmem:[%s5317_s26 + $0xe8] sm:$0x1] }
 0x369   : > { %v2598_v17 = vadd.f32 %v2581_v60, %v6154_v62  ;;  %v2630_v11 = vpop.f32.mrf.mxu1 }
 0x36a   : > { %v6291_v8 = vadd.f32 %v2724_v6, %v2695_v12  ;;  %v6299_v62 = vsel %vm486_vm2, %v3112_v2, %v3116_v22  ;;  %v5042_v12 = vld [vmem:[%s5317_s26 + $0xe0] sm:$0xff] }
 0x36b   : > { %v2647_v38 = vadd.f32 %v2630_v11, %v2598_v17  ;;  %4681 = vmatmul.msk.bf16.gmra.mxu0 %vm246_vm1, %v5024_v29  ;;  %4802 = vmatmul.msk.bf16.gmra.mxu3 %vm246_vm1, %v6737_v24  ;;  %6770 = vst [vmem:[#allocation36_spill] sm:$0xff] %v6299_v62  ;;  %v5025_v17 = vld [vmem:[%s5317_s26 + $0xd8] sm:$0xff]  ;;  %v3122_v15 = vshll.u32 %v5042_v12, 16 }
 0x36c   : > { %4737 = vmatmul.msk.bf16.gmra.mxu1 %vm246_vm1, %v6288_v28  ;;  %v6306_v28 = vld [vmem:[%s5317_s26 + $0x128] sm:$0xff] }
 0x36d   : > { %6771 = vst [vmem:[#allocation37_spill] sm:$0xff] %v6306_v28 }
 0x36e   : > { %v2728_v19 = vpop.f32.mrf.mxu3 }
 0x36f   : > { %v2677_v33 = vpop.f32.mrf.mxu2 }
 0x370   : > { %v2583_v23 = vpop.f32.mrf.mxu0 }
 0x371   : > { %v2632_v6 = vpop.f32.mrf.mxu1 }
 0x372   : > { %v3124_v6 = vrot.slane %v3122_v15, 1  ;;  %v3126_v15 = vshrl.u32 %v5042_v12, 16 }
 0x374   : > { %4794 = vmatmul.msk.bf16.gmra.mxu2 %vm246_vm1, %v6299_v62 }
 0x376   : > { %v2730_v60 = vpop.f32.mrf.mxu3 }
 0x377   : > { %v2679_v29 = vpop.f32.mrf.mxu2 }
 0x378   : > { %v2696_v24 = vadd.f32 %v2679_v29, %v2647_v38  ;;  %v2585_v11 = vpop.f32.mrf.mxu0  ;;  %v3120_v38 = vor.u32 %v3118_v30, %v3116_v22  ;;  %v6324_v30 = vld [vmem:[%s5317_s26 + $0x130] sm:$0xff] }
 0x379   : > { %v2599_v20 = vadd.f32 %v2585_v11, %v6172_v51  ;;  %v2634_v33 = vpop.f32.mrf.mxu1 }
 0x37a   : > { %v6309_v2 = vadd.f32 %v2728_v19, %v2696_v24  ;;  %v6318_v19 = vsel %vm486_vm2, %v3120_v38, %v3124_v6  ;;  %v3056_v24 = vunpack.c.l.b16 %v4756_v63 }
 0x37b   : > { %v2648_v23 = vadd.f32 %v2634_v33, %v2599_v20  ;;  %4682 = vmatmul.msk.bf16.gmra.mxu0 %vm246_vm1, %v5025_v17  ;;  %4803 = vmatmul.msk.bf16.gmra.mxu3 %vm246_vm1, %v6742_v0 }
 0x37c   : > { %4738 = vmatmul.msk.bf16.gmra.mxu1 %vm246_vm1, %v6306_v28  ;;  %v3065_v0 = vpack.c.b16 %v3056_v24, %v3056_v24  ;;  %v5026_v28 = vld [vmem:[%s5317_s26 + $0xe0] sm:$0xff] }
 0x37e   : > { %v2732_v60 = vpop.f32.mrf.mxu3 }
 0x37f   : > { %v2681_v29 = vpop.f32.mrf.mxu2 }
 0x380   : > { %v2587_v51 = vpop.f32.mrf.mxu0  ;;  %v3130_v29 = vshll.u32 %v3065_v0, 16 }
 0x381   : > { %v2636_v11 = vpop.f32.mrf.mxu1 }
 0x382   : > { %v3132_v24 = vrot.slane %v3130_v29, 1 }
 0x384   : > { %4795 = vmatmul.msk.bf16.gmra.mxu2 %vm246_vm1, %v6318_v19 }
 0x386   : > { %v2734_v20 = vpop.f32.mrf.mxu3 }
 0x387   : > { %v2683_v17 = vpop.f32.mrf.mxu2 }
 0x388   : > { %v2697_v33 = vadd.f32 %v2683_v17, %v2648_v23  ;;  %v2589_v22 = vpop.f32.mrf.mxu0  ;;  %v3128_v23 = vor.u32 %v3126_v15, %v3124_v6 }
 0x389   : > { %v2600_v51 = vadd.f32 %v2589_v22, %v6192_v39  ;;  %v2638_v62 = vpop.f32.mrf.mxu1 }
 0x38a   : > { %v6327_v38 = vadd.f32 %v2732_v60, %v2697_v33  ;;  %v6335_v0 = vsel %vm486_vm2, %v3128_v23, %v3132_v24 }
 0x38b   : > { %v2649_v63 = vadd.f32 %v2638_v62, %v2600_v51  ;;  %4683 = vmatmul.msk.bf16.gmra.mxu0 %vm246_vm1, %v5026_v28  ;;  %4804 = vmatmul.msk.bf16.gmra.mxu3 %vm246_vm1, %v6747_v35 }
 0x38c   : > { %4739 = vmatmul.msk.bf16.gmra.mxu1 %vm246_vm1, %v6324_v30 }
 0x38e   : > { %v2736_v17 = vpop.f32.mrf.mxu3 }
 0x38f   : > { %v2685_v11 = vpop.f32.mrf.mxu2 }
 0x390   : > { %v2591_v12 = vpop.f32.mrf.mxu0 }
 0x391   : > { %v2640_v39 = vpop.f32.mrf.mxu1 }
 0x394   : > { %4796 = vmatmul.msk.bf16.gmra.mxu2 %vm246_vm1, %v6335_v0 }
 0x396   : > { %v2738_v28 = vpop.f32.mrf.mxu3 }
 0x397   : > { %v2687_v62 = vpop.f32.mrf.mxu2 }
 0x398   : > { %v2698_v60 = vadd.f32 %v2687_v62, %v2649_v63  ;;  %v2837_v20 = vpop.f32.mrf.mxu0 }
 0x399   : > { %v2869_v35 = vadd.f32 %v2837_v20, %v6219_v9  ;;  %v2966_v33 = vpop.f32.mrf.mxu1 }
 0x39a   : > { %v6340_v22 = vadd.f32 %v2736_v17, %v2698_v60 }
 0x39b   : > { %v2998_v6 = vadd.f32 %v2966_v33, %v2869_v35  ;;  %4805 = vmatmul.msk.bf16.vlgmr.msrb.gmra.mxu0 %vm246_vm1, %v5912_v27  ;;  %4829 = vmatmul.msk.bf16.vlgmr.msrb.gmra.mxu3 %vm246_vm1, %v5623_v49  ;;  %v6772_v27 = vmax.f32 %v5755_v42, %v6045_v36 }
 0x39c   : > { %4813 = vmatmul.msk.bf16.vlgmr.msrb.gmra.mxu1 %vm246_vm1, %v5769_v40 }
 0x39e   : > { %v6348_v29 = vpop.f32.mrf.mxu3 }
 0x39f   : > { %v2689_v15 = vpop.f32.mrf.mxu2 }
 0x3a0   : > { %v2839_v51 = vpop.f32.mrf.mxu0 }
 0x3a1   : > { %v2968_v63 = vpop.f32.mrf.mxu1 }
 0x3a4   : > { %4821 = vmatmul.msk.bf16.vlgmr.msrb.gmra.mxu2 %vm246_vm1, %v6059_v18 }
 0x3a6   : > { %v3226_v23 = vpop.f32.mrf.mxu3 }
 0x3a7   : > { %v3167_v9 = vpop.f32.mrf.mxu2 }
 0x3a8   : > { %v3199_v24 = vadd.f32 %v3167_v9, %v2998_v6  ;;  %v2841_v11 = vpop.f32.mrf.mxu0 }
 0x3a9   : > { %v2870_v49 = vadd.f32 %v2841_v11, %v6237_v13  ;;  %v2970_v40 = vpop.f32.mrf.mxu1  ;;  %v6776_v11 = vld [vmem:[#allocation19_spill] sm:$0xff] }
 0x3aa   : > { %v6355_v17 = vmax.f32 %v6772_v27, %v3199_v24 }
 0x3ab   : > { %v2999_v12 = vadd.f32 %v2970_v40, %v2870_v49  ;;  %4806 = vmatmul.msk.bf16.gmra.mxu0 %vm246_vm1, %v5931_v47  ;;  %4830 = vmatmul.msk.bf16.gmra.mxu3 %vm246_vm1, %v5643_v59  ;;  %v6773_v47 = vmax.f32 %v5776_v25, %v6067_v34 }
 0x3ac   : > { %4814 = vmatmul.msk.bf16.gmra.mxu1 %vm246_vm1, %v5787_v16 }
 0x3ae   : > { %v6364_v39 = vpop.f32.mrf.mxu3 }
 0x3af   : > { %v3169_v18 = vpop.f32.mrf.mxu2 }
 0x3b0   : > { %v2843_v62 = vpop.f32.mrf.mxu0 }
 0x3b1   : > { %v2972_v42 = vpop.f32.mrf.mxu1  ;;  %v6778_v62 = vmax.f32 %v5810_v46, %v6103_v48 }
 0x3b4   : > { %4822 = vmatmul.msk.bf16.gmra.mxu2 %vm246_vm1, %v6078_v58  ;;  %v6774_v58 = vld [vmem:[#allocation6_spill] sm:$0xff] }
 0x3b6   : > { %v3230_v13 = vpop.f32.mrf.mxu3 }
 0x3b7   : > { %v3171_v36 = vpop.f32.mrf.mxu2 }
 0x3b8   : > { %v3200_v28 = vadd.f32 %v3171_v36, %v2999_v12  ;;  %v2845_v60 = vpop.f32.mrf.mxu0 }
 0x3b9   : > { %v2871_v59 = vadd.f32 %v2845_v60, %v6255_v21  ;;  %v2974_v16 = vpop.f32.mrf.mxu1 }
 0x3ba   : > { %v6371_v20 = vmax.f32 %v6773_v47, %v3200_v28  ;;  %v6779_v28 = vld [vmem:[#allocation21_spill] sm:$0xff] }
 0x3bb   : > { %v3000_v35 = vadd.f32 %v2974_v16, %v2871_v59  ;;  %4807 = vmatmul.msk.bf16.gmra.mxu0 %vm246_vm1, %v5949_v56  ;;  %4831 = vmatmul.msk.bf16.gmra.mxu3 %vm246_vm1, %v5659_v14  ;;  %v6775_v56 = vmax.f32 %v5793_v41, %v6085_v7 }
 0x3bc   : > { %4815 = vmatmul.msk.bf16.gmra.mxu1 %vm246_vm1, %v6774_v58  ;;  %v6781_v58 = vmax.f32 %v5827_v26, %v6121_v4 }
 0x3be   : > { %v6380_v6 = vpop.f32.mrf.mxu3 }
 0x3bf   : > { %v3173_v33 = vpop.f32.mrf.mxu2 }
 0x3c0   : > { %v2847_v15 = vpop.f32.mrf.mxu0 }
 0x3c1   : > { %v2976_v25 = vpop.f32.mrf.mxu1 }
 0x3c4   : > { %4823 = vmatmul.msk.bf16.gmra.mxu2 %vm246_vm1, %v6096_v31  ;;  %v6777_v31 = vld [vmem:[#allocation7_spill] sm:$0xff] }
 0x3c6   : > { %v3234_v21 = vpop.f32.mrf.mxu3 }
 0x3c7   : > { %v3175_v34 = vpop.f32.mrf.mxu2 }
 0x3c8   : > { %v3201_v51 = vadd.f32 %v3175_v34, %v3000_v35  ;;  %v2849_v63 = vpop.f32.mrf.mxu0 }
 0x3c9   : > { %v2872_v14 = vadd.f32 %v2849_v63, %v6273_v45  ;;  %v2978_v23 = vpop.f32.mrf.mxu1 }
 0x3ca   : > { %v6387_v9 = vmax.f32 %v6775_v56, %v3201_v51 }
 0x3cb   : > { %v3001_v24 = vadd.f32 %v2978_v23, %v2872_v14  ;;  %4808 = vmatmul.msk.bf16.gmra.mxu0 %vm246_vm1, %v6776_v11  ;;  %4832 = vmatmul.msk.bf16.gmra.mxu3 %vm246_vm1, %v5675_v10  ;;  %v6783_v14 = vld [vmem:[#allocation9_spill] sm:$0xff] }
 0x3cc   : > { %4816 = vmatmul.msk.bf16.gmra.mxu1 %vm246_vm1, %v6777_v31 }
 0x3ce   : > { %v6396_v49 = vpop.f32.mrf.mxu3 }
 0x3cf   : > { %v3177_v27 = vpop.f32.mrf.mxu2 }
 0x3d0   : > { %v2851_v40 = vpop.f32.mrf.mxu0  ;;  %v6786_v27 = vld [vmem:[#allocation25_spill] sm:$0xff] }
 0x3d1   : > { %v2980_v41 = vpop.f32.mrf.mxu1  ;;  %v6787_v40 = vld [vmem:[#allocation22_spill] sm:$0xff] }
 0x3d4   : > { %4824 = vmatmul.msk.bf16.gmra.mxu2 %vm246_vm1, %v6114_v32  ;;  %v6780_v32 = vld [vmem:[#allocation8_spill] sm:$0xff] }
 0x3d6   : > { %v3238_v45 = vpop.f32.mrf.mxu3 }
 0x3d7   : > { %v3179_v7 = vpop.f32.mrf.mxu2 }
 0x3d8   : > { %v3202_v12 = vadd.f32 %v3179_v7, %v3001_v24  ;;  %v2853_v18 = vpop.f32.mrf.mxu0 }
 0x3d9   : > { %v2873_v10 = vadd.f32 %v2853_v18, %v6291_v8  ;;  %v2982_v36 = vpop.f32.mrf.mxu1  ;;  %v6789_v18 = vld [vmem:[#allocation30_spill] sm:$0xff] }
 0x3da   : > { %v6403_v42 = vmax.f32 %v6778_v62, %v3202_v12 }
 0x3db   : > { %v3002_v13 = vadd.f32 %v2982_v36, %v2873_v10  ;;  %4809 = vmatmul.msk.bf16.gmra.mxu0 %vm246_vm1, %v6779_v28  ;;  %4833 = vmatmul.msk.bf16.gmra.mxu3 %vm246_vm1, %v5691_v44  ;;  %v6790_v28 = vld [vmem:[#allocation11_spill] sm:$0xff] }
 0x3dc   : > { %4817 = vmatmul.msk.bf16.gmra.mxu1 %vm246_vm1, %v6780_v32  ;;  %v6791_v32 = vld [vmem:[#allocation29_spill] sm:$0xff] }
 0x3de   : > { %v6412_v47 = vpop.f32.mrf.mxu3 }
 0x3df   : > { %v3181_v60 = vpop.f32.mrf.mxu2 }
 0x3e0   : > { %v2855_v59 = vpop.f32.mrf.mxu0  ;;  %v6792_v60 = vmax.f32 %v6790_v28, %v6791_v32 }
 0x3e1   : > { %v2984_v46 = vpop.f32.mrf.mxu1 }
 0x3e4   : > { %4825 = vmatmul.msk.bf16.gmra.mxu2 %vm246_vm1, %v6132_v3  ;;  %v6782_v3 = vld [vmem:[#allocation10_spill] sm:$0xff] }
 0x3e6   : > { %v3242_v8 = vpop.f32.mrf.mxu3 }
 0x3e7   : > { %v3183_v48 = vpop.f32.mrf.mxu2 }
 0x3e8   : > { %v3203_v16 = vadd.f32 %v3183_v48, %v3002_v13  ;;  %v2857_v35 = vpop.f32.mrf.mxu0  ;;  %v5043_v13 = vld [vmem:[%s5317_s26 + $0xf8] sm:$0xff] }
 0x3e9   : > { %v2874_v44 = vadd.f32 %v2857_v35, %v6309_v2  ;;  %v2986_v15 = vpop.f32.mrf.mxu1  ;;  %v6794_v35 = vld [vmem:[#allocation23_spill] sm:$0xff] }
 0x3ea   : > { %v6419_v33 = vmax.f32 %v6781_v58, %v3203_v16  ;;  %v6793_v16 = vld [vmem:[#allocation27_spill] sm:$0xff]  ;;  %v6795_v58 = vld [vmem:[#allocation14_spill] sm:$0xff] }
 0x3eb   : > { %v3003_v25 = vadd.f32 %v2986_v15, %v2874_v44  ;;  %4810 = vmatmul.msk.bf16.gmra.mxu0 %vm246_vm1, %v6003_v54  ;;  %4834 = vmatmul.msk.bf16.gmra.mxu3 %vm246_vm1, %v5707_v37  ;;  %v6784_v54 = vld [vmem:[#allocation28_spill] sm:$0xff]  ;;  %v5044_v44 = vld [vmem:[%s5317_s26 + $0x100] sm:$0xff]  ;;  %v3654_v15 = vshll.u32 %v5043_v13, 16 }
 0x3ec   : > { %4818 = vmatmul.msk.bf16.gmra.mxu1 %vm246_vm1, %v6782_v3  ;;  %v6785_v23 = vmax.f32 %v6783_v14, %v6784_v54 }
 0x3ee   : > { %v6428_v21 = vpop.f32.mrf.mxu3 }
 0x3ef   : > { %v3185_v34 = vpop.f32.mrf.mxu2 }
 0x3f0   : > { %v2859_v51 = vpop.f32.mrf.mxu0 }
 0x3f1   : > { %v2988_v26 = vpop.f32.mrf.mxu1  ;;  %v3652_v51 = vshrl.u32 %v5043_v13, 16 }
 0x3f2   : > { %v3656_v26 = vrot.slane %v3654_v15, 1 }
 0x3f4   : > { %4826 = vmatmul.msk.bf16.gmra.mxu2 %vm246_vm1, %v6150_v57  ;;  %v6788_v57 = vld [vmem:[#allocation12_spill] sm:$0xff] }
 0x3f6   : > { %v3246_v2 = vpop.f32.mrf.mxu3 }
 0x3f7   : > { %v3187_v4 = vpop.f32.mrf.mxu2  ;;  %v3657_v2 = vor.u32 %v3656_v26, %v3652_v51 }
 0x3f8   : > { %v3204_v63 = vadd.f32 %v3187_v4, %v3003_v25  ;;  %v2861_v56 = vpop.f32.mrf.mxu0 }
 0x3f9   : > { %v2875_v37 = vadd.f32 %v2861_v56, %v6327_v38  ;;  %v2990_v11 = vpop.f32.mrf.mxu1 }
 0x3fa   : > { %v6435_v24 = vmax.f32 %v6785_v23, %v3204_v63 }
 0x3fb   : > { %v3004_v31 = vadd.f32 %v2990_v11, %v2875_v37  ;;  %4811 = vmatmul.msk.bf16.gmra.mxu0 %vm246_vm1, %v6786_v27  ;;  %4835 = vmatmul.msk.bf16.gmra.mxu3 %vm246_vm1, %v6787_v40  ;;  %v6796_v11 = vld [vmem:[#allocation13_spill] sm:$0xff] }
 0x3fc   : > { %4819 = vmatmul.msk.bf16.gmra.mxu1 %vm246_vm1, %v6788_v57 }
 0x3fe   : > { %v6444_v7 = vpop.f32.mrf.mxu3 }
 0x3ff   : > { %v3189_v41 = vpop.f32.mrf.mxu2 }
 0x400   : > { %v2863_v45 = vpop.f32.mrf.mxu0 }
 0x401   : > { %v2992_v12 = vpop.f32.mrf.mxu1 }
 0x402   : > { %v6799_v12 = vld [vmem:[#allocation15_spill] sm:$0xff] }
 0x404   : > { %4827 = vmatmul.msk.bf16.gmra.mxu2 %vm246_vm1, %v6789_v18 }
 0x406   : > { %v3250_v62 = vpop.f32.mrf.mxu3 }
 0x407   : > { %v3191_v38 = vpop.f32.mrf.mxu2 }
 0x408   : > { %v3205_v10 = vadd.f32 %v3191_v38, %v3004_v31  ;;  %v2865_v36 = vpop.f32.mrf.mxu0  ;;  %v6797_v31 = vld [vmem:[#allocation31_spill] sm:$0xff] }
 0x409   : > { %v2876_v46 = vadd.f32 %v2865_v36, %v6340_v22  ;;  %v2994_v48 = vpop.f32.mrf.mxu1  ;;  %v3659_v22 = vshll.u32 %v5044_v44, 16  ;;  %v6798_v27 = vmax.f32 %v6796_v11, %v6797_v31 }
 0x40a   : > { %v6452_v59 = vmax.f32 %v6792_v60, %v3205_v10  ;;  %v3663_v10 = vshrl.u32 %v5044_v44, 16  ;;  %v6800_v44 = vld [vmem:[#allocation16_spill] sm:$0xff] }
 0x40b   : > { %v3005_v8 = vadd.f32 %v2994_v48, %v2876_v46  ;;  %4812 = vmatmul.msk.bf16.gmra.mxu0 %vm246_vm1, %v6793_v16  ;;  %4836 = vmatmul.msk.bf16.gmra.mxu3 %vm246_vm1, %v6794_v35  ;;  %v3661_v63 = vrot.slane %v3659_v22, 1 }
 0x40c   : > { %4820 = vmatmul.msk.bf16.gmra.mxu1 %vm246_vm1, %v6795_v58 }
 0x40d   : > { %v3662_v37 = vsel %vm486_vm2, %v3657_v2, %v3661_v63 }
 0x40e   : > { %v6462_v3 = vpop.f32.mrf.mxu3 }
 0x40f   : > { %v3193_v25 = vpop.f32.mrf.mxu2 }
 0x410   : > { %v2867_v34 = vpop.f32.mrf.mxu0 }
 0x411   : > { %v2996_v4 = vpop.f32.mrf.mxu1 }
 0x414   : > { %4828 = vmatmul.msk.bf16.gmra.mxu2 %vm246_vm1, %v6187_v1  ;;  %v5045_v1 = vld [vmem:[%s5317_s26 + $0x108] sm:$0xff] }
 0x415   : > { %v3667_v36 = vshll.u32 %v5045_v1, 16  ;;  %v3671_v51 = vshrl.u32 %v5045_v1, 16 }
 0x416   : > { %v3254_v14 = vpop.f32.mrf.mxu3 }
 0x417   : > { %v3195_v56 = vpop.f32.mrf.mxu2  ;;  %v3669_v28 = vrot.slane %v3667_v36, 1 }
 0x418   : > { %v3206_v54 = vadd.f32 %v3195_v56, %v3005_v8  ;;  %v3265_v23 = vpop.f32.mrf.mxu0 }
 0x419   : > { %v3266_v57 = vadd.f32 %v3265_v23, %v6348_v29  ;;  %v3306_v41 = vpop.f32.mrf.mxu1  ;;  %v3665_v29 = vor.u32 %v3663_v10, %v3661_v63  ;;  %v3673_v4 = vor.u32 %v3671_v51, %v3669_v28 }
 0x41a   : > { %v6470_v40 = vmax.f32 %v6798_v27, %v3206_v54  ;;  %v6802_v27 = vld [vmem:[#allocation17_spill] sm:$0xff] }
 0x41b   : > { %v3338_v45 = vadd.f32 %v3306_v41, %v3266_v57  ;;  %4837 = vmatmul.msk.bf16.vlgmr.msra.gmra.mxu0 %vm246_vm1, %v6799_v12  ;;  %4910 = vmatmul.msk.bf16.vlgmr.msra.gmra.mxu3 %vm246_vm1, %v3662_v37  ;;  %v3670_v8 = vsel %vm486_vm2, %v3665_v29, %v3669_v28  ;;  %v5047_v57 = vld [vmem:[%s5317_s26 + $0x118] sm:$0xff] }
 0x41c   : > { %4845 = vmatmul.msk.bf16.vlgmr.msra.gmra.mxu1 %vm246_vm1, %v6196_v43 }
 0x41e   : > { %v3404_v38 = vpop.f32.mrf.mxu3 }
 0x41f   : > { %v3197_v18 = vpop.f32.mrf.mxu2 }
 0x420   : > { %v3267_v62 = vpop.f32.mrf.mxu0  ;;  %v3683_v18 = vshll.u32 %v5047_v57, 16 }
 0x421   : > { %v3308_v13 = vpop.f32.mrf.mxu1 }
 0x422   : > { %v3685_v10 = vrot.slane %v3683_v18, 1 }
 0x424   : > { %4853 = vmatmul.msk.bf16.vlgmr.msra.gmra.mxu2 %vm246_vm1, %v6208_v53  ;;  %v5046_v53 = vld [vmem:[%s5317_s26 + $0x110] sm:$0xff] }
 0x425   : > { %v3675_v26 = vshll.u32 %v5046_v53, 16  ;;  %v3679_v1 = vshrl.u32 %v5046_v53, 16  ;;  %v3687_v53 = vshrl.u32 %v5047_v57, 16 }
 0x426   : > { %v3406_v60 = vpop.f32.mrf.mxu3 }
 0x427   : > { %v3355_v32 = vpop.f32.mrf.mxu2  ;;  %v3677_v2 = vrot.slane %v3675_v26, 1 }
 0x428   : > { %v3387_v46 = vadd.f32 %v3355_v32, %v3338_v45  ;;  %v3269_v48 = vpop.f32.mrf.mxu0 }
 0x429   : > { %v3270_v43 = vadd.f32 %v3269_v48, %v6364_v39  ;;  %v3310_v16 = vpop.f32.mrf.mxu1  ;;  %v6801_v39 = vld [vmem:[#allocation32_spill] sm:$0xff]  ;;  %v3678_v23 = vsel %vm486_vm2, %v3673_v4, %v3677_v2  ;;  %v3681_v62 = vor.u32 %v3679_v1, %v3677_v2 }
 0x42a   : > { %v6483_v35 = vadd.f32 %v3404_v38, %v3387_v46 }
 0x42b   : > { %v3339_v58 = vadd.f32 %v3310_v16, %v3270_v43  ;;  %4838 = vmatmul.msk.bf16.gmra.mxu0 %vm246_vm1, %v6800_v44  ;;  %4911 = vmatmul.msk.bf16.gmra.mxu3 %vm246_vm1, %v3670_v8  ;;  %v3686_v32 = vsel %vm486_vm2, %v3681_v62, %v3685_v10  ;;  %v6804_v8 = vld [vmem:[#allocation18_spill] sm:$0xff]  ;;  %v5048_v43 = vld [vmem:[%s5317_s26 + $0x120] sm:$0xff] }
 0x42c   : > { %4846 = vmatmul.msk.bf16.gmra.mxu1 %vm246_vm1, %v6216_v50 }
 0x42e   : > { %v3408_v25 = vpop.f32.mrf.mxu3 }
 0x42f   : > { %v3357_v15 = vpop.f32.mrf.mxu2 }
 0x430   : > { %v3271_v34 = vpop.f32.mrf.mxu0  ;;  %v3691_v15 = vshll.u32 %v5048_v43, 16 }
 0x431   : > { %v3312_v22 = vpop.f32.mrf.mxu1  ;;  %v3689_v34 = vor.u32 %v3687_v53, %v3685_v10 }
 0x432   : > { %v3693_v51 = vrot.slane %v3691_v15, 1 }
 0x434   : > { %4854 = vmatmul.msk.bf16.gmra.mxu2 %vm246_vm1, %v6801_v39  ;;  %v3694_v2 = vsel %vm486_vm2, %v3689_v34, %v3693_v51 }
 0x436   : > { %v3410_v56 = vpop.f32.mrf.mxu3 }
 0x437   : > { %v3359_v63 = vpop.f32.mrf.mxu2 }
 0x438   : > { %v3388_v14 = vadd.f32 %v3359_v63, %v3339_v58  ;;  %v3273_v54 = vpop.f32.mrf.mxu0 }
 0x439   : > { %v3274_v50 = vadd.f32 %v3273_v54, %v6380_v6  ;;  %v3314_v37 = vpop.f32.mrf.mxu1  ;;  %v6803_v6 = vld [vmem:[#allocation33_spill] sm:$0xff]  ;;  %v6806_v54 = vld [vmem:[#allocation20_spill] sm:$0xff] }
 0x43a   : > { %v6495_v11 = vadd.f32 %v3408_v25, %v3388_v14 }
 0x43b   : > { %v3340_v31 = vadd.f32 %v3314_v37, %v3274_v50  ;;  %4839 = vmatmul.msk.bf16.gmra.mxu0 %vm246_vm1, %v6802_v27  ;;  %4912 = vmatmul.msk.bf16.gmra.mxu3 %vm246_vm1, %v3678_v23  ;;  %v5049_v23 = vld [vmem:[%s5317_s26 + $0x128] sm:$0xff]  ;;  %v3695_v27 = vshrl.u32 %v5048_v43, 16 }
 0x43c   : > { %4847 = vmatmul.msk.bf16.gmra.mxu1 %vm246_vm1, %v6234_v55  ;;  %v3699_v57 = vshll.u32 %v5049_v23, 16 }
 0x43e   : > { %v3412_v45 = vpop.f32.mrf.mxu3 }
 0x43f   : > { %v3361_v41 = vpop.f32.mrf.mxu2 }
 0x440   : > { %v3275_v12 = vpop.f32.mrf.mxu0 }
 0x441   : > { %v3316_v38 = vpop.f32.mrf.mxu1 }
 0x444   : > { %4855 = vmatmul.msk.bf16.gmra.mxu2 %vm246_vm1, %v6803_v6 }
 0x446   : > { %v3414_v13 = vpop.f32.mrf.mxu3 }
 0x447   : > { %v3363_v36 = vpop.f32.mrf.mxu2  ;;  %v6807_v13 = vld [vmem:[#allocation5_spill] sm:$0xff] }
 0x448   : > { %v3389_v29 = vadd.f32 %v3363_v36, %v3340_v31  ;;  %v3277_v28 = vpop.f32.mrf.mxu0 }
 0x449   : > { %v3278_v55 = vadd.f32 %v3277_v28, %v6396_v49  ;;  %v3318_v60 = vpop.f32.mrf.mxu1  ;;  %v6805_v49 = vld [vmem:[#allocation34_spill] sm:$0xff] }
 0x44a   : > { %v6507_v46 = vadd.f32 %v3412_v45, %v3389_v29  ;;  %v3701_v45 = vrot.slane %v3699_v57, 1  ;;  %v5050_v29 = vld [vmem:[%s5317_s26 + $0x130] sm:$0xff] }
 0x44b   : > { %v3341_v48 = vadd.f32 %v3318_v60, %v3278_v55  ;;  %4840 = vmatmul.msk.bf16.gmra.mxu0 %vm246_vm1, %v6804_v8  ;;  %4913 = vmatmul.msk.bf16.gmra.mxu3 %vm246_vm1, %v3686_v32  ;;  %v3703_v60 = vshrl.u32 %v5049_v23, 16  ;;  %v6809_v8 = vld [vmem:[#allocation36_spill] sm:$0xff]  ;;  %v3711_v23 = vshrl.u32 %v5050_v29, 16 }
 0x44c   : > { %4848 = vmatmul.msk.bf16.gmra.mxu1 %vm246_vm1, %v6252_v61 }
 0x44d   : > { %v3705_v43 = vor.u32 %v3703_v60, %v3701_v45 }
 0x44e   : > { %v3416_v58 = vpop.f32.mrf.mxu3 }
 0x44f   : > { %v3365_v16 = vpop.f32.mrf.mxu2 }
 0x450   : > { %v3279_v44 = vpop.f32.mrf.mxu0 }
 0x451   : > { %v3320_v25 = vpop.f32.mrf.mxu1 }
 0x454   : > { %4856 = vmatmul.msk.bf16.gmra.mxu2 %vm246_vm1, %v6805_v49 }
 0x456   : > { %v3418_v22 = vpop.f32.mrf.mxu3 }
 0x457   : > { %v3367_v26 = vpop.f32.mrf.mxu2 }
 0x458   : > { %v3390_v39 = vadd.f32 %v3367_v26, %v3341_v48  ;;  %v3281_v4 = vpop.f32.mrf.mxu0  ;;  %v3707_v48 = vshll.u32 %v5050_v29, 16 }
 0x459   : > { %v3282_v61 = vadd.f32 %v3281_v4, %v6412_v47  ;;  %v3322_v63 = vpop.f32.mrf.mxu1  ;;  %v3697_v47 = vor.u32 %v3695_v27, %v3693_v51  ;;  %v6810_v4 = vld [vmem:[#allocation24_spill] sm:$0xff] }
 0x45a   : > { %v6519_v56 = vadd.f32 %v3416_v58, %v3390_v39  ;;  %v3709_v16 = vrot.slane %v3707_v48, 1  ;;  %v4877_v58 = vld [vmem:[%s5317_s26 + $0x138] sm:$0x1]  ;;  %s5147_s26 = scalar_lea.hbm %s6645_s3, 128 }
 0x45b   : > { %v3342_v14 = vadd.f32 %v3322_v63, %v3282_v61  ;;  %4841 = vmatmul.msk.bf16.gmra.mxu0 %vm246_vm1, %v6806_v54  ;;  %4914 = vmatmul.msk.bf16.gmra.mxu3 %vm246_vm1, %v3694_v2  ;;  %v3702_v6 = vsel %vm486_vm2, %v3697_v47, %v3701_v45  ;;  %v3641_v34 = vunpack.c.l.b16 %v4877_v58  ;;  %v6811_v2 = vld [vmem:[#allocation37_spill] sm:$0xff]  ;;  %p5149_p1 = scmp.lt.s32.totalorder %s5147_s26, %s5143_s20 }
 0x45c   : > { %4849 = vmatmul.msk.bf16.gmra.mxu1 %vm246_vm1, %v6270_v5  ;;  %v3710_v49 = vsel %vm486_vm2, %v3705_v43, %v3709_v16 }
 0x45d   : > { %v3650_v61 = vpack.c.b16 %v3641_v34, %v3641_v34  ;;  %p5150_p2 = por %p5149_p1, %p5148_p0 }
 0x45e   : > { %v3420_v37 = vpop.f32.mrf.mxu3 }
 0x45f   : > { %v3369_v50 = vpop.f32.mrf.mxu2  ;;  %p5151_p3 = pnand %p5150_p2, %p5146_p13 }
 0x460   : > { %v3283_v31 = vpop.f32.mrf.mxu0  ;;  %v3715_v50 = vshll.u32 %v3650_v61, 16 }
 0x461   : > { %v3324_v41 = vpop.f32.mrf.mxu1 }
 0x462   : > { %v3717_v31 = vrot.slane %v3715_v50, 1 }
 0x464   : > { %4857 = vmatmul.msk.bf16.gmra.mxu2 %vm246_vm1, %v6281_v52  ;;  %v6808_v52 = vld [vmem:[#allocation35_spill] sm:$0xff] }
 0x466   : > { %v3422_v1 = vpop.f32.mrf.mxu3 }
 0x467   : > { %v3371_v12 = vpop.f32.mrf.mxu2 }
 0x468   : > { %v3391_v18 = vadd.f32 %v3371_v12, %v3342_v14  ;;  %v3285_v38 = vpop.f32.mrf.mxu0 }
 0x469   : > { %v3286_v5 = vadd.f32 %v3285_v38, %v6428_v21  ;;  %v3326_v62 = vpop.f32.mrf.mxu1 }
 0x46a   : > { %v6531_v10 = vadd.f32 %v3420_v37, %v3391_v18 }
 0x46b   : > { %v3343_v36 = vadd.f32 %v3326_v62, %v3286_v5  ;;  %4842 = vmatmul.msk.bf16.gmra.mxu0 %vm246_vm1, %v6807_v13  ;;  %4915 = vmatmul.msk.bf16.gmra.mxu3 %vm246_vm1, %v3702_v6  ;;  %v6812_v6 = vld [vmem:[#allocation26_spill] sm:$0xff] }
 0x46c   : > { %4850 = vmatmul.msk.bf16.gmra.mxu1 %vm246_vm1, %v6808_v52 }
 0x46e   : > { %v3424_v32 = vpop.f32.mrf.mxu3 }
 0x46f   : > { %v3373_v28 = vpop.f32.mrf.mxu2 }
 0x470   : > { %v3287_v55 = vpop.f32.mrf.mxu0 }
 0x471   : > { %v3328_v21 = vpop.f32.mrf.mxu1 }
 0x474   : > { %4858 = vmatmul.msk.bf16.gmra.mxu2 %vm246_vm1, %v6809_v8 }
 0x476   : > { %v3426_v53 = vpop.f32.mrf.mxu3 }
 0x477   : > { %v3375_v44 = vpop.f32.mrf.mxu2  ;;  %v6571_v53 = vld [vmem:[%s6644_s2] ss:$0 sm:$0xff] }
 0x478   : > { %v3392_v15 = vadd.f32 %v3375_v44, %v3343_v36  ;;  %v3289_v25 = vpop.f32.mrf.mxu0 }
 0x479   : > { %v3290_v51 = vadd.f32 %v3289_v25, %v6444_v7  ;;  %v3330_v26 = vpop.f32.mrf.mxu1  ;;  %v3713_v7 = vor.u32 %v3711_v23, %v3709_v16 }
 0x47a   : > { %v6544_v22 = vadd.f32 %v3424_v32, %v3392_v15 }
 0x47b   : > { %v3344_v39 = vadd.f32 %v3330_v26, %v3290_v51  ;;  %4843 = vmatmul.msk.bf16.gmra.mxu0 %vm246_vm1, %v6810_v4  ;;  %4916 = vmatmul.msk.bf16.gmra.mxu3 %vm246_vm1, %v3710_v49  ;;  %v3718_v45 = vsel %vm486_vm2, %v3713_v7, %v3717_v31 }
 0x47c   : > { %4851 = vmatmul.msk.bf16.gmra.mxu1 %vm246_vm1, %v6811_v2 }
 0x47e   : > { %v3428_v14 = vpop.f32.mrf.mxu3 }
 0x47f   : > { %v3377_v63 = vpop.f32.mrf.mxu2 }
 0x480   : > { %v3291_v54 = vpop.f32.mrf.mxu0 }
 0x481   : > { %v3332_v37 = vpop.f32.mrf.mxu1 }
 0x484   : > { %4859 = vmatmul.msk.bf16.gmra.mxu2 %vm246_vm1, %v6318_v19 }
 0x486   : > { %v3430_v57 = vpop.f32.mrf.mxu3 }
 0x487   : > { %v3379_v27 = vpop.f32.mrf.mxu2 }
 0x488   : > { %v3393_v41 = vadd.f32 %v3379_v27, %v3344_v39  ;;  %v3293_v47 = vpop.f32.mrf.mxu0 }
 0x489   : > { %v3294_v12 = vadd.f32 %v3293_v47, %v6462_v3  ;;  %v3334_v1 = vpop.f32.mrf.mxu1 }
 0x48a   : > { %v6555_v18 = vadd.f32 %v3428_v14, %v3393_v41 }
 0x48b   : > { %v3345_v38 = vadd.f32 %v3334_v1, %v3294_v12  ;;  %4844 = vmatmul.msk.bf16.gmra.mxu0 %vm246_vm1, %v6812_v6  ;;  %4917 = vmatmul.msk.bf16.gmra.mxu3 %vm246_vm1, %v3718_v45 }
 0x48c   : > { %4852 = vmatmul.msk.bf16.gmra.mxu1 %vm246_vm1, %v6324_v30 }
 0x48e   : > { %v3432_v5 = vpop.f32.mrf.mxu3 }
 0x48f   : > { %v3381_v19 = vpop.f32.mrf.mxu2 }
 0x490   : > { %v3295_v62 = vpop.f32.mrf.mxu0 }
 0x491   : > { %v3336_v36 = vpop.f32.mrf.mxu1 }
 0x494   : > { %4860 = vmatmul.msk.bf16.gmra.mxu2 %vm246_vm1, %v6335_v0 }
 0x496   : > { %v3434_v13 = vpop.f32.mrf.mxu3 }
 0x497   : > { %v3383_v3 = vpop.f32.mrf.mxu2 }
 0x498   : > { %v3394_v52 = vadd.f32 %v3383_v3, %v3345_v38  ;;  %v3453_v29 = vpop.f32.mrf.mxu0 }
 0x499   : > { %v3502_v28 = vpop.f32.mrf.mxu1  ;;  %v3485_v30 = vadd.f32 %v3453_v29, %v6483_v35 }
 0x49a   : > { %v6564_v32 = vadd.f32 %v3432_v5, %v3394_v52 }
 0x49b   : > { %v3534_v8 = vadd.f32 %v3502_v28, %v3485_v30 }
 0x49e   : > { %v3752_v60 = vpop.f32.mrf.mxu3 }
 0x49f   : > { %v3385_v55 = vpop.f32.mrf.mxu2 }
 0x4a0   : > { %v3455_v48 = vpop.f32.mrf.mxu0 }
 0x4a1   : > { %v3504_v21 = vpop.f32.mrf.mxu1 }
 0x4a6   : > { %v3754_v16 = vpop.f32.mrf.mxu3 }
 0x4a7   : > { %v3551_v43 = vpop.f32.mrf.mxu2 }
 0x4a8   : > { %v3583_v58 = vadd.f32 %v3551_v43, %v3534_v8  ;;  %v3457_v0 = vpop.f32.mrf.mxu0 }
 0x4a9   : > { %v3506_v15 = vpop.f32.mrf.mxu1  ;;  %v3486_v39 = vadd.f32 %v3457_v0, %v6495_v11 }
 0x4aa   : > { %v3784_v44 = vadd.f32 %v3752_v60, %v3583_v58 }
 0x4ab   : > { %v3535_v2 = vadd.f32 %v3506_v15, %v3486_v39 }
 0x4ac   : > { %v3792_v25 = vmax.f32 %v6355_v17, %v3784_v44 }
 0x4ae   : > { %v3804_v35 = vadd.f32 %v6571_v53, %v3792_v25  ;;  %v3756_v34 = vpop.f32.mrf.mxu3 }
 0x4af   : > { %v3553_v49 = vpop.f32.mrf.mxu2 }
 0x4b0   : > { %v3812_v51 = vmax.f32 %v3804_v35, 0.0  ;;  %v3459_v26 = vpop.f32.mrf.mxu0 }
 0x4b1   : > { %v3508_v4 = vpop.f32.mrf.mxu1 }
 0x4b2   : > { %3820 = vst [vmem:[%s6577_s6] sm:$0xff] %v3812_v51 }
 0x4b6   : > { %v3758_v63 = vpop.f32.mrf.mxu3 }
 0x4b7   : > { %v3555_v61 = vpop.f32.mrf.mxu2 }
 0x4b8   : > { %v3584_v14 = vadd.f32 %v3555_v61, %v3535_v2  ;;  %v3461_v54 = vpop.f32.mrf.mxu0 }
 0x4b9   : > { %v3510_v23 = vpop.f32.mrf.mxu1  ;;  %v3487_v11 = vadd.f32 %v3461_v54, %v6507_v46 }
 0x4ba   : > { %v3785_v17 = vadd.f32 %v3756_v34, %v3584_v14 }
 0x4bb   : > { %v3536_v47 = vadd.f32 %v3510_v23, %v3487_v11 }
 0x4bc   : > { %v3793_v50 = vmax.f32 %v6371_v20, %v3785_v17 }
 0x4be   : > { %v3805_v37 = vadd.f32 %v6571_v53, %v3793_v50  ;;  %v3760_v31 = vpop.f32.mrf.mxu3 }
 0x4bf   : > { %v3557_v7 = vpop.f32.mrf.mxu2 }
 0x4c0   : > { %v3813_v27 = vmax.f32 %v3805_v37, 0.0  ;;  %v3463_v57 = vpop.f32.mrf.mxu0 }
 0x4c1   : > { %v3512_v41 = vpop.f32.mrf.mxu1 }
 0x4c2   : > { %3821 = vst [vmem:[%s6577_s6 + $0x8] sm:$0xff] %v3813_v27 }
 0x4c6   : > { %v3762_v12 = vpop.f32.mrf.mxu3 }
 0x4c7   : > { %v3559_v45 = vpop.f32.mrf.mxu2 }
 0x4c8   : > { %v3585_v1 = vadd.f32 %v3559_v45, %v3536_v47  ;;  %v3465_v38 = vpop.f32.mrf.mxu0 }
 0x4c9   : > { %v3514_v19 = vpop.f32.mrf.mxu1  ;;  %v3488_v46 = vadd.f32 %v3465_v38, %v6519_v56 }
 0x4ca   : > { %v3786_v6 = vadd.f32 %v3760_v31, %v3585_v1 }
 0x4cb   : > { %v3537_v29 = vadd.f32 %v3514_v19, %v3488_v46 }
 0x4cc   : > { %v3794_v20 = vmax.f32 %v6387_v9, %v3786_v6 }
 0x4ce   : > { %v3806_v5 = vadd.f32 %v6571_v53, %v3794_v20  ;;  %v3764_v36 = vpop.f32.mrf.mxu3 }
 0x4cf   : > { %v3561_v62 = vpop.f32.mrf.mxu2 }
 0x4d0   : > { %v3814_v3 = vmax.f32 %v3806_v5, 0.0  ;;  %v3467_v13 = vpop.f32.mrf.mxu0 }
 0x4d1   : > { %v3516_v52 = vpop.f32.mrf.mxu1 }
 0x4d2   : > { %3822 = vst [vmem:[%s6577_s6 + $0x10] sm:$0xff] %v3814_v3 }
 0x4d6   : > { %v3766_v55 = vpop.f32.mrf.mxu3 }
 0x4d7   : > { %v3563_v28 = vpop.f32.mrf.mxu2 }
 0x4d8   : > { %v3586_v60 = vadd.f32 %v3563_v28, %v3537_v29  ;;  %v3469_v48 = vpop.f32.mrf.mxu0 }
 0x4d9   : > { %v3518_v21 = vpop.f32.mrf.mxu1  ;;  %v3489_v56 = vadd.f32 %v3469_v48, %v6531_v10 }
 0x4da   : > { %v3787_v30 = vadd.f32 %v3764_v36, %v3586_v60 }
 0x4db   : > { %v3538_v15 = vadd.f32 %v3518_v21, %v3489_v56 }
 0x4dc   : > { %v3795_v9 = vmax.f32 %v6403_v42, %v3787_v30 }
 0x4de   : > { %v3807_v8 = vadd.f32 %v6571_v53, %v3795_v9  ;;  %v3768_v16 = vpop.f32.mrf.mxu3 }
 0x4df   : > { %v3565_v43 = vpop.f32.mrf.mxu2 }
 0x4e0   : > { %v3815_v58 = vmax.f32 %v3807_v8, 0.0  ;;  %v3471_v0 = vpop.f32.mrf.mxu0 }
 0x4e1   : > { %v3520_v44 = vpop.f32.mrf.mxu1 }
 0x4e2   : > { %3823 = vst [vmem:[%s6577_s6 + $0x18] sm:$0xff] %v3815_v58 }
 0x4e6   : > { %v3770_v35 = vpop.f32.mrf.mxu3 }
 0x4e7   : > { %v3567_v25 = vpop.f32.mrf.mxu2 }
 0x4e8   : > { %v3587_v49 = vadd.f32 %v3567_v25, %v3538_v15  ;;  %v3473_v34 = vpop.f32.mrf.mxu0 }
 0x4e9   : > { %v3522_v26 = vpop.f32.mrf.mxu1  ;;  %v3490_v10 = vadd.f32 %v3473_v34, %v6544_v22 }
 0x4ea   : > { %v3788_v51 = vadd.f32 %v3768_v16, %v3587_v49 }
 0x4eb   : > { %v3539_v54 = vadd.f32 %v3522_v26, %v3490_v10 }
 0x4ec   : > { %v3796_v42 = vmax.f32 %v6419_v33, %v3788_v51 }
 0x4ee   : > { %v3808_v39 = vadd.f32 %v6571_v53, %v3796_v42  ;;  %v3772_v2 = vpop.f32.mrf.mxu3 }
 0x4ef   : > { %v3569_v4 = vpop.f32.mrf.mxu2 }
 0x4f0   : > { %v3816_v61 = vmax.f32 %v3808_v39, 0.0  ;;  %v3475_v63 = vpop.f32.mrf.mxu0 }
 0x4f1   : > { %v3524_v14 = vpop.f32.mrf.mxu1 }
 0x4f2   : > { %3824 = vst [vmem:[%s6577_s6 + $0x20] sm:$0xff] %v3816_v61 }
 0x4f6   : > { %v3774_v23 = vpop.f32.mrf.mxu3 }
 0x4f7   : > { %v3571_v17 = vpop.f32.mrf.mxu2 }
 0x4f8   : > { %v3588_v50 = vadd.f32 %v3571_v17, %v3539_v54  ;;  %v3477_v37 = vpop.f32.mrf.mxu0 }
 0x4f9   : > { %v3526_v31 = vpop.f32.mrf.mxu1  ;;  %v3491_v22 = vadd.f32 %v3477_v37, %v6555_v18 }
 0x4fa   : > { %v3789_v7 = vadd.f32 %v3772_v2, %v3588_v50 }
 0x4fb   : > { %v3540_v12 = vadd.f32 %v3526_v31, %v3491_v22 }
 0x4fc   : > { %v3797_v33 = vmax.f32 %v6435_v24, %v3789_v7 }
 0x4fe   : > { %v3809_v27 = vadd.f32 %v6571_v53, %v3797_v33  ;;  %v3776_v11 = vpop.f32.mrf.mxu3 }
 0x4ff   : > { %v3573_v57 = vpop.f32.mrf.mxu2 }
 0x500   : > { %v3817_v41 = vmax.f32 %v3809_v27, 0.0  ;;  %v3479_v47 = vpop.f32.mrf.mxu0 }
 0x501   : > { %v3528_v45 = vpop.f32.mrf.mxu1 }
 0x502   : > { %3825 = vst [vmem:[%s6577_s6 + $0x28] sm:$0xff] %v3817_v41 }
 0x506   : > { %v3778_v38 = vpop.f32.mrf.mxu3 }
 0x507   : > { %v3575_v1 = vpop.f32.mrf.mxu2 }
 0x508   : > { %v3589_v6 = vadd.f32 %v3575_v1, %v3540_v12  ;;  %v3481_v19 = vpop.f32.mrf.mxu0 }
 0x509   : > { %v3530_v5 = vpop.f32.mrf.mxu1  ;;  %v3492_v18 = vadd.f32 %v3481_v19, %v6564_v32 }
 0x50a   : > { %v3790_v20 = vadd.f32 %v3776_v11, %v3589_v6 }
 0x50b   : > { %v3541_v29 = vadd.f32 %v3530_v5, %v3492_v18 }
 0x50c   : > { %v3798_v24 = vmax.f32 %v6452_v59, %v3790_v20 }
 0x50e   : > { %v3810_v62 = vadd.f32 %v6571_v53, %v3798_v24  ;;  %v3780_v3 = vpop.f32.mrf.mxu3 }
 0x50f   : > { %v3577_v36 = vpop.f32.mrf.mxu2 }
 0x510   : > { %v3818_v13 = vmax.f32 %v3810_v62, 0.0  ;;  %v3483_v46 = vpop.f32.mrf.mxu0 }
 0x511   : > { %v3532_v52 = vpop.f32.mrf.mxu1 }
 0x512   : > { %3826 = vst [vmem:[%s6577_s6 + $0x30] sm:$0xff] %v3818_v13 }
 0x516   : > { %v3782_v55 = vpop.f32.mrf.mxu3 }
 0x517   : > { %v3579_v28 = vpop.f32.mrf.mxu2 }
 0x518   : > { %v3590_v60 = vadd.f32 %v3579_v28, %v3541_v29 }
 0x51a   : > { %v3791_v59 = vadd.f32 %v3780_v3, %v3590_v60 }
 0x51c   : > { %v3799_v48 = vmax.f32 %v6470_v40, %v3791_v59 }
 0x51e   : > { %v3811_v32 = vadd.f32 %v6571_v53, %v3799_v48 }
 0x51f   : > { %v3581_v30 = vpop.f32.mrf.mxu2 }
 0x520   : > { %v3819_v21 = vmax.f32 %v3811_v32, 0.0 }
 0x522   : > { %3827 = vst [vmem:[%s6577_s6 + $0x38] sm:$0xff] %v3819_v21 }
 0x523   : > { %5154 = shalt.err (!%p5151_p3)
}
 0x524   : > { %s5191_s29 = smov 128   ;;  %s5192_s30 = smov 8  }
 0x525   : > { %5053 = dma.vmem_to_hbm [thread:$0]  (%p5251_p5), %s3842_s11, 1024, %s3844_s17, %s3829_s16, %s5191_s29, %s5191_s29, %s5192_s30  }
 0x526 PF: > { %p5059_p4 = scmp.ge.s32.totalorder %s5189_s15, 2  ;;  %s3858_s4 = sand.u32 1, %s5177_s12  }
 0x527   : > { %s3859_s5 = scalar_lea.sflag [#allocation3], %s3858_s4 }
 0x528   : > { %p5056_p7 = pnand %p5059_p4, %p5255_p6 }
 0x52a   : > { %p5057_p8 = pneg %p5056_p7 }
 0x52c   : > { %5172 = dma.done.wait (%p5057_p8), %s3859_s5, 1024  }
 0x52d   : > { %5174 = vsyncadd (%p5057_p8), %s3859_s5, 4294966272  ;;  %p13_p9 = scmp.ge.s32.totalorder %s5238_s18, 4   ;;  %s6813_s12 = smov %s5181_s13 }
 0x52e   : > { %s6814_s13 = smov %s5185_s14  ;;  %s6815_s14 = smov %s5249_s21 }
 0x52f   : > { %s6816_s15 = smov %s5238_s18  ;;  %15 = sbr.rel (!%p13_p9) target bundleno = 3 (0x3), region = 78 }
 0x534   :  { %3865 = vsyncpa [#allocation3], 1 }
 0x535   :  { %3867 = vsyncpa [#allocation3 + $0x1], 1 }

</bundles_post_ra>
